<compile_context>
chip_gen: v7x
topology: tpu7x:2x2x1
jax: 0.10.0
libtpu: 0.0.40
codegen_flags: <defaults>
</compile_context>

<pallas_src>
import math
from functools import partial

import jax
import jax.numpy as jnp
from jax import lax
from jax.experimental import pallas as pl
from jax.experimental.pallas import tpu as pltpu

_LANE = 128
_LN_EPS = 1e-5


def _ceil_to(x, m):
    return ((x + m - 1) // m) * m


def _pad_to(x, shape):
    return jnp.pad(x, [(0, t - s) for s, t in zip(x.shape, shape)])


# ---------------- in-kernel LayerNorm over the first n_real (zero-padded) lanes ---------------
def _layer_norm_padded(x, gamma, beta, n_real):
    # Padded lanes of x / gamma / beta are exactly zero, so plain lane-sums divided by n_real
    # give the true mean and E[x^2]; the output keeps zeros in the padded lanes.
    s1 = jnp.sum(x, axis=-1, keepdims=True)
    s2 = jnp.sum(x * x, axis=-1, keepdims=True)
    mu = s1 * (1.0 / n_real)
    var = s2 * (1.0 / n_real) - mu * mu
    return (x - mu) * lax.rsqrt(var + _LN_EPS) * gamma + beta


# -------------------- fused embed + n_layers TransformerEncoderLayer kernel -------------------
def _fused_transformer_kernel(
        src_ref,                      # (1, T, I_pad)     read only at l==0
        enc_w_ref, enc_b_ref,         # (I_pad, E_pad), (1, E_pad)
        enc_g_ref, enc_bt_ref,        # (1, E_pad)
        wq_ref, wk_ref, wv_ref,       # (1, H, E_pad, Dh_pad)   head-major
        bq_ref, bk_ref, bv_ref,       # (1, H, 1, Dh_pad)
        wo_ref, bo_ref,               # (1, H*Dh_pad, E_pad), (1, 1, E_pad)
        g1_ref, bt1_ref,              # (1, 1, E_pad)
        w1_ref, b1_ref,               # (1, E_pad, F_pad), (1, 1, F_pad)
        w2_ref, b2_ref,               # (1, F_pad, E_pad), (1, 1, E_pad)
        g2_ref, bt2_ref,              # (1, 1, E_pad)
        o_ref,                        # (1, T, E_pad)     written only at the last layer
        x_ref,                        # VMEM scratch (T, E_pad): layer-resident activation
        *, n_heads, n_units, head_dim):
    layer = pl.program_id(1)
    n_layers = pl.num_programs(1)
    dh_pad = wq_ref.shape[-1]
    scale = 1.0 / math.sqrt(head_dim)

    # ---- step 0: input embedding Linear(in_size, n_units) + LayerNorm ----
    @pl.when(layer == 0)
    def _embed():
        x0 = jnp.dot(src_ref[0], enc_w_ref[...],
                     preferred_element_type=jnp.float32) + enc_b_ref[...]
        x_ref[...] = _layer_norm_padded(x0, enc_g_ref[...], enc_bt_ref[...], n_units)

    x = x_ref[...]                                           # (T, E_pad), resident in VMEM

    # ---- multi-head self-attention (no mask, eval-mode dropout = identity) ----
    ctx_parts = []
    for h in range(n_heads):            # heads are leading-axis indexed: no lane slicing
        qh = jnp.dot(x, wq_ref[0, h], preferred_element_type=jnp.float32) + bq_ref[0, h]
        kh = jnp.dot(x, wk_ref[0, h], preferred_element_type=jnp.float32) + bk_ref[0, h]
        vh = jnp.dot(x, wv_ref[0, h], preferred_element_type=jnp.float32) + bv_ref[0, h]
        # scores = q @ k^T without an explicit transpose
        s = lax.dot_general(qh, kh, (((1,), (1,)), ((), ())),
                            preferred_element_type=jnp.float32) * scale      # (T, T)
        s = s - jnp.max(s, axis=-1, keepdims=True)
        p = jnp.exp(s)
        p = p * pl.reciprocal(jnp.sum(p, axis=-1, keepdims=True), approx=True)
        ctx_parts.append(jnp.dot(p, vh, preferred_element_type=jnp.float32))  # (T, Dh_pad)
    # Each head block is 128-lane aligned -> concat is pure vreg placement; ONE projection matmul.
    ctx = jnp.concatenate(ctx_parts, axis=-1)                 # (T, H*Dh_pad)
    attn = jnp.dot(ctx, wo_ref[0], preferred_element_type=jnp.float32) + bo_ref[0]

    # ---- residual + norm1, feed-forward (ReLU), residual + norm2 (post-norm layout) ----
    y = _layer_norm_padded(x + attn, g1_ref[0], bt1_ref[0], n_units)
    hid = jnp.maximum(jnp.dot(y, w1_ref[0], preferred_element_type=jnp.float32)
                      + b1_ref[0], 0.0)
    ffn = jnp.dot(hid, w2_ref[0], preferred_element_type=jnp.float32) + b2_ref[0]
    out = _layer_norm_padded(y + ffn, g2_ref[0], bt2_ref[0], n_units)

    x_ref[...] = out                                          # stays resident for layer l+1

    @pl.when(layer == n_layers - 1)
    def _finalize():
        o_ref[0] = out                                        # single lane-dense HBM writeback


# ----------------------- host-side packing into padded / head-major layout --------------------
def pack_params(params, n_heads):
    I, E = params["enc_w"].shape
    L = len(params["layers"])
    F = params["layers"][0]["w1"].shape[1]
    H = n_heads
    Dh = E // H
    I_pad, E_pad = _ceil_to(I, _LANE), _ceil_to(E, _LANE)
    F_pad, Dh_pad = _ceil_to(F, _LANE), _ceil_to(Dh, _LANE)

    pk = dict(
        enc_w=_pad_to(params["enc_w"], (I_pad, E_pad)),
        enc_b=_pad_to(params["enc_b"].reshape(1, E), (1, E_pad)),
        enc_g=_pad_to(params["enc_norm_g"].reshape(1, E), (1, E_pad)),
        enc_bt=_pad_to(params["enc_norm_b"].reshape(1, E), (1, E_pad)),
    )

    def head_w(w):                                    # (E, E) -> (H, E_pad, Dh_pad)
        return _pad_to(w.reshape(E, H, Dh).transpose(1, 0, 2), (H, E_pad, Dh_pad))

    def head_b(b):                                    # (E,)   -> (H, 1, Dh_pad)
        return _pad_to(b.reshape(H, 1, Dh), (H, 1, Dh_pad))

    def vec(v, n, n_pad):                             # (n,)/(1,n) -> (1, n_pad)
        return _pad_to(v.reshape(1, n), (1, n_pad))

    def pack_layer(lp):
        qw, kw, vw = jnp.split(lp["wqkv"], 3, axis=1)
        qb, kb, vb = jnp.split(lp["bqkv"].reshape(-1), 3)
        wo = _pad_to(lp["wo"].reshape(H, Dh, E), (H, Dh_pad, E_pad)).reshape(H * Dh_pad, E_pad)
        return dict(
            wq=head_w(qw), wk=head_w(kw), wv=head_w(vw),
            bq=head_b(qb), bk=head_b(kb), bv=head_b(vb),
            wo=wo, bo=vec(lp["bo"], E, E_pad),
            g1=vec(lp["g1"], E, E_pad), bt1=vec(lp["bt1"], E, E_pad),
            w1=_pad_to(lp["w1"], (E_pad, F_pad)), b1=vec(lp["b1"], F, F_pad),
            w2=_pad_to(lp["w2"], (F_pad, E_pad)), b2=vec(lp["b2"], E, E_pad),
            g2=vec(lp["g2"], E, E_pad), bt2=vec(lp["bt2"], E, E_pad),
        )

    per_layer = [pack_layer(lp) for lp in params["layers"]]
    for k in per_layer[0]:
        pk[k] = jnp.stack([pl_[k] for pl_ in per_layer], axis=0)   # leading n_layers axis
    return pk


# ----------------------------------- pallas_call wrapper --------------------------------------
def fused_forward_pallas(src_padded, pk, n_heads, n_units):
    B, T, I_pad = src_padded.shape
    L, H, E_pad, Dh_pad = pk["wq"].shape
    head_dim = n_units // n_heads

    def full_spec(a):                       # whole array resident, never refetched
        nd = a.ndim
        return pl.BlockSpec(a.shape, lambda b, l, _nd=nd: (0,) * _nd)

    def layer_spec(a):                      # leading n_layers axis indexed by grid axis 1
        nd = a.ndim
        return pl.BlockSpec((1,) + a.shape[1:], lambda b, l, _nd=nd: (l,) + (0,) * (_nd - 1))

    in_specs = [pl.BlockSpec((1, T, I_pad), lambda b, l: (b, 0, 0)),
                full_spec(pk["enc_w"]), full_spec(pk["enc_b"]),
                full_spec(pk["enc_g"]), full_spec(pk["enc_bt"])]
    layer_keys = ("wq", "wk", "wv", "bq", "bk", "bv", "wo", "bo",
                  "g1", "bt1", "w1", "b1", "w2", "b2", "g2", "bt2")
    in_specs += [layer_spec(pk[k]) for k in layer_keys]

    kernel = partial(_fused_transformer_kernel,
                     n_heads=n_heads, n_units=n_units, head_dim=head_dim)
    out = pl.pallas_call(
        kernel,
        out_shape=jax.ShapeDtypeStruct((B, T, E_pad), jnp.float32),
        grid=(B, L),
        in_specs=in_specs,
        out_specs=pl.BlockSpec((1, T, E_pad), lambda b, l: (b, 0, 0)),
        scratch_shapes=[pltpu.VMEM((T, E_pad), jnp.float32)],
        compiler_params=pltpu.CompilerParams(
            dimension_semantics=("parallel", "arbitrary"),
            vmem_limit_bytes=48 * 1024 * 1024),
    )(src_padded, pk["enc_w"], pk["enc_b"], pk["enc_g"], pk["enc_bt"],
      *[pk[k] for k in layer_keys])
    return out


def transformer_model_forward(src_list, params, n_heads, activation=None):
    """Equivalent of TransformerModel.forward(src) with has_mask=False, has_pos=False."""
    n_units = params["enc_w"].shape[1]
    # nn.utils.rnn.pad_sequence(src, padding_value=-1, batch_first=True)  (host-side glue)
    max_len = max(s.shape[0] for s in src_list)
    padded = [jnp.pad(s, ((0, max_len - s.shape[0]), (0, 0)), constant_values=-1.0)
              for s in src_list]
    src = jnp.stack(padded, axis=0).astype(jnp.float32)            # (B, T, in_size)
    src = _pad_to(src, (src.shape[0], src.shape[1], _ceil_to(src.shape[2], _LANE)))

    pk = pack_params(params, n_heads)
    out = fused_forward_pallas(src, pk, n_heads, n_units)[..., :n_units]
    if activation is not None:
        out = activation(out)
    return out


# ----------------------------- deterministic parameter init -----------------------------------
def init_params(key, in_size, n_units, n_layers, dim_feedforward):
    E, F = n_units, dim_feedforward
    keys = iter(jax.random.split(key, 4 + 12 * n_layers))

    def u(shape, k):
        return jax.random.uniform(next(keys), shape, jnp.float32, -k, k)

    params = dict(
        enc_w=u((in_size, E), 0.1),                 # init_weights(): uniform(-0.1, 0.1)
        enc_b=jnp.zeros((1, E), jnp.float32),       # init_weights(): bias zeroed
        enc_norm_g=1.0 + u((1, E), 0.05),
        enc_norm_b=u((1, E), 0.05),
        layers=[],
    )
    ke, kf = 1.0 / math.sqrt(E), 1.0 / math.sqrt(F)
    for _ in range(n_layers):
        params["layers"].append(dict(
            wqkv=u((E, 3 * E), ke),  bqkv=u((1, 3 * E), ke),   # MHA in-proj (pre-transposed)
            wo=u((E, E), ke),        bo=u((1, E), ke),          # MHA out-proj
            g1=1.0 + u((1, E), 0.05), bt1=u((1, E), 0.05),      # norm1
            w1=u((E, F), ke),        b1=u((1, F), ke),          # linear1
            w2=u((F, E), kf),        b2=u((1, E), kf),          # linear2
            g2=1.0 + u((1, E), 0.05), bt2=u((1, E), 0.05),      # norm2
        ))
    return params


# -------------------------------- pure-JAX reference check ------------------------------------
def _ref_forward(src_list, params, n_heads):
    max_len = max(s.shape[0] for s in src_list)
    padded = [jnp.pad(s, ((0, max_len - s.shape[0]), (0, 0)), constant_values=-1.0)
              for s in src_list]
    x = jnp.stack(padded, axis=0).astype(jnp.float32)

    def ln(v, g, b, eps=_LN_EPS):
        mu = jnp.mean(v, axis=-1, keepdims=True)
        var = jnp.mean((v - mu) ** 2, axis=-1, keepdims=True)
        return (v - mu) / jnp.sqrt(var + eps) * g + b

    x = ln(x @ params["enc_w"] + params["enc_b"], params["enc_norm_g"], params["enc_norm_b"])
    B, T, E = x.shape
    Dh = E // n_heads
    for lp in params["layers"]:
        qkv = x @ lp["wqkv"] + lp["bqkv"]
        q, k, v = jnp.split(qkv, 3, axis=-1)
        q = q.reshape(B, T, n_heads, Dh).transpose(0, 2, 1, 3)
        k = k.reshape(B, T, n_heads, Dh).transpose(0, 2, 1, 3)
        v = v.reshape(B, T, n_heads, Dh).transpose(0, 2, 1, 3)
        s = jnp.einsum("bhtd,bhsd->bhts", q, k) / math.sqrt(Dh)
        p = jax.nn.softmax(s, axis=-1)
        ctx = jnp.einsum("bhts,bhsd->bhtd", p, v).transpose(0, 2, 1, 3).reshape(B, T, E)
        x = ln(x + ctx @ lp["wo"] + lp["bo"], lp["g1"], lp["bt1"])
        hid = jax.nn.relu(x @ lp["w1"] + lp["b1"])
        x = ln(x + hid @ lp["w2"] + lp["b2"], lp["g2"], lp["bt2"])
    return x


if __name__ == "__main__":
    in_size, n_heads, n_units, n_layers, dim_ff = 16, 4, 32, 2, 64
    B, T = 2, 8

    key = jax.random.PRNGKey(0)
    k1, k2, kp = jax.random.split(key, 3)
    # list of variable-length sequences, exactly like the PyTorch forward expects
    src = [jax.random.normal(k1, (T, in_size), jnp.float32),
           jax.random.normal(k2, (T - 2, in_size), jnp.float32)]
    params = init_params(kp, in_size, n_units, n_layers, dim_ff)

    out = transformer_model_forward(src, params, n_heads)
    jax.block_until_ready(out)

    ref = _ref_forward(src, params, n_heads)
    assert out.shape == (B, T, n_units)
    # Tolerance accounts for pl.reciprocal(approx=True) in the softmax and the padded-lane
    # LayerNorm reformulation (E[x^2]-mu^2); structural errors would be orders larger.
    err = float(jnp.max(jnp.abs(out - ref)))
    assert jnp.allclose(out, ref, atol=5e-3, rtol=5e-3), err

    print("KERNEL_OK")
</pallas_src>

<mosaic_0001>
module attributes {stable_mosaic.version = 11 : i64} {
  func.func @_fused_transformer_kernel(%arg0: i32, %arg1: i32, %arg2: memref<1x8x128xf32, #tpu.memory_space<vmem>>, %arg3: memref<128x128xf32, #tpu.memory_space<vmem>>, %arg4: memref<1x128xf32, #tpu.memory_space<vmem>>, %arg5: memref<1x128xf32, #tpu.memory_space<vmem>>, %arg6: memref<1x128xf32, #tpu.memory_space<vmem>>, %arg7: memref<1x4x128x128xf32, #tpu.memory_space<vmem>>, %arg8: memref<1x4x128x128xf32, #tpu.memory_space<vmem>>, %arg9: memref<1x4x128x128xf32, #tpu.memory_space<vmem>>, %arg10: memref<1x4x1x128xf32, #tpu.memory_space<vmem>>, %arg11: memref<1x4x1x128xf32, #tpu.memory_space<vmem>>, %arg12: memref<1x4x1x128xf32, #tpu.memory_space<vmem>>, %arg13: memref<1x512x128xf32, #tpu.memory_space<vmem>>, %arg14: memref<1x1x128xf32, #tpu.memory_space<vmem>>, %arg15: memref<1x1x128xf32, #tpu.memory_space<vmem>>, %arg16: memref<1x1x128xf32, #tpu.memory_space<vmem>>, %arg17: memref<1x128x128xf32, #tpu.memory_space<vmem>>, %arg18: memref<1x1x128xf32, #tpu.memory_space<vmem>>, %arg19: memref<1x128x128xf32, #tpu.memory_space<vmem>>, %arg20: memref<1x1x128xf32, #tpu.memory_space<vmem>>, %arg21: memref<1x1x128xf32, #tpu.memory_space<vmem>>, %arg22: memref<1x1x128xf32, #tpu.memory_space<vmem>>, %arg23: memref<1x8x128xf32, #tpu.memory_space<vmem>>, %arg24: memref<8x128xf32, #tpu.memory_space<vmem>>) attributes {dimension_semantics = [#tpu.dimension_semantics<parallel>, #tpu.dimension_semantics<arbitrary>], iteration_bounds = array<i64: 2, 2>, scalar_prefetch = 0 : i64, scratch_operands = 1 : i64, tpu.core_type = #tpu.core_type<tc>, window_params = [{transform_indices = @transform_0, window_bounds = array<i64: 1, 8, 128>}, {pipeline_mode = #tpu.pipeline_mode<synchronous>, transform_indices = @transform_1, window_bounds = array<i64: 128, 128>}, {pipeline_mode = #tpu.pipeline_mode<synchronous>, transform_indices = @transform_2, window_bounds = array<i64: 1, 128>}, {pipeline_mode = #tpu.pipeline_mode<synchronous>, transform_indices = @transform_3, window_bounds = array<i64: 1, 128>}, {pipeline_mode = #tpu.pipeline_mode<synchronous>, transform_indices = @transform_4, window_bounds = array<i64: 1, 128>}, {transform_indices = @transform_5, window_bounds = array<i64: 1, 4, 128, 128>}, {transform_indices = @transform_6, window_bounds = array<i64: 1, 4, 128, 128>}, {transform_indices = @transform_7, window_bounds = array<i64: 1, 4, 128, 128>}, {transform_indices = @transform_8, window_bounds = array<i64: 1, 4, 1, 128>}, {transform_indices = @transform_9, window_bounds = array<i64: 1, 4, 1, 128>}, {transform_indices = @transform_10, window_bounds = array<i64: 1, 4, 1, 128>}, {transform_indices = @transform_11, window_bounds = array<i64: 1, 512, 128>}, {transform_indices = @transform_12, window_bounds = array<i64: 1, 1, 128>}, {transform_indices = @transform_13, window_bounds = array<i64: 1, 1, 128>}, {transform_indices = @transform_14, window_bounds = array<i64: 1, 1, 128>}, {transform_indices = @transform_15, window_bounds = array<i64: 1, 128, 128>}, {transform_indices = @transform_16, window_bounds = array<i64: 1, 1, 128>}, {transform_indices = @transform_17, window_bounds = array<i64: 1, 128, 128>}, {transform_indices = @transform_18, window_bounds = array<i64: 1, 1, 128>}, {transform_indices = @transform_19, window_bounds = array<i64: 1, 1, 128>}, {transform_indices = @transform_20, window_bounds = array<i64: 1, 1, 128>}, {transform_indices = @transform_21, window_bounds = array<i64: 1, 8, 128>}]} {
    %c0_i32 = arith.constant 0 : i32
    %0 = arith.cmpi eq, %arg1, %c0_i32 : i32
    %1 = arith.extui %0 : i1 to i32
    %c0_i32_0 = arith.constant 0 : i32
    %2 = arith.cmpi ne, %1, %c0_i32_0 : i32
    scf.if %2 {
      %c0_173 = arith.constant 0 : index
      %c0_174 = arith.constant 0 : index
      %c0_175 = arith.constant 0 : index
      %226 = vector.load %arg2[%c0_173, %c0_174, %c0_175] : memref<1x8x128xf32, #tpu.memory_space<vmem>>, vector<1x8x128xf32>
      %227 = vector.shape_cast %226 : vector<1x8x128xf32> to vector<8x128xf32>
      %c0_176 = arith.constant 0 : index
      %c0_177 = arith.constant 0 : index
      %228 = vector.load %arg3[%c0_176, %c0_177] : memref<128x128xf32, #tpu.memory_space<vmem>>, vector<128x128xf32>
      %cst_178 = arith.constant dense<0.000000e+00> : vector<8x128xf32>
      %229 = tpu.matmul %227, %228, %cst_178 {dimension_numbers = #tpu.dot_dimension_numbers<[1], [0], [0], [1], [0, 0, 1, 1], [], []>} : vector<8x128xf32>, vector<128x128xf32>, vector<8x128xf32> -> vector<8x128xf32>
      %c0_179 = arith.constant 0 : index
      %c0_180 = arith.constant 0 : index
      %230 = vector.load %arg4[%c0_179, %c0_180] : memref<1x128xf32, #tpu.memory_space<vmem>>, vector<1x128xf32>
      %231 = vector.broadcast %230 : vector<1x128xf32> to vector<8x128xf32>
      %232 = arith.addf %229, %231 : vector<8x128xf32>
      %c0_181 = arith.constant 0 : index
      %c0_182 = arith.constant 0 : index
      %233 = vector.load %arg5[%c0_181, %c0_182] : memref<1x128xf32, #tpu.memory_space<vmem>>, vector<1x128xf32>
      %c0_183 = arith.constant 0 : index
      %c0_184 = arith.constant 0 : index
      %234 = vector.load %arg6[%c0_183, %c0_184] : memref<1x128xf32, #tpu.memory_space<vmem>>, vector<1x128xf32>
      %cst_185 = arith.constant dense<0.000000e+00> : vector<8xf32>
      %235 = vector.multi_reduction <add>, %232, %cst_185 [1] : vector<8x128xf32> to vector<8xf32>
      %236 = vector.shape_cast %235 : vector<8xf32> to vector<8x1xf32>
      %237 = arith.mulf %232, %232 : vector<8x128xf32>
      %cst_186 = arith.constant dense<0.000000e+00> : vector<8xf32>
      %238 = vector.multi_reduction <add>, %237, %cst_186 [1] : vector<8x128xf32> to vector<8xf32>
      %239 = vector.shape_cast %238 : vector<8xf32> to vector<8x1xf32>
      %cst_187 = arith.constant 3.125000e-02 : f32
      %240 = vector.broadcast %cst_187 : f32 to vector<8x1xf32>
      %241 = arith.mulf %236, %240 : vector<8x1xf32>
      %cst_188 = arith.constant 3.125000e-02 : f32
      %242 = vector.broadcast %cst_188 : f32 to vector<8x1xf32>
      %243 = arith.mulf %239, %242 : vector<8x1xf32>
      %244 = arith.mulf %241, %241 : vector<8x1xf32>
      %245 = arith.subf %243, %244 : vector<8x1xf32>
      %246 = vector.broadcast %241 : vector<8x1xf32> to vector<8x128xf32>
      %247 = arith.subf %232, %246 : vector<8x128xf32>
      %cst_189 = arith.constant 9.99999974E-6 : f32
      %248 = vector.broadcast %cst_189 : f32 to vector<8x1xf32>
      %249 = arith.addf %245, %248 : vector<8x1xf32>
      %250 = math.rsqrt %249 : vector<8x1xf32>
      %251 = vector.broadcast %250 : vector<8x1xf32> to vector<8x128xf32>
      %252 = arith.mulf %247, %251 : vector<8x128xf32>
      %253 = vector.broadcast %233 : vector<1x128xf32> to vector<8x128xf32>
      %254 = arith.mulf %252, %253 : vector<8x128xf32>
      %255 = vector.broadcast %234 : vector<1x128xf32> to vector<8x128xf32>
      %256 = arith.addf %254, %255 : vector<8x128xf32>
      %c0_190 = arith.constant 0 : index
      %c0_191 = arith.constant 0 : index
      %257 = vector.load %arg24[%c0_190, %c0_191] : memref<8x128xf32, #tpu.memory_space<vmem>>, vector<8x128xf32>
      tpu.vector_store %arg24[%c0_190, %c0_191], %256 {strides = array<i32>} : memref<8x128xf32, #tpu.memory_space<vmem>>, vector<8x128xf32>,
    } else {
    }
    %c0 = arith.constant 0 : index
    %c0_1 = arith.constant 0 : index
    %3 = vector.load %arg24[%c0, %c0_1] : memref<8x128xf32, #tpu.memory_space<vmem>>, vector<8x128xf32>
    %c0_2 = arith.constant 0 : index
    %c0_3 = arith.constant 0 : index
    %c0_4 = arith.constant 0 : index
    %c0_5 = arith.constant 0 : index
    %4 = vector.load %arg7[%c0_2, %c0_3, %c0_4, %c0_5] : memref<1x4x128x128xf32, #tpu.memory_space<vmem>>, vector<1x1x128x128xf32>
    %5 = vector.shape_cast %4 : vector<1x1x128x128xf32> to vector<128x128xf32>
    %cst = arith.constant dense<0.000000e+00> : vector<8x128xf32>
    %6 = tpu.matmul %3, %5, %cst {dimension_numbers = #tpu.dot_dimension_numbers<[1], [0], [0], [1], [0, 0, 1, 1], [], []>} : vector<8x128xf32>, vector<128x128xf32>, vector<8x128xf32> -> vector<8x128xf32>
    %c0_6 = arith.constant 0 : index
    %c0_7 = arith.constant 0 : index
    %c0_8 = arith.constant 0 : index
    %c0_9 = arith.constant 0 : index
    %7 = vector.load %arg10[%c0_6, %c0_7, %c0_8, %c0_9] : memref<1x4x1x128xf32, #tpu.memory_space<vmem>>, vector<1x1x1x128xf32>
    %8 = vector.shape_cast %7 : vector<1x1x1x128xf32> to vector<1x128xf32>
    %9 = vector.broadcast %8 : vector<1x128xf32> to vector<8x128xf32>
    %10 = arith.addf %6, %9 : vector<8x128xf32>
    %c0_10 = arith.constant 0 : index
    %c0_11 = arith.constant 0 : index
    %c0_12 = arith.constant 0 : index
    %c0_13 = arith.constant 0 : index
    %11 = vector.load %arg8[%c0_10, %c0_11, %c0_12, %c0_13] : memref<1x4x128x128xf32, #tpu.memory_space<vmem>>, vector<1x1x128x128xf32>
    %12 = vector.shape_cast %11 : vector<1x1x128x128xf32> to vector<128x128xf32>
    %cst_14 = arith.constant dense<0.000000e+00> : vector<8x128xf32>
    %13 = tpu.matmul %3, %12, %cst_14 {dimension_numbers = #tpu.dot_dimension_numbers<[1], [0], [0], [1], [0, 0, 1, 1], [], []>} : vector<8x128xf32>, vector<128x128xf32>, vector<8x128xf32> -> vector<8x128xf32>
    %c0_15 = arith.constant 0 : index
    %c0_16 = arith.constant 0 : index
    %c0_17 = arith.constant 0 : index
    %c0_18 = arith.constant 0 : index
    %14 = vector.load %arg11[%c0_15, %c0_16, %c0_17, %c0_18] : memref<1x4x1x128xf32, #tpu.memory_space<vmem>>, vector<1x1x1x128xf32>
    %15 = vector.shape_cast %14 : vector<1x1x1x128xf32> to vector<1x128xf32>
    %16 = vector.broadcast %15 : vector<1x128xf32> to vector<8x128xf32>
    %17 = arith.addf %13, %16 : vector<8x128xf32>
    %c0_19 = arith.constant 0 : index
    %c0_20 = arith.constant 0 : index
    %c0_21 = arith.constant 0 : index
    %c0_22 = arith.constant 0 : index
    %18 = vector.load %arg9[%c0_19, %c0_20, %c0_21, %c0_22] : memref<1x4x128x128xf32, #tpu.memory_space<vmem>>, vector<1x1x128x128xf32>
    %19 = vector.shape_cast %18 : vector<1x1x128x128xf32> to vector<128x128xf32>
    %cst_23 = arith.constant dense<0.000000e+00> : vector<8x128xf32>
    %20 = tpu.matmul %3, %19, %cst_23 {dimension_numbers = #tpu.dot_dimension_numbers<[1], [0], [0], [1], [0, 0, 1, 1], [], []>} : vector<8x128xf32>, vector<128x128xf32>, vector<8x128xf32> -> vector<8x128xf32>
    %c0_24 = arith.constant 0 : index
    %c0_25 = arith.constant 0 : index
    %c0_26 = arith.constant 0 : index
    %c0_27 = arith.constant 0 : index
    %21 = vector.load %arg12[%c0_24, %c0_25, %c0_26, %c0_27] : memref<1x4x1x128xf32, #tpu.memory_space<vmem>>, vector<1x1x1x128xf32>
    %22 = vector.shape_cast %21 : vector<1x1x1x128xf32> to vector<1x128xf32>
    %23 = vector.broadcast %22 : vector<1x128xf32> to vector<8x128xf32>
    %24 = arith.addf %20, %23 : vector<8x128xf32>
    %cst_28 = arith.constant dense<0.000000e+00> : vector<8x8xf32>
    %25 = tpu.matmul %10, %17, %cst_28 {dimension_numbers = #tpu.dot_dimension_numbers<[1], [1], [0], [0], [0, 0, 1, 0], [], []>} : vector<8x128xf32>, vector<8x128xf32>, vector<8x8xf32> -> vector<8x8xf32>
    %cst_29 = arith.constant 0.353553385 : f32
    %26 = vector.broadcast %cst_29 : f32 to vector<8x8xf32>
    %27 = arith.mulf %25, %26 : vector<8x8xf32>
    %cst_30 = arith.constant dense<0xFF800000> : vector<8xf32>
    %28 = vector.multi_reduction <maximumf>, %27, %cst_30 [1] : vector<8x8xf32> to vector<8xf32>
    %29 = vector.shape_cast %28 : vector<8xf32> to vector<8x1xf32>
    %30 = vector.broadcast %29 : vector<8x1xf32> to vector<8x8xf32>
    %31 = arith.subf %27, %30 : vector<8x8xf32>
    %32 = math.exp %31 : vector<8x8xf32>
    %cst_31 = arith.constant dense<0.000000e+00> : vector<8xf32>
    %33 = vector.multi_reduction <add>, %32, %cst_31 [1] : vector<8x8xf32> to vector<8xf32>
    %34 = vector.shape_cast %33 : vector<8xf32> to vector<8x1xf32>
    %35 = tpu.reciprocal %34 {approx = true} : vector<8x1xf32> -> vector<8x1xf32>
    %36 = vector.broadcast %35 : vector<8x1xf32> to vector<8x8xf32>
    %37 = arith.mulf %32, %36 : vector<8x8xf32>
    %cst_32 = arith.constant dense<0.000000e+00> : vector<8x128xf32>
    %38 = tpu.matmul %37, %24, %cst_32 {dimension_numbers = #tpu.dot_dimension_numbers<[1], [0], [0], [1], [0, 0, 1, 1], [], []>} : vector<8x8xf32>, vector<8x128xf32>, vector<8x128xf32> -> vector<8x128xf32>
    %c0_33 = arith.constant 0 : index
    %c1 = arith.constant 1 : index
    %c0_34 = arith.constant 0 : index
    %c0_35 = arith.constant 0 : index
    %39 = vector.load %arg7[%c0_33, %c1, %c0_34, %c0_35] : memref<1x4x128x128xf32, #tpu.memory_space<vmem>>, vector<1x1x128x128xf32>
    %40 = vector.shape_cast %39 : vector<1x1x128x128xf32> to vector<128x128xf32>
    %cst_36 = arith.constant dense<0.000000e+00> : vector<8x128xf32>
    %41 = tpu.matmul %3, %40, %cst_36 {dimension_numbers = #tpu.dot_dimension_numbers<[1], [0], [0], [1], [0, 0, 1, 1], [], []>} : vector<8x128xf32>, vector<128x128xf32>, vector<8x128xf32> -> vector<8x128xf32>
    %c0_37 = arith.constant 0 : index
    %c1_38 = arith.constant 1 : index
    %c0_39 = arith.constant 0 : index
    %c0_40 = arith.constant 0 : index
    %42 = vector.load %arg10[%c0_37, %c1_38, %c0_39, %c0_40] : memref<1x4x1x128xf32, #tpu.memory_space<vmem>>, vector<1x1x1x128xf32>
    %43 = vector.shape_cast %42 : vector<1x1x1x128xf32> to vector<1x128xf32>
    %44 = vector.broadcast %43 : vector<1x128xf32> to vector<8x128xf32>
    %45 = arith.addf %41, %44 : vector<8x128xf32>
    %c0_41 = arith.constant 0 : index
    %c1_42 = arith.constant 1 : index
    %c0_43 = arith.constant 0 : index
    %c0_44 = arith.constant 0 : index
    %46 = vector.load %arg8[%c0_41, %c1_42, %c0_43, %c0_44] : memref<1x4x128x128xf32, #tpu.memory_space<vmem>>, vector<1x1x128x128xf32>
    %47 = vector.shape_cast %46 : vector<1x1x128x128xf32> to vector<128x128xf32>
    %cst_45 = arith.constant dense<0.000000e+00> : vector<8x128xf32>
    %48 = tpu.matmul %3, %47, %cst_45 {dimension_numbers = #tpu.dot_dimension_numbers<[1], [0], [0], [1], [0, 0, 1, 1], [], []>} : vector<8x128xf32>, vector<128x128xf32>, vector<8x128xf32> -> vector<8x128xf32>
    %c0_46 = arith.constant 0 : index
    %c1_47 = arith.constant 1 : index
    %c0_48 = arith.constant 0 : index
    %c0_49 = arith.constant 0 : index
    %49 = vector.load %arg11[%c0_46, %c1_47, %c0_48, %c0_49] : memref<1x4x1x128xf32, #tpu.memory_space<vmem>>, vector<1x1x1x128xf32>
    %50 = vector.shape_cast %49 : vector<1x1x1x128xf32> to vector<1x128xf32>
    %51 = vector.broadcast %50 : vector<1x128xf32> to vector<8x128xf32>
    %52 = arith.addf %48, %51 : vector<8x128xf32>
    %c0_50 = arith.constant 0 : index
    %c1_51 = arith.constant 1 : index
    %c0_52 = arith.constant 0 : index
    %c0_53 = arith.constant 0 : index
    %53 = vector.load %arg9[%c0_50, %c1_51, %c0_52, %c0_53] : memref<1x4x128x128xf32, #tpu.memory_space<vmem>>, vector<1x1x128x128xf32>
    %54 = vector.shape_cast %53 : vector<1x1x128x128xf32> to vector<128x128xf32>
    %cst_54 = arith.constant dense<0.000000e+00> : vector<8x128xf32>
    %55 = tpu.matmul %3, %54, %cst_54 {dimension_numbers = #tpu.dot_dimension_numbers<[1], [0], [0], [1], [0, 0, 1, 1], [], []>} : vector<8x128xf32>, vector<128x128xf32>, vector<8x128xf32> -> vector<8x128xf32>
    %c0_55 = arith.constant 0 : index
    %c1_56 = arith.constant 1 : index
    %c0_57 = arith.constant 0 : index
    %c0_58 = arith.constant 0 : index
    %56 = vector.load %arg12[%c0_55, %c1_56, %c0_57, %c0_58] : memref<1x4x1x128xf32, #tpu.memory_space<vmem>>, vector<1x1x1x128xf32>
    %57 = vector.shape_cast %56 : vector<1x1x1x128xf32> to vector<1x128xf32>
    %58 = vector.broadcast %57 : vector<1x128xf32> to vector<8x128xf32>
    %59 = arith.addf %55, %58 : vector<8x128xf32>
    %cst_59 = arith.constant dense<0.000000e+00> : vector<8x8xf32>
    %60 = tpu.matmul %45, %52, %cst_59 {dimension_numbers = #tpu.dot_dimension_numbers<[1], [1], [0], [0], [0, 0, 1, 0], [], []>} : vector<8x128xf32>, vector<8x128xf32>, vector<8x8xf32> -> vector<8x8xf32>
    %cst_60 = arith.constant 0.353553385 : f32
    %61 = vector.broadcast %cst_60 : f32 to vector<8x8xf32>
    %62 = arith.mulf %60, %61 : vector<8x8xf32>
    %cst_61 = arith.constant dense<0xFF800000> : vector<8xf32>
    %63 = vector.multi_reduction <maximumf>, %62, %cst_61 [1] : vector<8x8xf32> to vector<8xf32>
    %64 = vector.shape_cast %63 : vector<8xf32> to vector<8x1xf32>
    %65 = vector.broadcast %64 : vector<8x1xf32> to vector<8x8xf32>
    %66 = arith.subf %62, %65 : vector<8x8xf32>
    %67 = math.exp %66 : vector<8x8xf32>
    %cst_62 = arith.constant dense<0.000000e+00> : vector<8xf32>
    %68 = vector.multi_reduction <add>, %67, %cst_62 [1] : vector<8x8xf32> to vector<8xf32>
    %69 = vector.shape_cast %68 : vector<8xf32> to vector<8x1xf32>
    %70 = tpu.reciprocal %69 {approx = true} : vector<8x1xf32> -> vector<8x1xf32>
    %71 = vector.broadcast %70 : vector<8x1xf32> to vector<8x8xf32>
    %72 = arith.mulf %67, %71 : vector<8x8xf32>
    %cst_63 = arith.constant dense<0.000000e+00> : vector<8x128xf32>
    %73 = tpu.matmul %72, %59, %cst_63 {dimension_numbers = #tpu.dot_dimension_numbers<[1], [0], [0], [1], [0, 0, 1, 1], [], []>} : vector<8x8xf32>, vector<8x128xf32>, vector<8x128xf32> -> vector<8x128xf32>
    %c0_64 = arith.constant 0 : index
    %c2 = arith.constant 2 : index
    %c0_65 = arith.constant 0 : index
    %c0_66 = arith.constant 0 : index
    %74 = vector.load %arg7[%c0_64, %c2, %c0_65, %c0_66] : memref<1x4x128x128xf32, #tpu.memory_space<vmem>>, vector<1x1x128x128xf32>
    %75 = vector.shape_cast %74 : vector<1x1x128x128xf32> to vector<128x128xf32>
    %cst_67 = arith.constant dense<0.000000e+00> : vector<8x128xf32>
    %76 = tpu.matmul %3, %75, %cst_67 {dimension_numbers = #tpu.dot_dimension_numbers<[1], [0], [0], [1], [0, 0, 1, 1], [], []>} : vector<8x128xf32>, vector<128x128xf32>, vector<8x128xf32> -> vector<8x128xf32>
    %c0_68 = arith.constant 0 : index
    %c2_69 = arith.constant 2 : index
    %c0_70 = arith.constant 0 : index
    %c0_71 = arith.constant 0 : index
    %77 = vector.load %arg10[%c0_68, %c2_69, %c0_70, %c0_71] : memref<1x4x1x128xf32, #tpu.memory_space<vmem>>, vector<1x1x1x128xf32>
    %78 = vector.shape_cast %77 : vector<1x1x1x128xf32> to vector<1x128xf32>
    %79 = vector.broadcast %78 : vector<1x128xf32> to vector<8x128xf32>
    %80 = arith.addf %76, %79 : vector<8x128xf32>
    %c0_72 = arith.constant 0 : index
    %c2_73 = arith.constant 2 : index
    %c0_74 = arith.constant 0 : index
    %c0_75 = arith.constant 0 : index
    %81 = vector.load %arg8[%c0_72, %c2_73, %c0_74, %c0_75] : memref<1x4x128x128xf32, #tpu.memory_space<vmem>>, vector<1x1x128x128xf32>
    %82 = vector.shape_cast %81 : vector<1x1x128x128xf32> to vector<128x128xf32>
    %cst_76 = arith.constant dense<0.000000e+00> : vector<8x128xf32>
    %83 = tpu.matmul %3, %82, %cst_76 {dimension_numbers = #tpu.dot_dimension_numbers<[1], [0], [0], [1], [0, 0, 1, 1], [], []>} : vector<8x128xf32>, vector<128x128xf32>, vector<8x128xf32> -> vector<8x128xf32>
    %c0_77 = arith.constant 0 : index
    %c2_78 = arith.constant 2 : index
    %c0_79 = arith.constant 0 : index
    %c0_80 = arith.constant 0 : index
    %84 = vector.load %arg11[%c0_77, %c2_78, %c0_79, %c0_80] : memref<1x4x1x128xf32, #tpu.memory_space<vmem>>, vector<1x1x1x128xf32>
    %85 = vector.shape_cast %84 : vector<1x1x1x128xf32> to vector<1x128xf32>
    %86 = vector.broadcast %85 : vector<1x128xf32> to vector<8x128xf32>
    %87 = arith.addf %83, %86 : vector<8x128xf32>
    %c0_81 = arith.constant 0 : index
    %c2_82 = arith.constant 2 : index
    %c0_83 = arith.constant 0 : index
    %c0_84 = arith.constant 0 : index
    %88 = vector.load %arg9[%c0_81, %c2_82, %c0_83, %c0_84] : memref<1x4x128x128xf32, #tpu.memory_space<vmem>>, vector<1x1x128x128xf32>
    %89 = vector.shape_cast %88 : vector<1x1x128x128xf32> to vector<128x128xf32>
    %cst_85 = arith.constant dense<0.000000e+00> : vector<8x128xf32>
    %90 = tpu.matmul %3, %89, %cst_85 {dimension_numbers = #tpu.dot_dimension_numbers<[1], [0], [0], [1], [0, 0, 1, 1], [], []>} : vector<8x128xf32>, vector<128x128xf32>, vector<8x128xf32> -> vector<8x128xf32>
    %c0_86 = arith.constant 0 : index
    %c2_87 = arith.constant 2 : index
    %c0_88 = arith.constant 0 : index
    %c0_89 = arith.constant 0 : index
    %91 = vector.load %arg12[%c0_86, %c2_87, %c0_88, %c0_89] : memref<1x4x1x128xf32, #tpu.memory_space<vmem>>, vector<1x1x1x128xf32>
    %92 = vector.shape_cast %91 : vector<1x1x1x128xf32> to vector<1x128xf32>
    %93 = vector.broadcast %92 : vector<1x128xf32> to vector<8x128xf32>
    %94 = arith.addf %90, %93 : vector<8x128xf32>
    %cst_90 = arith.constant dense<0.000000e+00> : vector<8x8xf32>
    %95 = tpu.matmul %80, %87, %cst_90 {dimension_numbers = #tpu.dot_dimension_numbers<[1], [1], [0], [0], [0, 0, 1, 0], [], []>} : vector<8x128xf32>, vector<8x128xf32>, vector<8x8xf32> -> vector<8x8xf32>
    %cst_91 = arith.constant 0.353553385 : f32
    %96 = vector.broadcast %cst_91 : f32 to vector<8x8xf32>
    %97 = arith.mulf %95, %96 : vector<8x8xf32>
    %cst_92 = arith.constant dense<0xFF800000> : vector<8xf32>
    %98 = vector.multi_reduction <maximumf>, %97, %cst_92 [1] : vector<8x8xf32> to vector<8xf32>
    %99 = vector.shape_cast %98 : vector<8xf32> to vector<8x1xf32>
    %100 = vector.broadcast %99 : vector<8x1xf32> to vector<8x8xf32>
    %101 = arith.subf %97, %100 : vector<8x8xf32>
    %102 = math.exp %101 : vector<8x8xf32>
    %cst_93 = arith.constant dense<0.000000e+00> : vector<8xf32>
    %103 = vector.multi_reduction <add>, %102, %cst_93 [1] : vector<8x8xf32> to vector<8xf32>
    %104 = vector.shape_cast %103 : vector<8xf32> to vector<8x1xf32>
    %105 = tpu.reciprocal %104 {approx = true} : vector<8x1xf32> -> vector<8x1xf32>
    %106 = vector.broadcast %105 : vector<8x1xf32> to vector<8x8xf32>
    %107 = arith.mulf %102, %106 : vector<8x8xf32>
    %cst_94 = arith.constant dense<0.000000e+00> : vector<8x128xf32>
    %108 = tpu.matmul %107, %94, %cst_94 {dimension_numbers = #tpu.dot_dimension_numbers<[1], [0], [0], [1], [0, 0, 1, 1], [], []>} : vector<8x8xf32>, vector<8x128xf32>, vector<8x128xf32> -> vector<8x128xf32>
    %c0_95 = arith.constant 0 : index
    %c3 = arith.constant 3 : index
    %c0_96 = arith.constant 0 : index
    %c0_97 = arith.constant 0 : index
    %109 = vector.load %arg7[%c0_95, %c3, %c0_96, %c0_97] : memref<1x4x128x128xf32, #tpu.memory_space<vmem>>, vector<1x1x128x128xf32>
    %110 = vector.shape_cast %109 : vector<1x1x128x128xf32> to vector<128x128xf32>
    %cst_98 = arith.constant dense<0.000000e+00> : vector<8x128xf32>
    %111 = tpu.matmul %3, %110, %cst_98 {dimension_numbers = #tpu.dot_dimension_numbers<[1], [0], [0], [1], [0, 0, 1, 1], [], []>} : vector<8x128xf32>, vector<128x128xf32>, vector<8x128xf32> -> vector<8x128xf32>
    %c0_99 = arith.constant 0 : index
    %c3_100 = arith.constant 3 : index
    %c0_101 = arith.constant 0 : index
    %c0_102 = arith.constant 0 : index
    %112 = vector.load %arg10[%c0_99, %c3_100, %c0_101, %c0_102] : memref<1x4x1x128xf32, #tpu.memory_space<vmem>>, vector<1x1x1x128xf32>
    %113 = vector.shape_cast %112 : vector<1x1x1x128xf32> to vector<1x128xf32>
    %114 = vector.broadcast %113 : vector<1x128xf32> to vector<8x128xf32>
    %115 = arith.addf %111, %114 : vector<8x128xf32>
    %c0_103 = arith.constant 0 : index
    %c3_104 = arith.constant 3 : index
    %c0_105 = arith.constant 0 : index
    %c0_106 = arith.constant 0 : index
    %116 = vector.load %arg8[%c0_103, %c3_104, %c0_105, %c0_106] : memref<1x4x128x128xf32, #tpu.memory_space<vmem>>, vector<1x1x128x128xf32>
    %117 = vector.shape_cast %116 : vector<1x1x128x128xf32> to vector<128x128xf32>
    %cst_107 = arith.constant dense<0.000000e+00> : vector<8x128xf32>
    %118 = tpu.matmul %3, %117, %cst_107 {dimension_numbers = #tpu.dot_dimension_numbers<[1], [0], [0], [1], [0, 0, 1, 1], [], []>} : vector<8x128xf32>, vector<128x128xf32>, vector<8x128xf32> -> vector<8x128xf32>
    %c0_108 = arith.constant 0 : index
    %c3_109 = arith.constant 3 : index
    %c0_110 = arith.constant 0 : index
    %c0_111 = arith.constant 0 : index
    %119 = vector.load %arg11[%c0_108, %c3_109, %c0_110, %c0_111] : memref<1x4x1x128xf32, #tpu.memory_space<vmem>>, vector<1x1x1x128xf32>
    %120 = vector.shape_cast %119 : vector<1x1x1x128xf32> to vector<1x128xf32>
    %121 = vector.broadcast %120 : vector<1x128xf32> to vector<8x128xf32>
    %122 = arith.addf %118, %121 : vector<8x128xf32>
    %c0_112 = arith.constant 0 : index
    %c3_113 = arith.constant 3 : index
    %c0_114 = arith.constant 0 : index
    %c0_115 = arith.constant 0 : index
    %123 = vector.load %arg9[%c0_112, %c3_113, %c0_114, %c0_115] : memref<1x4x128x128xf32, #tpu.memory_space<vmem>>, vector<1x1x128x128xf32>
    %124 = vector.shape_cast %123 : vector<1x1x128x128xf32> to vector<128x128xf32>
    %cst_116 = arith.constant dense<0.000000e+00> : vector<8x128xf32>
    %125 = tpu.matmul %3, %124, %cst_116 {dimension_numbers = #tpu.dot_dimension_numbers<[1], [0], [0], [1], [0, 0, 1, 1], [], []>} : vector<8x128xf32>, vector<128x128xf32>, vector<8x128xf32> -> vector<8x128xf32>
    %c0_117 = arith.constant 0 : index
    %c3_118 = arith.constant 3 : index
    %c0_119 = arith.constant 0 : index
    %c0_120 = arith.constant 0 : index
    %126 = vector.load %arg12[%c0_117, %c3_118, %c0_119, %c0_120] : memref<1x4x1x128xf32, #tpu.memory_space<vmem>>, vector<1x1x1x128xf32>
    %127 = vector.shape_cast %126 : vector<1x1x1x128xf32> to vector<1x128xf32>
    %128 = vector.broadcast %127 : vector<1x128xf32> to vector<8x128xf32>
    %129 = arith.addf %125, %128 : vector<8x128xf32>
    %cst_121 = arith.constant dense<0.000000e+00> : vector<8x8xf32>
    %130 = tpu.matmul %115, %122, %cst_121 {dimension_numbers = #tpu.dot_dimension_numbers<[1], [1], [0], [0], [0, 0, 1, 0], [], []>} : vector<8x128xf32>, vector<8x128xf32>, vector<8x8xf32> -> vector<8x8xf32>
    %cst_122 = arith.constant 0.353553385 : f32
    %131 = vector.broadcast %cst_122 : f32 to vector<8x8xf32>
    %132 = arith.mulf %130, %131 : vector<8x8xf32>
    %cst_123 = arith.constant dense<0xFF800000> : vector<8xf32>
    %133 = vector.multi_reduction <maximumf>, %132, %cst_123 [1] : vector<8x8xf32> to vector<8xf32>
    %134 = vector.shape_cast %133 : vector<8xf32> to vector<8x1xf32>
    %135 = vector.broadcast %134 : vector<8x1xf32> to vector<8x8xf32>
    %136 = arith.subf %132, %135 : vector<8x8xf32>
    %137 = math.exp %136 : vector<8x8xf32>
    %cst_124 = arith.constant dense<0.000000e+00> : vector<8xf32>
    %138 = vector.multi_reduction <add>, %137, %cst_124 [1] : vector<8x8xf32> to vector<8xf32>
    %139 = vector.shape_cast %138 : vector<8xf32> to vector<8x1xf32>
    %140 = tpu.reciprocal %139 {approx = true} : vector<8x1xf32> -> vector<8x1xf32>
    %141 = vector.broadcast %140 : vector<8x1xf32> to vector<8x8xf32>
    %142 = arith.mulf %137, %141 : vector<8x8xf32>
    %cst_125 = arith.constant dense<0.000000e+00> : vector<8x128xf32>
    %143 = tpu.matmul %142, %129, %cst_125 {dimension_numbers = #tpu.dot_dimension_numbers<[1], [0], [0], [1], [0, 0, 1, 1], [], []>} : vector<8x8xf32>, vector<8x128xf32>, vector<8x128xf32> -> vector<8x128xf32>
    %144 = tpu.concatenate %38, %73, %108, %143 in 1 : vector<8x128xf32>, vector<8x128xf32>, vector<8x128xf32>, vector<8x128xf32> -> vector<8x512xf32>
    %c0_126 = arith.constant 0 : index
    %c0_127 = arith.constant 0 : index
    %c0_128 = arith.constant 0 : index
    %145 = vector.load %arg13[%c0_126, %c0_127, %c0_128] : memref<1x512x128xf32, #tpu.memory_space<vmem>>, vector<1x512x128xf32>
    %146 = vector.shape_cast %145 : vector<1x512x128xf32> to vector<512x128xf32>
    %cst_129 = arith.constant dense<0.000000e+00> : vector<8x128xf32>
    %147 = tpu.matmul %144, %146, %cst_129 {dimension_numbers = #tpu.dot_dimension_numbers<[1], [0], [0], [1], [0, 0, 1, 1], [], []>} : vector<8x512xf32>, vector<512x128xf32>, vector<8x128xf32> -> vector<8x128xf32>
    %c0_130 = arith.constant 0 : index
    %c0_131 = arith.constant 0 : index
    %c0_132 = arith.constant 0 : index
    %148 = vector.load %arg14[%c0_130, %c0_131, %c0_132] : memref<1x1x128xf32, #tpu.memory_space<vmem>>, vector<1x1x128xf32>
    %149 = vector.shape_cast %148 : vector<1x1x128xf32> to vector<1x128xf32>
    %150 = vector.broadcast %149 : vector<1x128xf32> to vector<8x128xf32>
    %151 = arith.addf %147, %150 : vector<8x128xf32>
    %152 = arith.addf %3, %151 : vector<8x128xf32>
    %c0_133 = arith.constant 0 : index
    %c0_134 = arith.constant 0 : index
    %c0_135 = arith.constant 0 : index
    %153 = vector.load %arg15[%c0_133, %c0_134, %c0_135] : memref<1x1x128xf32, #tpu.memory_space<vmem>>, vector<1x1x128xf32>
    %154 = vector.shape_cast %153 : vector<1x1x128xf32> to vector<1x128xf32>
    %c0_136 = arith.constant 0 : index
    %c0_137 = arith.constant 0 : index
    %c0_138 = arith.constant 0 : index
    %155 = vector.load %arg16[%c0_136, %c0_137, %c0_138] : memref<1x1x128xf32, #tpu.memory_space<vmem>>, vector<1x1x128xf32>
    %156 = vector.shape_cast %155 : vector<1x1x128xf32> to vector<1x128xf32>
    %cst_139 = arith.constant dense<0.000000e+00> : vector<8xf32>
    %157 = vector.multi_reduction <add>, %152, %cst_139 [1] : vector<8x128xf32> to vector<8xf32>
    %158 = vector.shape_cast %157 : vector<8xf32> to vector<8x1xf32>
    %159 = arith.mulf %152, %152 : vector<8x128xf32>
    %cst_140 = arith.constant dense<0.000000e+00> : vector<8xf32>
    %160 = vector.multi_reduction <add>, %159, %cst_140 [1] : vector<8x128xf32> to vector<8xf32>
    %161 = vector.shape_cast %160 : vector<8xf32> to vector<8x1xf32>
    %cst_141 = arith.constant 3.125000e-02 : f32
    %162 = vector.broadcast %cst_141 : f32 to vector<8x1xf32>
    %163 = arith.mulf %158, %162 : vector<8x1xf32>
    %cst_142 = arith.constant 3.125000e-02 : f32
    %164 = vector.broadcast %cst_142 : f32 to vector<8x1xf32>
    %165 = arith.mulf %161, %164 : vector<8x1xf32>
    %166 = arith.mulf %163, %163 : vector<8x1xf32>
    %167 = arith.subf %165, %166 : vector<8x1xf32>
    %168 = vector.broadcast %163 : vector<8x1xf32> to vector<8x128xf32>
    %169 = arith.subf %152, %168 : vector<8x128xf32>
    %cst_143 = arith.constant 9.99999974E-6 : f32
    %170 = vector.broadcast %cst_143 : f32 to vector<8x1xf32>
    %171 = arith.addf %167, %170 : vector<8x1xf32>
    %172 = math.rsqrt %171 : vector<8x1xf32>
    %173 = vector.broadcast %172 : vector<8x1xf32> to vector<8x128xf32>
    %174 = arith.mulf %169, %173 : vector<8x128xf32>
    %175 = vector.broadcast %154 : vector<1x128xf32> to vector<8x128xf32>
    %176 = arith.mulf %174, %175 : vector<8x128xf32>
    %177 = vector.broadcast %156 : vector<1x128xf32> to vector<8x128xf32>
    %178 = arith.addf %176, %177 : vector<8x128xf32>
    %c0_144 = arith.constant 0 : index
    %c0_145 = arith.constant 0 : index
    %c0_146 = arith.constant 0 : index
    %179 = vector.load %arg17[%c0_144, %c0_145, %c0_146] : memref<1x128x128xf32, #tpu.memory_space<vmem>>, vector<1x128x128xf32>
    %180 = vector.shape_cast %179 : vector<1x128x128xf32> to vector<128x128xf32>
    %cst_147 = arith.constant dense<0.000000e+00> : vector<8x128xf32>
    %181 = tpu.matmul %178, %180, %cst_147 {dimension_numbers = #tpu.dot_dimension_numbers<[1], [0], [0], [1], [0, 0, 1, 1], [], []>} : vector<8x128xf32>, vector<128x128xf32>, vector<8x128xf32> -> vector<8x128xf32>
    %c0_148 = arith.constant 0 : index
    %c0_149 = arith.constant 0 : index
    %c0_150 = arith.constant 0 : index
    %182 = vector.load %arg18[%c0_148, %c0_149, %c0_150] : memref<1x1x128xf32, #tpu.memory_space<vmem>>, vector<1x1x128xf32>
    %183 = vector.shape_cast %182 : vector<1x1x128xf32> to vector<1x128xf32>
    %184 = vector.broadcast %183 : vector<1x128xf32> to vector<8x128xf32>
    %185 = arith.addf %181, %184 : vector<8x128xf32>
    %cst_151 = arith.constant 0.000000e+00 : f32
    %186 = vector.broadcast %cst_151 : f32 to vector<8x128xf32>
    %187 = arith.maximumf %185, %186 : vector<8x128xf32>
    %c0_152 = arith.constant 0 : index
    %c0_153 = arith.constant 0 : index
    %c0_154 = arith.constant 0 : index
    %188 = vector.load %arg19[%c0_152, %c0_153, %c0_154] : memref<1x128x128xf32, #tpu.memory_space<vmem>>, vector<1x128x128xf32>
    %189 = vector.shape_cast %188 : vector<1x128x128xf32> to vector<128x128xf32>
    %cst_155 = arith.constant dense<0.000000e+00> : vector<8x128xf32>
    %190 = tpu.matmul %187, %189, %cst_155 {dimension_numbers = #tpu.dot_dimension_numbers<[1], [0], [0], [1], [0, 0, 1, 1], [], []>} : vector<8x128xf32>, vector<128x128xf32>, vector<8x128xf32> -> vector<8x128xf32>
    %c0_156 = arith.constant 0 : index
    %c0_157 = arith.constant 0 : index
    %c0_158 = arith.constant 0 : index
    %191 = vector.load %arg20[%c0_156, %c0_157, %c0_158] : memref<1x1x128xf32, #tpu.memory_space<vmem>>, vector<1x1x128xf32>
    %192 = vector.shape_cast %191 : vector<1x1x128xf32> to vector<1x128xf32>
    %193 = vector.broadcast %192 : vector<1x128xf32> to vector<8x128xf32>
    %194 = arith.addf %190, %193 : vector<8x128xf32>
    %195 = arith.addf %178, %194 : vector<8x128xf32>
    %c0_159 = arith.constant 0 : index
    %c0_160 = arith.constant 0 : index
    %c0_161 = arith.constant 0 : index
    %196 = vector.load %arg21[%c0_159, %c0_160, %c0_161] : memref<1x1x128xf32, #tpu.memory_space<vmem>>, vector<1x1x128xf32>
    %197 = vector.shape_cast %196 : vector<1x1x128xf32> to vector<1x128xf32>
    %c0_162 = arith.constant 0 : index
    %c0_163 = arith.constant 0 : index
    %c0_164 = arith.constant 0 : index
    %198 = vector.load %arg22[%c0_162, %c0_163, %c0_164] : memref<1x1x128xf32, #tpu.memory_space<vmem>>, vector<1x1x128xf32>
    %199 = vector.shape_cast %198 : vector<1x1x128xf32> to vector<1x128xf32>
    %cst_165 = arith.constant dense<0.000000e+00> : vector<8xf32>
    %200 = vector.multi_reduction <add>, %195, %cst_165 [1] : vector<8x128xf32> to vector<8xf32>
    %201 = vector.shape_cast %200 : vector<8xf32> to vector<8x1xf32>
    %202 = arith.mulf %195, %195 : vector<8x128xf32>
    %cst_166 = arith.constant dense<0.000000e+00> : vector<8xf32>
    %203 = vector.multi_reduction <add>, %202, %cst_166 [1] : vector<8x128xf32> to vector<8xf32>
    %204 = vector.shape_cast %203 : vector<8xf32> to vector<8x1xf32>
    %cst_167 = arith.constant 3.125000e-02 : f32
    %205 = vector.broadcast %cst_167 : f32 to vector<8x1xf32>
    %206 = arith.mulf %201, %205 : vector<8x1xf32>
    %cst_168 = arith.constant 3.125000e-02 : f32
    %207 = vector.broadcast %cst_168 : f32 to vector<8x1xf32>
    %208 = arith.mulf %204, %207 : vector<8x1xf32>
    %209 = arith.mulf %206, %206 : vector<8x1xf32>
    %210 = arith.subf %208, %209 : vector<8x1xf32>
    %211 = vector.broadcast %206 : vector<8x1xf32> to vector<8x128xf32>
    %212 = arith.subf %195, %211 : vector<8x128xf32>
    %cst_169 = arith.constant 9.99999974E-6 : f32
    %213 = vector.broadcast %cst_169 : f32 to vector<8x1xf32>
    %214 = arith.addf %210, %213 : vector<8x1xf32>
    %215 = math.rsqrt %214 : vector<8x1xf32>
    %216 = vector.broadcast %215 : vector<8x1xf32> to vector<8x128xf32>
    %217 = arith.mulf %212, %216 : vector<8x128xf32>
    %218 = vector.broadcast %197 : vector<1x128xf32> to vector<8x128xf32>
    %219 = arith.mulf %217, %218 : vector<8x128xf32>
    %220 = vector.broadcast %199 : vector<1x128xf32> to vector<8x128xf32>
    %221 = arith.addf %219, %220 : vector<8x128xf32>
    %c0_170 = arith.constant 0 : index
    %c0_171 = arith.constant 0 : index
    %222 = vector.load %arg24[%c0_170, %c0_171] : memref<8x128xf32, #tpu.memory_space<vmem>>, vector<8x128xf32>
    tpu.vector_store %arg24[%c0_170, %c0_171], %221 {strides = array<i32>} : memref<8x128xf32, #tpu.memory_space<vmem>>, vector<8x128xf32>,
    %c1_i32 = arith.constant 1 : i32
    %223 = arith.cmpi eq, %arg1, %c1_i32 : i32
    %224 = arith.extui %223 : i1 to i32
    %c0_i32_172 = arith.constant 0 : i32
    %225 = arith.cmpi ne, %224, %c0_i32_172 : i32
    scf.if %225 {
      %c0_173 = arith.constant 0 : index
      %c0_174 = arith.constant 0 : index
      %c0_175 = arith.constant 0 : index
      %226 = vector.load %arg23[%c0_173, %c0_174, %c0_175] : memref<1x8x128xf32, #tpu.memory_space<vmem>>, vector<1x8x128xf32>
      %227 = vector.shape_cast %226 : vector<1x8x128xf32> to vector<8x128xf32>
      %228 = vector.shape_cast %221 : vector<8x128xf32> to vector<1x8x128xf32>
      tpu.vector_store %arg23[%c0_173, %c0_174, %c0_175], %228 {strides = array<i32>} : memref<1x8x128xf32, #tpu.memory_space<vmem>>, vector<1x8x128xf32>,
    } else {
    }
    return
  }
  func.func @transform_0(%arg0: i32, %arg1: i32) -> (i32, i32, i32) {
    %c0_i32 = arith.constant 0 : i32
    %c0_i32_0 = arith.constant 0 : i32
    %c0_i32_1 = arith.constant 0 : i32
    return %arg0, %c0_i32, %c0_i32_0 : i32, i32, i32
  }
  func.func @transform_1(%arg0: i32, %arg1: i32) -> (i32, i32) {
    %c0_i32 = arith.constant 0 : i32
    %c0_i32_0 = arith.constant 0 : i32
    %c0_i32_1 = arith.constant 0 : i32
    return %c0_i32, %c0_i32_0 : i32, i32
  }
  func.func @transform_2(%arg0: i32, %arg1: i32) -> (i32, i32) {
    %c0_i32 = arith.constant 0 : i32
    %c0_i32_0 = arith.constant 0 : i32
    %c0_i32_1 = arith.constant 0 : i32
    return %c0_i32, %c0_i32_0 : i32, i32
  }
  func.func @transform_3(%arg0: i32, %arg1: i32) -> (i32, i32) {
    %c0_i32 = arith.constant 0 : i32
    %c0_i32_0 = arith.constant 0 : i32
    %c0_i32_1 = arith.constant 0 : i32
    return %c0_i32, %c0_i32_0 : i32, i32
  }
  func.func @transform_4(%arg0: i32, %arg1: i32) -> (i32, i32) {
    %c0_i32 = arith.constant 0 : i32
    %c0_i32_0 = arith.constant 0 : i32
    %c0_i32_1 = arith.constant 0 : i32
    return %c0_i32, %c0_i32_0 : i32, i32
  }
  func.func @transform_5(%arg0: i32, %arg1: i32) -> (i32, i32, i32, i32) {
    %c0_i32 = arith.constant 0 : i32
    %c0_i32_0 = arith.constant 0 : i32
    %c0_i32_1 = arith.constant 0 : i32
    %c0_i32_2 = arith.constant 0 : i32
    return %arg1, %c0_i32, %c0_i32_0, %c0_i32_1 : i32, i32, i32, i32
  }
  func.func @transform_6(%arg0: i32, %arg1: i32) -> (i32, i32, i32, i32) {
    %c0_i32 = arith.constant 0 : i32
    %c0_i32_0 = arith.constant 0 : i32
    %c0_i32_1 = arith.constant 0 : i32
    %c0_i32_2 = arith.constant 0 : i32
    return %arg1, %c0_i32, %c0_i32_0, %c0_i32_1 : i32, i32, i32, i32
  }
  func.func @transform_7(%arg0: i32, %arg1: i32) -> (i32, i32, i32, i32) {
    %c0_i32 = arith.constant 0 : i32
    %c0_i32_0 = arith.constant 0 : i32
    %c0_i32_1 = arith.constant 0 : i32
    %c0_i32_2 = arith.constant 0 : i32
    return %arg1, %c0_i32, %c0_i32_0, %c0_i32_1 : i32, i32, i32, i32
  }
  func.func @transform_8(%arg0: i32, %arg1: i32) -> (i32, i32, i32, i32) {
    %c0_i32 = arith.constant 0 : i32
    %c0_i32_0 = arith.constant 0 : i32
    %c0_i32_1 = arith.constant 0 : i32
    %c0_i32_2 = arith.constant 0 : i32
    return %arg1, %c0_i32, %c0_i32_0, %c0_i32_1 : i32, i32, i32, i32
  }
  func.func @transform_9(%arg0: i32, %arg1: i32) -> (i32, i32, i32, i32) {
    %c0_i32 = arith.constant 0 : i32
    %c0_i32_0 = arith.constant 0 : i32
    %c0_i32_1 = arith.constant 0 : i32
    %c0_i32_2 = arith.constant 0 : i32
    return %arg1, %c0_i32, %c0_i32_0, %c0_i32_1 : i32, i32, i32, i32
  }
  func.func @transform_10(%arg0: i32, %arg1: i32) -> (i32, i32, i32, i32) {
    %c0_i32 = arith.constant 0 : i32
    %c0_i32_0 = arith.constant 0 : i32
    %c0_i32_1 = arith.constant 0 : i32
    %c0_i32_2 = arith.constant 0 : i32
    return %arg1, %c0_i32, %c0_i32_0, %c0_i32_1 : i32, i32, i32, i32
  }
  func.func @transform_11(%arg0: i32, %arg1: i32) -> (i32, i32, i32) {
    %c0_i32 = arith.constant 0 : i32
    %c0_i32_0 = arith.constant 0 : i32
    %c0_i32_1 = arith.constant 0 : i32
    return %arg1, %c0_i32, %c0_i32_0 : i32, i32, i32
  }
  func.func @transform_12(%arg0: i32, %arg1: i32) -> (i32, i32, i32) {
    %c0_i32 = arith.constant 0 : i32
    %c0_i32_0 = arith.constant 0 : i32
    %c0_i32_1 = arith.constant 0 : i32
    return %arg1, %c0_i32, %c0_i32_0 : i32, i32, i32
  }
  func.func @transform_13(%arg0: i32, %arg1: i32) -> (i32, i32, i32) {
    %c0_i32 = arith.constant 0 : i32
    %c0_i32_0 = arith.constant 0 : i32
    %c0_i32_1 = arith.constant 0 : i32
    return %arg1, %c0_i32, %c0_i32_0 : i32, i32, i32
  }
  func.func @transform_14(%arg0: i32, %arg1: i32) -> (i32, i32, i32) {
    %c0_i32 = arith.constant 0 : i32
    %c0_i32_0 = arith.constant 0 : i32
    %c0_i32_1 = arith.constant 0 : i32
    return %arg1, %c0_i32, %c0_i32_0 : i32, i32, i32
  }
  func.func @transform_15(%arg0: i32, %arg1: i32) -> (i32, i32, i32) {
    %c0_i32 = arith.constant 0 : i32
    %c0_i32_0 = arith.constant 0 : i32
    %c0_i32_1 = arith.constant 0 : i32
    return %arg1, %c0_i32, %c0_i32_0 : i32, i32, i32
  }
  func.func @transform_16(%arg0: i32, %arg1: i32) -> (i32, i32, i32) {
    %c0_i32 = arith.constant 0 : i32
    %c0_i32_0 = arith.constant 0 : i32
    %c0_i32_1 = arith.constant 0 : i32
    return %arg1, %c0_i32, %c0_i32_0 : i32, i32, i32
  }
  func.func @transform_17(%arg0: i32, %arg1: i32) -> (i32, i32, i32) {
    %c0_i32 = arith.constant 0 : i32
    %c0_i32_0 = arith.constant 0 : i32
    %c0_i32_1 = arith.constant 0 : i32
    return %arg1, %c0_i32, %c0_i32_0 : i32, i32, i32
  }
  func.func @transform_18(%arg0: i32, %arg1: i32) -> (i32, i32, i32) {
    %c0_i32 = arith.constant 0 : i32
    %c0_i32_0 = arith.constant 0 : i32
    %c0_i32_1 = arith.constant 0 : i32
    return %arg1, %c0_i32, %c0_i32_0 : i32, i32, i32
  }
  func.func @transform_19(%arg0: i32, %arg1: i32) -> (i32, i32, i32) {
    %c0_i32 = arith.constant 0 : i32
    %c0_i32_0 = arith.constant 0 : i32
    %c0_i32_1 = arith.constant 0 : i32
    return %arg1, %c0_i32, %c0_i32_0 : i32, i32, i32
  }
  func.func @transform_20(%arg0: i32, %arg1: i32) -> (i32, i32, i32) {
    %c0_i32 = arith.constant 0 : i32
    %c0_i32_0 = arith.constant 0 : i32
    %c0_i32_1 = arith.constant 0 : i32
    return %arg1, %c0_i32, %c0_i32_0 : i32, i32, i32
  }
  func.func @transform_21(%arg0: i32, %arg1: i32) -> (i32, i32, i32) {
    %c0_i32 = arith.constant 0 : i32
    %c0_i32_0 = arith.constant 0 : i32
    %c0_i32_1 = arith.constant 0 : i32
    return %arg0, %c0_i32, %c0_i32_0 : i32, i32, i32
  }
}

</mosaic_0001>

<bundles_post_ra>
// kernel: tpu_custom_call.1
= control target key start
LH: loop header
LB: loop body
LE: loop exit
PB: predicated region body
PF: predicated region fallthrough
CT: control target
= control target key end

     0   :  { %s7424_s0 = inlined_call_operand.hbm [shape: f32[2,8,128], index: 0, kind: input, shape index: {}]   ;;  %s7425_s1 = inlined_call_operand.hbm [shape: f32[128,128], index: 1, kind: input, shape index: {}]   ;;  %s7426_s2 = inlined_call_operand.hbm [shape: f32[1,128], index: 2, kind: input, shape index: {}]   ;;  %s7427_s3 = inlined_call_operand.hbm [shape: f32[1,128], index: 3, kind: input, shape index: {}]   ;;  %s7428_s4 = inlined_call_operand.hbm [shape: f32[1,128], index: 4, kind: input, shape index: {}]   ;;  %s7429_s5 = inlined_call_operand.hbm [shape: f32[2,4,128,128], index: 5, kind: input, shape index: {}]   ;;  %s7430_s6 = inlined_call_operand.hbm [shape: f32[2,4,128,128], index: 6, kind: input, shape index: {}]   ;;  %s7431_s7 = inlined_call_operand.hbm [shape: f32[2,4,128,128], index: 7, kind: input, shape index: {}]   ;;  %s7432_s8 = inlined_call_operand.vmem [shape: f32[2,4,1,128], index: 8, kind: input, shape index: {}]   ;;  %s7433_s9 = inlined_call_operand.vmem [shape: f32[2,4,1,128], index: 9, kind: input, shape index: {}]   ;;  %s7434_s10 = inlined_call_operand.vmem [shape: f32[2,4,1,128], index: 10, kind: input, shape index: {}]   ;;  %s7435_s11 = inlined_call_operand.hbm [shape: f32[2,512,128], index: 11, kind: input, shape index: {}]   ;;  %s7436_s12 = inlined_call_operand.vmem [shape: f32[2,1,128], index: 12, kind: input, shape index: {}]   ;;  %s7437_s13 = inlined_call_operand.vmem [shape: f32[2,1,128], index: 13, kind: input, shape index: {}]   ;;  %s7438_s14 = inlined_call_operand.vmem [shape: f32[2,1,128], index: 14, kind: input, shape index: {}]   ;;  %s7439_s15 = inlined_call_operand.hbm [shape: f32[2,128,128], index: 15, kind: input, shape index: {}]   ;;  %s7440_s16 = inlined_call_operand.vmem [shape: f32[2,1,128], index: 16, kind: input, shape index: {}]   ;;  %s7441_s17 = inlined_call_operand.hbm [shape: f32[2,128,128], index: 17, kind: input, shape index: {}]   ;;  %s7442_s18 = inlined_call_operand.vmem [shape: f32[2,1,128], index: 18, kind: input, shape index: {}]   ;;  %s7443_s19 = inlined_call_operand.vmem [shape: f32[2,1,128], index: 19, kind: input, shape index: {}]   ;;  %s7444_s20 = inlined_call_operand.vmem [shape: f32[2,1,128], index: 20, kind: input, shape index: {}]   ;;  %s7445_s21 = inlined_call_operand.hbm [shape: f32[2,8,128], index: 21, kind: output, shape index: {}]  }
   0x1   :  { %7519 = sst [smem:[#allocation55_spill]] %s7424_s0 }
   0x2   :  { %7520 = sst [smem:[#allocation56_spill]] %s7425_s1 }
   0x3   :  { %7521 = sst [smem:[#allocation57_spill]] %s7426_s2 }
   0x4   :  { %7522 = sst [smem:[#allocation58_spill]] %s7427_s3 }
   0x5   :  { %7523 = sst [smem:[#allocation59_spill]] %s7428_s4 }
   0x6   :  { %7524 = sst [smem:[#allocation60_spill]] %s7429_s5 }
   0x7   :  { %7525 = sst [smem:[#allocation61_spill]] %s7430_s6 }
   0x8   :  { %7526 = sst [smem:[#allocation62_spill]] %s7431_s7 }
   0x9   :  { %7527 = sst [smem:[#allocation63_spill]] %s7432_s8 }
   0xa   :  { %7528 = sst [smem:[#allocation64_spill]] %s7433_s9 }
   0xb   :  { %7529 = sst [smem:[#allocation65_spill]] %s7434_s10 }
   0xc   :  { %7530 = sst [smem:[#allocation66_spill]] %s7435_s11 }
   0xd   :  { %7531 = sst [smem:[#allocation67_spill]] %s7436_s12 }
   0xe   :  { %7532 = sst [smem:[#allocation68_spill]] %s7437_s13 }
   0xf   :  { %7533 = sst [smem:[#allocation69_spill]] %s7438_s14 }
  0x10   :  { %7534 = sst [smem:[#allocation70_spill]] %s7439_s15 }
  0x11   :  { %7535 = sst [smem:[#allocation71_spill]] %s7440_s16 }
  0x12   :  { %7536 = sst [smem:[#allocation72_spill]] %s7441_s17 }
  0x13   :  { %7537 = sst [smem:[#allocation73_spill]] %s7442_s18 }
  0x14   :  { %7538 = sst [smem:[#allocation74_spill]] %s7443_s19 }
  0x15   :  { %7539 = sst [smem:[#allocation75_spill]] %s7444_s20 }
  0x16   :  { %7540 = sst [smem:[#allocation76_spill]] %s7445_s21 }
  0x17   :  { %26 = vsyncpa [#allocation4], 0 }
  0x18   :  { %28 = vsyncpa [#allocation4 + $0x1], 0 }
  0x19   :  { %29 = vsyncpa [#allocation7], 0 }
  0x1a   :  { %30 = vsyncpa [#allocation10], 0 }
  0x1b   :  { %31 = vsyncpa [#allocation13], 0 }
  0x1c   :  { %33 = vsyncpa [#allocation13 + $0x1], 0 }
  0x1d   :  { %34 = vsyncpa [#allocation16], 0 }
  0x1e   :  { %36 = vsyncpa [#allocation16 + $0x1], 0 }
  0x1f   :  { %37 = vsyncpa [#allocation19], 0 }
  0x20   :  { %39 = vsyncpa [#allocation19 + $0x1], 0 }
  0x21   :  { %40 = vsyncpa [#allocation5], 0 }
  0x22   :  { %42 = vsyncpa [#allocation5 + $0x1], 0  ;;  %s6190_s2 = smov 0   ;;  %s6192_s25 = smov 0  }
  0x23   :  { %s6194_s26 = smov 0   ;;  %s6196_s27 = smov 0  }
  0x24   :  { %s6198_s3 = smov 0   ;;  %s6200_s28 = smov 0  }
  0x25   :  { %s6202_s29 = smov 0   ;;  %s6204_s0 = smov 0  }
  0x26   :  { %s6206_s4 = smov 0   ;;  %s6208_s30 = smov 0  }
  0x27   :  { %s6210_s5 = smov 0  }
  0x28 LB: > { %7541 = sst [smem:[#allocation29_spill]] %s6022_s25  ;;  %s6244_s22 = sadd.s32 4294967295, %s6058_s5   ;;  %s6058_s5 = sphi %s6210_s5, %s48_s5   ;;  %s6054_s30 = sphi %s6208_s30, %s7663_s30   ;;  %s6050_s4 = sphi %s6206_s4, %s7662_s4   ;;  %s6046_s0 = sphi %s6204_s0, %s7661_s0   ;;  %s6042_s29 = sphi %s6202_s29, %s7660_s29   ;;  %s6038_s28 = sphi %s6200_s28, %s7659_s28   ;;  %s6034_s3 = sphi %s6198_s3, %s7658_s3   ;;  %s6030_s27 = sphi %s6196_s27, %s7657_s27   ;;  %s6026_s26 = sphi %s6194_s26, %s7656_s26   ;;  %s6022_s25 = sphi %s6192_s25, %s7655_s25   ;;  %s6018_s2 = sphi %s6190_s2, %s7654_s2  }
  0x29   : > { %7542 = sst [smem:[#allocation30_spill]] %s6026_s26  ;;  %p190_p0 = scmp.ne.s32.totalorder %s6022_s25, %s6018_s2 }
  0x2a   : > { %7543 = sst [smem:[#allocation31_spill]] %s6030_s27  ;;  %p7453_p1 = scmp.eq.s32.totalorder %s6244_s22, 0 }
  0x2b   : > { %7544 = sst [smem:[#allocation32_spill]] %s6034_s3  ;;  %p3827_p2 = scmp.ge.s32.totalorder %s6058_s5, 1 }
  0x2c   : > { %7545 = sst [smem:[#allocation33_spill]] %s6038_s28  ;;  %p617_p3 = scmp.lt.s32.totalorder %s6058_s5, 5 }
  0x2d   : > { %7546 = sst [smem:[#allocation34_spill]] %s6042_s29  ;;  %p6252_p4 = por %p190_p0, %p7453_p1 }
  0x2e   : > { %7547 = sst [smem:[#allocation35_spill]] %s6046_s0  ;;  %p6256_p5 = pnand %p3827_p2, %p617_p3 }
  0x2f   : > { %7548 = sst [smem:[#allocation36_spill]] %s6050_s4  ;;  %s6060_s24 = smov [#allocation6]  }
  0x30   : > { %7549 = sst [smem:[#allocation37_spill]] %s6054_s30  ;;  %s629_s21 = sshll.u32 %s6060_s24, 4  ;;  %s630_s21 = int_to_ptr.vmem [resolvable:$true] %s629_s21 }
  0x31   : > { %7550 = sst [smem:[#allocation38_spill]] %s6058_s5  ;;  %p5422_p6 = pneg %p6256_p5 }
  0x32   : > { %s7551_s23 = scalar_select %p6252_p4, 1, 0 }
  0x33   : > { %s7553_s1 = scalar_select %p6256_p5, 1, 0 }
  0x34   : > { %7552 = sst [smem:[#allocation39_spill]] %s7551_s23  ;;  %p6264_p7 = pnand %p5422_p6, %p7453_p1 }
  0x35   : > { %7554 = sst [smem:[#allocation40_spill]] %s7553_s1  ;;  %s6061_s0 = smov [#allocation9]  }
  0x36   : > { %s7555_s2 = scalar_select %p6264_p7, 1, 0 }
  0x37   : > { %s654_s20 = sshll.u32 %s6061_s0, 4  ;;  %s7556_s16 = sld [smem:[#allocation56_spill]]  ;;  %s6268_s20 = int_to_ptr.vmem [resolvable:$true] %s654_s20 }
  0x38   : > { %p6278_p9 = pneg %p6264_p7 }
  0x3a   : > { %s7557_s24 = scalar_select %p6278_p9, 1, 0 }
  0x3d   : > { %s5594_s14 = scalar_lea.hbm %s7556_s16, 2048 }
  0x3e   : > { %p5595_p8 = scmp.ne.s32.totalorder %s7556_s16, %s5594_s14  ;;  %p5601_p12 = scmp.lt.u32.totalorder %s5594_s14, %s7556_s16 }
  0x40   : > { %p5597_p10 = pnand %p6278_p9, %p5595_p8 }
  0x42   : > { %p5598_p11 = pneg %p5597_p10 }
  0x44   : > { %p5603_p13 = pnand %p5601_p12, %p5598_p11 }
  0x46   : > { %5606 = shalt.err (!%p5603_p13)
}
  0x47   : > { %s5607_s18 = scalar_lea.vmem %s630_s21, 2048  ;;  %p5615_p6 = scmp.lt.s32.totalorder %s630_s21, %s630_s21 }
  0x48   : > { %p5608_p0 = scmp.ne.s32.totalorder %s630_s21, %s5607_s18  ;;  %p5616_p1 = scmp.lt.s32.totalorder %s5607_s18, %s5607_s18 }
  0x4a   : > { %p5610_p2 = pnand %p5608_p0, %p6278_p9  ;;  %p5617_p4 = por %p5616_p1, %p5615_p6 }
  0x4c   : > { %p5611_p3 = pneg %p5610_p2 }
  0x4e   : > { %p5618_p5 = pnand %p5617_p4, %p5611_p3 }
  0x50   : > { %5621 = shalt.err (!%p5618_p5)
}
  0x51   : > { %s7461_s10 = smov 128   ;;  %s7463_s13 = smov 8  }
  0x52   : > { %5425 = dma.hbm_to_vmem [thread:$0]  (!%p6264_p7), %s7556_s16, 2048, %s630_s21, [#allocation7], %s7461_s10, %s7461_s10, %s7463_s13  }
  0x53   : > { %s7558_s8 = sld [smem:[#allocation58_spill]] }
  0x59   : > { %s5622_s12 = scalar_lea.hbm %s7558_s8, 16 }
  0x5a   : > { %p5623_p1 = scmp.ne.s32.totalorder %s7558_s8, %s5622_s12  ;;  %p5629_p8 = scmp.lt.u32.totalorder %s5622_s12, %s7558_s8 }
  0x5c   : > { %p5625_p4 = pnand %p5623_p1, %p6278_p9 }
  0x5e   : > { %p5626_p5 = pneg %p5625_p4 }
  0x60   : > { %p5631_p10 = pnand %p5629_p8, %p5626_p5 }
  0x62   : > { %5634 = shalt.err (!%p5631_p10)
}
  0x63   : > { %s5635_s21 = scalar_lea.vmem %s6268_s20, 16  ;;  %s5642_s29 = scalar_lea.vmem %s6268_s20, 32 }
  0x64   : > { %p5636_p11 = scmp.ne.s32.totalorder %s6268_s20, %s5635_s21  ;;  %p5643_p0 = scmp.lt.s32.totalorder %s6268_s20, %s6268_s20 }
  0x65   : > { %p5644_p2 = scmp.lt.s32.totalorder %s5642_s29, %s5635_s21 }
  0x66   : > { %p5638_p12 = pnand %p5636_p11, %p6278_p9 }
  0x67   : > { %p5645_p3 = por %p5644_p2, %p5643_p0 }
  0x68   : > { %p5639_p13 = pneg %p5638_p12 }
  0x6a   : > { %p5646_p6 = pnand %p5645_p3, %p5639_p13 }
  0x6c   : > { %5649 = shalt.err (!%p5646_p6)
}
  0x6d   : > { %5431 = dma.hbm_to_vmem [thread:$0]  (!%p6264_p7), %s7558_s8, 16, %s6268_s20, [#allocation10]  }
  0x6e   : > { %p7468_p1 = scmp.eq.s32.totalorder %s6058_s5, 0  ;;  %p184_p4 = scmp.ne.s32.totalorder %s6026_s26, %s6022_s25 }
  0x6f   : > { %p7467_p5 = scmp.lt.s32.totalorder %s6058_s5, 4  ;;  %s6326_s1 = sand.u32 1, %s6058_s5  }
  0x70   : > { %7559 = sst [smem:[#allocation41_spill]] %s6326_s1  ;;  %s7460_s9 = sand.u32 1, %s6026_s26  }
  0x71   : > { %p186_p8 = por %p184_p4, %p7468_p1  ;;  %s6333_s14 = sshll.u32 %s7460_s9, 9 }
  0x72   : > { %7560 = sst [smem:[#allocation42_spill]] %s6333_s14  ;;  %s6336_s19 = sshll.u32 %s6050_s4, 13 }
  0x73   : > { %7561 = sst [smem:[#allocation43_spill]] %s6336_s19  ;;  %s7562_s21 = sld [smem:[#allocation60_spill]] }
  0x74   : > { %s698_s29 = scalar_lea.vmem [#allocation12], %s6333_s14  ;;  %p6347_p10 = pnand %p7467_p5, %p186_p8 }
  0x75   : > { %s705_s12 = sshll.u32 %s698_s29, 4  ;;  %s6351_s12 = int_to_ptr.vmem [resolvable:$true] %s705_s12 }
  0x76   : > { %s7563_s23 = scalar_select %p6347_p10, 1, 0 }
  0x77   : > { %p6358_p12 = pneg %p6347_p10 }
  0x78   : > { %7564 = sst [smem:[#allocation44_spill]] %s7563_s23 }
  0x79   : > { %s6342_s20 = scalar_lea.hbm %s7562_s21, %s6336_s19  ;;  %s5655_s13 = scalar_lea.hbm %s7562_s21, 16384 }
  0x7a   : > { %s5650_s10 = scalar_lea.hbm %s6342_s20, 8192  ;;  %p5656_p2 = scmp.lt.u32.totalorder %s6342_s20, %s7562_s21 }
  0x7b   : > { %p5651_p11 = scmp.ne.s32.totalorder %s6342_s20, %s5650_s10  ;;  %p5657_p3 = scmp.lt.u32.totalorder %s5655_s13, %s5650_s10 }
  0x7c   : > { %s7565_s0 = scalar_select %p6358_p12, 1, 0 }
  0x7d   : > { %p5653_p13 = pnand %p6358_p12, %p5651_p11  ;;  %p5658_p6 = por %p5657_p3, %p5656_p2 }
  0x7e   : > { %7566 = sst [smem:[#allocation45_spill]] %s7565_s0  ;;  %p5659_p4 = scmp.lt.u32.totalorder %s5650_s10, %s6342_s20 }
  0x7f   : > { %p5654_p0 = pneg %p5653_p13 }
  0x80   : > { %p5660_p8 = por %p5659_p4, %p5658_p6 }
  0x82   : > { %p5661_p5 = pnand %p5660_p8, %p5654_p0 }
  0x84   : > { %5664 = shalt.err (!%p5661_p5)
}
  0x85   : > { %s5665_s9 = scalar_lea.vmem %s6351_s12, 8192  ;;  %s6064_s18 = smov [#allocation12]  }
  0x86   : > { %p5666_p11 = scmp.ne.s32.totalorder %s6351_s12, %s5665_s9  ;;  %s5670_s29 = sshll.u32 %s6064_s18, 4  ;;  %s5671_s29 = int_to_ptr.vmem [resolvable:$false] %s5670_s29 }
  0x87   : > { %s5672_s8 = scalar_lea.vmem %s5671_s29, 16384  ;;  %p5673_p7 = scmp.lt.s32.totalorder %s6351_s12, %s5671_s29 }
  0x88   : > { %p5668_p13 = pnand %p5666_p11, %p6358_p12  ;;  %p5674_p9 = scmp.lt.s32.totalorder %s5672_s8, %s5665_s9 }
  0x8a   : > { %p5669_p1 = pneg %p5668_p13  ;;  %p5675_p2 = por %p5674_p9, %p5673_p7 }
  0x8c   : > { %p5676_p3 = pnand %p5675_p2, %p5669_p1 }
  0x8e   : > { %5679 = shalt.err (!%p5676_p3)
}
  0x8f   : > { %s7567_s16 = smov 8   ;;  %s7568_s10 = smov 128  }
  0x90   : > { %s7569_s13 = scalar_lea.sflag [#allocation13], %s6326_s1  ;;  %s7570_s7 = sld [smem:[#allocation62_spill]] }
  0x91   : > { %5441 = dma.hbm_to_vmem [thread:$0]  (!%p6347_p10), %s6342_s20, 8192, %s6351_s12, %s7569_s13, %s7568_s10, %s7568_s10, %s7567_s16  }
  0x92   : > { %s740_s8 = scalar_lea.vmem [#allocation15], %s6333_s14  ;;  %s7478_s25 = scalar_lea.sflag [#allocation16], %s6326_s1 }
  0x93   : > { %s747_s21 = sshll.u32 %s740_s8, 4  ;;  %s6393_s21 = int_to_ptr.vmem [resolvable:$true] %s747_s21 }
  0x96   : > { %s6390_s9 = scalar_lea.hbm %s7570_s7, %s6336_s19  ;;  %s5685_s13 = scalar_lea.hbm %s7570_s7, 16384 }
  0x97   : > { %s5680_s11 = scalar_lea.hbm %s6390_s9, 8192  ;;  %p5686_p5 = scmp.lt.u32.totalorder %s6390_s9, %s7570_s7 }
  0x98   : > { %p5681_p7 = scmp.ne.s32.totalorder %s6390_s9, %s5680_s11  ;;  %p5687_p0 = scmp.lt.u32.totalorder %s5685_s13, %s5680_s11 }
  0x99   : > { %p5689_p4 = scmp.lt.u32.totalorder %s5680_s11, %s6390_s9 }
  0x9a   : > { %p5683_p9 = pnand %p5681_p7, %p6358_p12  ;;  %p5688_p6 = por %p5687_p0, %p5686_p5 }
  0x9c   : > { %p5684_p1 = pneg %p5683_p9  ;;  %p5690_p8 = por %p5689_p4, %p5688_p6 }
  0x9e   : > { %p5691_p11 = pnand %p5690_p8, %p5684_p1 }
  0xa0   : > { %5694 = shalt.err (!%p5691_p11)
}
  0xa1   : > { %s5695_s8 = scalar_lea.vmem %s6393_s21, 8192  ;;  %s6065_s20 = smov [#allocation15]  }
  0xa2   : > { %p5696_p13 = scmp.ne.s32.totalorder %s6393_s21, %s5695_s8  ;;  %s5700_s12 = sshll.u32 %s6065_s20, 4  ;;  %s5701_s12 = int_to_ptr.vmem [resolvable:$false] %s5700_s12 }
  0xa3   : > { %s5702_s18 = scalar_lea.vmem %s5701_s12, 16384  ;;  %p5703_p7 = scmp.lt.s32.totalorder %s6393_s21, %s5701_s12 }
  0xa4   : > { %p5698_p2 = pnand %p5696_p13, %p6358_p12  ;;  %p5704_p9 = scmp.lt.s32.totalorder %s5702_s18, %s5695_s8 }
  0xa6   : > { %p5699_p3 = pneg %p5698_p2  ;;  %p5705_p5 = por %p5704_p9, %p5703_p7 }
  0xa8   : > { %p5706_p0 = pnand %p5705_p5, %p5699_p3 }
  0xaa   : > { %5709 = shalt.err (!%p5706_p0)
}
  0xab   : > { %5447 = dma.hbm_to_vmem [thread:$0]  (!%p6347_p10), %s6390_s9, 8192, %s6393_s21, %s7478_s25, %s7568_s10, %s7568_s10, %s7567_s16  }
  0xac   : > { %s7571_s11 = sand.u32 1, %s6026_s26   ;;  %s7479_s29 = sshll.u32 %s6050_s4, 11 }
  0xad   : > { %s6424_s13 = sshll.u32 %s7571_s11, 7  ;;  %s7572_s15 = sld [smem:[#allocation70_spill]] }
  0xae   : > { %s821_s7 = scalar_lea.vmem [#allocation18], %s6424_s13  ;;  %s7493_s21 = scalar_lea.sflag [#allocation19], %s6326_s1 }
  0xaf   : > { %s828_s14 = sshll.u32 %s821_s7, 4  ;;  %s6436_s14 = int_to_ptr.vmem [resolvable:$true] %s828_s14 }
  0xb3   : > { %s6432_s12 = scalar_lea.hbm %s7572_s15, %s7479_s29  ;;  %s5715_s8 = scalar_lea.hbm %s7572_s15, 4096 }
  0xb4   : > { %s5710_s9 = scalar_lea.hbm %s6432_s12, 2048  ;;  %p5716_p8 = scmp.lt.u32.totalorder %s6432_s12, %s7572_s15 }
  0xb5   : > { %p5711_p1 = scmp.ne.s32.totalorder %s6432_s12, %s5710_s9  ;;  %p5717_p11 = scmp.lt.u32.totalorder %s5715_s8, %s5710_s9 }
  0xb6   : > { %p5719_p2 = scmp.lt.u32.totalorder %s5710_s9, %s6432_s12 }
  0xb7   : > { %p5713_p6 = pnand %p5711_p1, %p6358_p12  ;;  %p5718_p13 = por %p5717_p11, %p5716_p8 }
  0xb9   : > { %p5714_p4 = pneg %p5713_p6  ;;  %p5720_p3 = por %p5719_p2, %p5718_p13 }
  0xbb   : > { %p5721_p7 = pnand %p5720_p3, %p5714_p4 }
  0xbd   : > { %5724 = shalt.err (!%p5721_p7)
}
  0xbe   : > { %s5725_s7 = scalar_lea.vmem %s6436_s14, 2048  ;;  %s6066_s25 = smov [#allocation18]  }
  0xbf   : > { %p5726_p9 = scmp.ne.s32.totalorder %s6436_s14, %s5725_s7  ;;  %s5730_s11 = sshll.u32 %s6066_s25, 4  ;;  %s5731_s11 = int_to_ptr.vmem [resolvable:$false] %s5730_s11 }
  0xc0   : > { %s5732_s29 = scalar_lea.vmem %s5731_s11, 4096  ;;  %p5733_p1 = scmp.lt.s32.totalorder %s6436_s14, %s5731_s11 }
  0xc1   : > { %p5728_p5 = pnand %p5726_p9, %p6358_p12  ;;  %p5734_p6 = scmp.lt.s32.totalorder %s5732_s29, %s5725_s7 }
  0xc3   : > { %p5729_p0 = pneg %p5728_p5  ;;  %p5735_p8 = por %p5734_p6, %p5733_p1 }
  0xc5   : > { %p5736_p11 = pnand %p5735_p8, %p5729_p0 }
  0xc7   : > { %5739 = shalt.err (!%p5736_p11)
}
  0xc8   : > { %5453 = dma.hbm_to_vmem [thread:$0]  (!%p6347_p10), %s6432_s12, 2048, %s6436_s14, %s7493_s21, %s7568_s10, %s7568_s10, %s7567_s16  }
  0xc9   : > { %s7573_s9 = sshll.u32 %s6050_s4, 11  ;;  %s7574_s17 = sld [smem:[#allocation72_spill]] }
  0xca   : > { %s848_s25 = scalar_lea.vmem [#allocation20], %s6424_s13  ;;  %s6067_s29 = smov [#allocation8]  }
  0xcb   : > { %s6473_s11 = sshll.u32 %s848_s25, 4  ;;  %s643_s18 = sshll.u32 %s6067_s29, 4  ;;  %s644_s18 = int_to_ptr.vmem [resolvable:$true] %s643_s18  ;;  %s6653_s11 = int_to_ptr.vmem [resolvable:$true] %s6473_s11 }
  0xcc   : > { %s7575_s23 = sld [smem:[#allocation57_spill]]  ;;  %p7576_p13 = scmp.ne.s32.totalorder %s7557_s24, 0 }
  0xcf   : > { %s6470_s7 = scalar_lea.hbm %s7574_s17, %s7573_s9 }
  0xd2   : > { %s5740_s0 = scalar_lea.hbm %s7575_s23, 16 }
  0xd3   : > { %p5741_p4 = scmp.ne.s32.totalorder %s7575_s23, %s5740_s0  ;;  %p5747_p7 = scmp.lt.u32.totalorder %s5740_s0, %s7575_s23 }
  0xd5   : > { %p5743_p2 = pnand %p5741_p4, %p7576_p13 }
  0xd7   : > { %p5744_p3 = pneg %p5743_p2 }
  0xd9   : > { %p5749_p9 = pnand %p5747_p7, %p5744_p3 }
  0xdb   : > { %5752 = shalt.err (!%p5749_p9)
}
  0xdc   : > { %s5753_s13 = scalar_lea.vmem %s644_s18, 16  ;;  %s5760_s15 = scalar_lea.vmem %s644_s18, 32 }
  0xdd   : > { %p5754_p5 = scmp.ne.s32.totalorder %s644_s18, %s5753_s13  ;;  %p5761_p6 = scmp.lt.s32.totalorder %s644_s18, %s644_s18 }
  0xde   : > { %p5762_p8 = scmp.lt.s32.totalorder %s5760_s15, %s5753_s13 }
  0xdf   : > { %p5756_p0 = pnand %p5754_p5, %p7576_p13 }
  0xe0   : > { %p5763_p11 = por %p5762_p8, %p5761_p6 }
  0xe1   : > { %p5757_p1 = pneg %p5756_p0 }
  0xe3   : > { %p5764_p10 = pnand %p5763_p11, %p5757_p1 }
  0xe5   : > { %5767 = shalt.err (!%p5764_p10)
}
  0xe6   : > { %p7577_p4 = scmp.ne.s32.totalorder %s7555_s2, 0  ;;  %s6068_s19 = smov [#allocation11]  }
  0xe7   : > { %s665_s0 = sshll.u32 %s6068_s19, 4  ;;  %s7578_s20 = sld [smem:[#allocation59_spill]]  ;;  %s666_s0 = int_to_ptr.vmem [resolvable:$true] %s665_s0 }
  0xe8   : > { %5428 = dma.hbm_to_vmem [thread:$0]  (!%p7577_p4), %s7575_s23, 16, %s644_s18, [#allocation7]  }
  0xed   : > { %s5768_s25 = scalar_lea.hbm %s7578_s20, 16 }
  0xee   : > { %p5769_p2 = scmp.ne.s32.totalorder %s7578_s20, %s5768_s25  ;;  %p5775_p7 = scmp.lt.u32.totalorder %s5768_s25, %s7578_s20 }
  0xf0   : > { %p5771_p10 = pnand %p5769_p2, %p7576_p13 }
  0xf2   : > { %p5772_p3 = pneg %p5771_p10 }
  0xf4   : > { %p5777_p9 = pnand %p5775_p7, %p5772_p3 }
  0xf6   : > { %5780 = shalt.err (!%p5777_p9)
}
  0xf7   : > { %s5781_s18 = scalar_lea.vmem %s666_s0, 16  ;;  %s5788_s15 = scalar_lea.vmem %s666_s0, 32 }
  0xf8   : > { %p5782_p5 = scmp.ne.s32.totalorder %s666_s0, %s5781_s18  ;;  %p5789_p6 = scmp.lt.s32.totalorder %s666_s0, %s666_s0 }
  0xf9   : > { %p5790_p8 = scmp.lt.s32.totalorder %s5788_s15, %s5781_s18 }
  0xfa   : > { %p5784_p0 = pnand %p5782_p5, %p7576_p13 }
  0xfb   : > { %p5791_p11 = por %p5790_p8, %p5789_p6 }
  0xfc   : > { %p5785_p1 = pneg %p5784_p0 }
  0xfe   : > { %p5792_p12 = pnand %p5791_p11, %p5785_p1 }
 0x100   : > { %5795 = shalt.err (!%p5792_p12)
}
 0x101   : > { %5434 = dma.hbm_to_vmem [thread:$0]  (!%p7577_p4), %s7578_s20, 16, %s666_s0, [#allocation10]  }
 0x102   : > { %s3826_s2 = sadd.s32 4294967294, %s6058_s5   ;;  %s57_s24 = sadd.s32 1, %s6050_s4 }
 0x103   : > { %p58_p12 = scmp.ge.s32.totalorder %s57_s24, 2  ;;  %s60_s19 = sadd.s32 1, %s6054_s30 }
 0x104   : > { %s67_s9 = sadd.s32 1, %s6038_s28  ;;  %p74_p13 = scmp.ne.s32.totalorder %s6038_s28, %s6034_s3 }
 0x105   : > { %s7665_s24 = smov (%p58_p12, %s57_s24), 0  ;;  %s7667_s19 = smov (!%p58_p12, %s60_s19), %s6054_s30 }
 0x106   : > { %7579 = sst [smem:[#allocation46_spill]] %s7665_s24  ;;  %p7580_p4 = scmp.eq.s32.totalorder %s6058_s5, 0 }
 0x107   : > { %p80_p10 = scmp.ne.s32.totalorder %s6034_s3, %s6030_s27  ;;  %p62_p3 = scmp.ge.s32.totalorder %s7667_s19, 2 }
 0x108   : > { %p6525_p2 = por %p7580_p4, %p74_p13  ;;  %s174_s8 = ssub.s32 %s6050_s4, %s7665_s24 }
 0x109   : > { %p7582_p7 = scmp.eq.s32.totalorder %s6244_s22, 0  ;;  %p175_p5 = scmp.eq.s32.totalorder %s174_s8, 0 }
 0x10a   : > { %s7669_s19 = smov (%p62_p3, %s7667_s19), 0  ;;  %s7585_s29 = sadd.s32 1, %s6026_s26 }
 0x10b   : > { %p6538_p9 = por %p7582_p7, %p80_p10  ;;  %7584 = sst [smem:[#allocation47_spill]] %s7669_s19 }
 0x10c   : > { %s6547_s14 = scalar_select %p175_p5, %s6026_s26, %s7585_s29  }
 0x10d   : > { %s7583_s25 = scalar_select %p6538_p9, 1, 0 }
 0x10e   : > { %7586 = sst [smem:[#allocation48_spill]] %s6547_s14  ;;  %s7587_s12 = sld [smem:[#allocation43_spill]] }
 0x10f   : > { %s64_s13 = ssub.s32 %s6054_s30, %s7669_s19  ;;  %p604_p0 = scmp.eq.s32.totalorder %s6244_s22, 3 }
 0x110   : > { %p65_p1 = scmp.eq.s32.totalorder %s64_s13, 0  ;;  %p610_p6 = scmp.eq.s32.totalorder %s3826_s2, 3 }
 0x111   : > { %p6555_p8 = por %p604_p0, %p74_p13  ;;  %s676_s15 = sand.u32 1, %s6038_s28  }
 0x112   : > { %s6561_s6 = scalar_select %p65_p1, %s6038_s28, %s67_s9  }
 0x113   : > { %s7588_s18 = scalar_select %p6555_p8, 1, 0 }
 0x114   : > { %7590 = sst [smem:[#allocation49_spill]] %s6561_s6  ;;  %p6566_p11 = por %p610_p6, %p80_p10 }
 0x115   : > { %7589 = sst [smem:[#allocation43_spill]] %s7588_s18  ;;  %s3833_s8 = sshll.u32 %s676_s15, 3 }
 0x116   : > { %s7591_s1 = scalar_select %p6566_p11, 1, 0 }
 0x117   : > { %s3834_s29 = sshll.u32 %s6054_s30, 7  ;;  %s7593_s23 = sld [smem:[#allocation55_spill]] }
 0x118   : > { %7592 = sst [smem:[#allocation50_spill]] %s7591_s1  ;;  %s680_s2 = scalar_lea.vmem [#allocation3], %s3833_s8 }
 0x119   : > { %s687_s19 = sshll.u32 %s680_s2, 4  ;;  %p7594_p12 = scmp.lt.s32.totalorder %s6058_s5, 4  ;;  %s6584_s19 = int_to_ptr.vmem [resolvable:$true] %s687_s19 }
 0x11a   : > { %s7596_s20 = sld [smem:[#allocation61_spill]]  ;;  %s677_s30 = scalar_lea.sflag [#allocation4], %s676_s15 }
 0x11b   : > { %p6580_p13 = pnand %p7594_p12, %p6525_p2 }
 0x11d   : > { %s6574_s13 = scalar_lea.hbm %s7593_s23, %s3834_s29  ;;  %p5798_p10 = pneg %p6580_p13 }
 0x11e   : > { %s5796_s4 = scalar_lea.hbm %s6574_s13, 128  ;;  %s5801_s2 = scalar_lea.hbm %s7593_s23, 256 }
 0x11f   : > { %p5797_p4 = scmp.ne.s32.totalorder %s6574_s13, %s5796_s4  ;;  %p5802_p7 = scmp.lt.u32.totalorder %s6574_s13, %s7593_s23 }
 0x120   : > { %s6590_s29 = scalar_lea.hbm %s7596_s20, %s7587_s12  ;;  %p5803_p5 = scmp.lt.u32.totalorder %s5801_s2, %s5796_s4 }
 0x121   : > { %p5799_p2 = pnand %p5798_p10, %p5797_p4  ;;  %p5805_p1 = scmp.lt.u32.totalorder %s5796_s4, %s6574_s13 }
 0x122   : > { %p5804_p0 = por %p5803_p5, %p5802_p7 }
 0x123   : > { %p5800_p3 = pneg %p5799_p2 }
 0x124   : > { %p5806_p6 = por %p5805_p1, %p5804_p0 }
 0x126   : > { %p5807_p12 = pnand %p5806_p6, %p5800_p3 }
 0x128   : > { %5810 = shalt.err (!%p5807_p12)
}
 0x129   : > { %s5811_s24 = scalar_lea.vmem %s6584_s19, 128  ;;  %s6069_s15 = smov [#allocation3]  }
 0x12a   : > { %p5812_p4 = scmp.ne.s32.totalorder %s6584_s19, %s5811_s24  ;;  %s5816_s21 = sshll.u32 %s6069_s15, 4  ;;  %s5817_s21 = int_to_ptr.vmem [resolvable:$false] %s5816_s21 }
 0x12b   : > { %s5818_s28 = scalar_lea.vmem %s5817_s21, 256  ;;  %p5819_p8 = scmp.lt.s32.totalorder %s6584_s19, %s5817_s21 }
 0x12c   : > { %p5814_p2 = pnand %p5812_p4, %p5798_p10  ;;  %p5820_p7 = scmp.lt.s32.totalorder %s5818_s28, %s5811_s24 }
 0x12e   : > { %p5815_p11 = pneg %p5814_p2  ;;  %p5821_p5 = por %p5820_p7, %p5819_p8 }
 0x130   : > { %p5822_p0 = pnand %p5821_p5, %p5815_p11 }
 0x132   : > { %5825 = shalt.err (!%p5822_p0)
}
 0x133   : > { %s7597_s4 = sld [smem:[#allocation42_spill]]  ;;  %s7598_s6 = sld [smem:[#allocation45_spill]] }
 0x134   : > { %5438 = dma.hbm_to_vmem [thread:$0]  (!%p6580_p13), %s6574_s13, 128, %s6584_s19, %s677_s30  }
 0x135   : > { %s7599_s15 = sld [smem:[#allocation66_spill]]  ;;  %s5826_s9 = scalar_lea.hbm %s6590_s29, 8192 }
 0x136   : > { %p5827_p8 = scmp.ne.s32.totalorder %s6590_s29, %s5826_s9  ;;  %s5831_s14 = scalar_lea.hbm %s7596_s20, 16384 }
 0x137   : > { %p5832_p13 = scmp.lt.u32.totalorder %s6590_s29, %s7596_s20  ;;  %p5833_p1 = scmp.lt.u32.totalorder %s5831_s14, %s5826_s9 }
 0x138   : > { %p5835_p12 = scmp.lt.u32.totalorder %s5826_s9, %s6590_s29 }
 0x139   : > { %s719_s0 = scalar_lea.vmem [#allocation14], %s7597_s4  ;;  %p7600_p11 = scmp.ne.s32.totalorder %s7598_s6, 0 }
 0x13a   : > { %s726_s8 = sshll.u32 %s719_s0, 4  ;;  %p5834_p6 = por %p5833_p1, %p5832_p13  ;;  %s6618_s8 = int_to_ptr.vmem [resolvable:$true] %s726_s8 }
 0x13b   : > { %s6624_s21 = scalar_lea.hbm %s7599_s15, %s7587_s12  ;;  %p5829_p10 = pnand %p5827_p8, %p7600_p11 }
 0x13c   : > { %p5836_p4 = por %p5835_p12, %p5834_p6 }
 0x13d   : > { %p5830_p3 = pneg %p5829_p10 }
 0x13f   : > { %p5837_p2 = pnand %p5836_p4, %p5830_p3 }
 0x141   : > { %5840 = shalt.err (!%p5837_p2)
}
 0x142   : > { %s5841_s19 = scalar_lea.vmem %s6618_s8, 8192  ;;  %s6070_s23 = smov [#allocation14]  }
 0x143   : > { %p5842_p7 = scmp.ne.s32.totalorder %s6618_s8, %s5841_s19  ;;  %s5846_s12 = sshll.u32 %s6070_s23, 4  ;;  %s5847_s12 = int_to_ptr.vmem [resolvable:$false] %s5846_s12 }
 0x144   : > { %s5848_s26 = scalar_lea.vmem %s5847_s12, 16384  ;;  %p5849_p8 = scmp.lt.s32.totalorder %s6618_s8, %s5847_s12 }
 0x145   : > { %p5844_p5 = pnand %p5842_p7, %p7600_p11  ;;  %p5850_p10 = scmp.lt.s32.totalorder %s5848_s26, %s5841_s19 }
 0x147   : > { %p5845_p0 = pneg %p5844_p5  ;;  %p5851_p13 = por %p5850_p10, %p5849_p8 }
 0x149   : > { %p5852_p1 = pnand %p5851_p13, %p5845_p0 }
 0x14b   : > { %5855 = shalt.err (!%p5852_p1)
}
 0x14c   : > { %s7601_s14 = sld [smem:[#allocation44_spill]]  ;;  %s7603_s13 = sld [smem:[#allocation41_spill]] }
 0x14d   : > { %s782_s2 = scalar_lea.vmem [#allocation17], %s7597_s4  ;;  %s5856_s9 = scalar_lea.hbm %s6624_s21, 8192 }
 0x14e   : > { %s789_s24 = sshll.u32 %s782_s2, 4  ;;  %p5857_p6 = scmp.ne.s32.totalorder %s6624_s21, %s5856_s9  ;;  %s6656_s24 = int_to_ptr.vmem [resolvable:$true] %s789_s24 }
 0x14f   : > { %s5861_s19 = scalar_lea.hbm %s7599_s15, 16384  ;;  %p5862_p2 = scmp.lt.u32.totalorder %s6624_s21, %s7599_s15 }
 0x150   : > { %p5859_p12 = pnand %p5857_p6, %p7600_p11  ;;  %p5863_p7 = scmp.lt.u32.totalorder %s5861_s19, %s5856_s9 }
 0x151   : > { %p5865_p0 = scmp.lt.u32.totalorder %s5856_s9, %s6624_s21 }
 0x152   : > { %p7602_p3 = scmp.ne.s32.totalorder %s7601_s14, 0  ;;  %s7604_s0 = scalar_lea.sflag [#allocation13], %s7603_s13 }
 0x153   : > { %p5860_p4 = pneg %p5859_p12  ;;  %p5864_p5 = por %p5863_p7, %p5862_p2 }
 0x154   : > { %5444 = dma.hbm_to_vmem [thread:$0]  (!%p7602_p3), %s6590_s29, 8192, %s6618_s8, %s7604_s0, %s7568_s10, %s7568_s10, %s7567_s16  }
 0x155   : > { %p5866_p8 = por %p5865_p0, %p5864_p5 }
 0x157   : > { %p5867_p10 = pnand %p5866_p8, %p5860_p4 }
 0x159   : > { %5870 = shalt.err (!%p5867_p10)
}
 0x15a   : > { %s5871_s29 = scalar_lea.vmem %s6656_s24, 8192  ;;  %s6071_s4 = smov [#allocation17]  }
 0x15b   : > { %p5872_p13 = scmp.ne.s32.totalorder %s6656_s24, %s5871_s29  ;;  %s5876_s8 = sshll.u32 %s6071_s4, 4  ;;  %s5877_s8 = int_to_ptr.vmem [resolvable:$false] %s5876_s8 }
 0x15c   : > { %s5878_s26 = scalar_lea.vmem %s5877_s8, 16384  ;;  %p5879_p12 = scmp.lt.s32.totalorder %s6656_s24, %s5877_s8 }
 0x15d   : > { %p5874_p1 = pnand %p5872_p13, %p7600_p11  ;;  %p5880_p9 = scmp.lt.s32.totalorder %s5878_s26, %s5871_s29 }
 0x15f   : > { %p5875_p6 = pneg %p5874_p1  ;;  %p5881_p2 = por %p5880_p9, %p5879_p12 }
 0x161   : > { %p5882_p7 = pnand %p5881_p2, %p5875_p6 }
 0x163   : > { %5885 = shalt.err (!%p5882_p7)
}
 0x164   : > { %s7605_s0 = scalar_lea.sflag [#allocation16], %s7603_s13  ;;  %s5886_s2 = scalar_lea.hbm %s6470_s7, 2048 }
 0x165   : > { %5450 = dma.hbm_to_vmem [thread:$0]  (!%p7602_p3), %s6624_s21, 8192, %s6656_s24, %s7605_s0, %s7568_s10, %s7568_s10, %s7567_s16  }
 0x166   : > { %p5887_p4 = scmp.ne.s32.totalorder %s6470_s7, %s5886_s2  ;;  %s5891_s30 = scalar_lea.hbm %s7574_s17, 4096 }
 0x167   : > { %p5892_p0 = scmp.lt.u32.totalorder %s6470_s7, %s7574_s17  ;;  %p5893_p8 = scmp.lt.u32.totalorder %s5891_s30, %s5886_s2 }
 0x168   : > { %p5889_p9 = pnand %p5887_p4, %p7600_p11  ;;  %p5895_p13 = scmp.lt.u32.totalorder %s5886_s2, %s6470_s7 }
 0x169   : > { %p5894_p10 = por %p5893_p8, %p5892_p0 }
 0x16a   : > { %p5890_p5 = pneg %p5889_p9 }
 0x16b   : > { %p5896_p1 = por %p5895_p13, %p5894_p10 }
 0x16d   : > { %p5897_p6 = pnand %p5896_p1, %p5890_p5 }
 0x16f   : > { %5900 = shalt.err (!%p5897_p6)
}
 0x170   : > { %s5901_s21 = scalar_lea.vmem %s6653_s11, 2048  ;;  %s6072_s24 = smov [#allocation20]  }
 0x171   : > { %p5902_p12 = scmp.ne.s32.totalorder %s6653_s11, %s5901_s21  ;;  %s5906_s12 = sshll.u32 %s6072_s24, 4  ;;  %s5907_s12 = int_to_ptr.vmem [resolvable:$false] %s5906_s12 }
 0x172   : > { %s5908_s29 = scalar_lea.vmem %s5907_s12, 4096  ;;  %p5909_p4 = scmp.lt.s32.totalorder %s6653_s11, %s5907_s12 }
 0x173   : > { %p5904_p2 = pnand %p5902_p12, %p7600_p11  ;;  %p5910_p9 = scmp.lt.s32.totalorder %s5908_s29, %s5901_s21 }
 0x175   : > { %p5905_p7 = pneg %p5904_p2  ;;  %p5911_p0 = por %p5910_p9, %p5909_p4 }
 0x177   : > { %p5912_p8 = pnand %p5911_p0, %p5905_p7 }
 0x179   : > { %5915 = shalt.err (!%p5912_p8)
}
 0x17a   : > { %s7606_s4 = scalar_lea.sflag [#allocation19], %s7603_s13  ;;  %s7607_s6 = sld [smem:[#allocation40_spill]] }
 0x17b   : > { %5456 = dma.hbm_to_vmem [thread:$0]  (!%p7602_p3), %s6470_s7, 2048, %s6653_s11, %s7606_s4, %s7568_s10, %s7568_s10, %s7567_s16  }
 0x180   : > { %p7608_p11 = scmp.ne.s32.totalorder %s7607_s6, 0 }
 0x182   : > { %885 = sbr.rel (%p7608_p11) target bundleno = 5175 (0x1437), region = 104 }
 0x189   : > { %s6713_s8 = sand.u32 1, %s6034_s3   ;;  %p7609_p5 = scmp.ne.s32.totalorder %s7583_s25, 0 }
 0x18a   : > { %s7505_s26 = sshll.u32 %s6713_s8, 3  ;;  %s888_s14 = scalar_lea.sflag [#allocation4], %s6713_s8 }
 0x18b   : > { %s6719_s0 = scalar_lea.vmem [#allocation3], %s7505_s26 }
 0x18c   : > { %5989 = dma.done.wait (%p7609_p5), %s888_s14, 128  }
 0x18d   : > { %5991 = vsyncadd (%p7609_p5), %s888_s14, 4294967168  ;;  %p7610_p3 = scmp.eq.s32.totalorder %s6244_s22, 0 }
 0x18f   : > { %5993 = dma.done.wait (%p7610_p3), [#allocation7], 2064   ;;  %p7611_p10 = pmov %p7610_p3 }
 0x190   : > { %p7612_p13 = pmov %p7610_p3 }
 0x191   : > { %5995 = vsyncadd (%p7611_p10), [#allocation7], 4294965232 }
 0x192   : > { %5997 = dma.done.wait (%p7612_p13), [#allocation10], 32   ;;  %p7613_p1 = pmov %p7610_p3 }
 0x193   : > { %s7614_s16 = sld [smem:[#allocation29_spill]]  ;;  %s7615_s10 = sld [smem:[#allocation39_spill]] }
 0x194   : > { %5999 = vsyncadd (%p7613_p1), [#allocation10], 4294967264  ;;  %s912_s7 = sand.u32 1, %s6244_s22  }
 0x195   : > { %s913_s25 = scalar_lea.sflag [#allocation13], %s912_s7 }
 0x199   : > { %s914_s11 = sand.u32 1, %s7614_s16   ;;  %p7616_p6 = scmp.ne.s32.totalorder %s7615_s10, 0 }
 0x19a   : > { %s3859_s13 = sshll.u32 %s914_s11, 9 }
 0x19b   : > { %s6735_s2 = scalar_lea.vmem [#allocation12], %s3859_s13 }
 0x19c   : > { %6001 = dma.done.wait (%p7616_p6), %s913_s25, 16384  }
 0x19d   : > { %6003 = vsyncadd (%p7616_p6), %s913_s25, 4294950912  ;;  %s6741_s9 = scalar_lea.vmem [#allocation14], %s3859_s13  ;;  %s931_s28 = scalar_lea.sflag [#allocation16], %s912_s7 }
 0x19e   : > { %s6743_s30 = scalar_lea.vmem [#allocation15], %s3859_s13 }
 0x19f   : > { %7617 = sst [smem:[#allocation51_spill]] %s6743_s30 }
 0x1a0   : > { %6005 = dma.done.wait (%p7616_p6), %s931_s28, 16384  }
 0x1a1   : > { %6007 = vsyncadd (%p7616_p6), %s931_s28, 4294950912  ;;  %s3863_s22 = sshll.u32 %s914_s11, 7  ;;  %s6749_s19 = scalar_lea.vmem [#allocation17], %s3859_s13 }
 0x1a2   : > { %7618 = sst [smem:[#allocation52_spill]] %s6749_s19  ;;  %s949_s23 = scalar_lea.sflag [#allocation19], %s912_s7 }
 0x1a3   : > { %s6751_s21 = scalar_lea.vmem [#allocation18], %s3863_s22 }
 0x1a4   : > { %7619 = sst [smem:[#allocation53_spill]] %s6751_s21 }
 0x1a5   : > { %6009 = dma.done.wait (%p7616_p6), %s949_s23, 4096  }
 0x1a6   : > { %6011 = vsyncadd (%p7616_p6), %s949_s23, 4294963200  ;;  %s7620_s24 = sld [smem:[#allocation34_spill]]  ;;  %s7622_s11 = sld [smem:[#allocation63_spill]] }
 0x1a7   : > { %s7623_s23 = sld [smem:[#allocation64_spill]]  ;;  %s7624_s20 = sld [smem:[#allocation65_spill]] }
 0x1a8   : > { %s7626_s5 = sld [smem:[#allocation68_spill]]  ;;  %s7627_s16 = sld [smem:[#allocation69_spill]] }
 0x1a9   : > { %s7628_s18 = sld [smem:[#allocation71_spill]]  ;;  %s7631_s27 = sld [smem:[#allocation75_spill]] }
 0x1aa   : > { %s6805_s1 = scalar_lea.vmem [#allocation20], %s3863_s22  ;;  %s7632_s6 = sshll.u32 %s6713_s8, 3 }
 0x1ac   : > { %p1083_p12 = scmp.lt.s32.totalorder %s7620_s24, 1  ;;  %p3869_p2 = scmp.ne.s32.totalorder %s7620_s24, 0 }
 0x1ad   : > { %v1121_v0 = vld [vmem:[#allocation6] sm:$0xff] (!%p3869_p2)  ;;  %v1122_v1 = vld [vmem:[#allocation6 + $0x8] sm:$0xff] (!%p3869_p2)  ;;  %v1123_v2 = vld [vmem:[#allocation6 + $0x10] sm:$0xff] (!%p3869_p2)  ;;  %v6073_v3 = vmov (!%p3869_p2), 0.0|0.0   ;;  %vm6074_vm0 = vmmov (!%p3869_p2), 0   ;;  %v6075_v6 = vmov (!%p3869_p2), 0.0  }
 0x1ae   : > { %s6759_s12 = scalar_select %p1083_p12, %s7620_s24, 1 }
 0x1af   : > { %4966 = vmatprep.subr.bf16.mxu0 (!%p3869_p2), %v6073_v3  ;;  %v4967_v4 = vpack.c.bf16 (!%p3869_p2), %v1122_v1, %v1121_v0  ;;  %v1124_v5 = vld [vmem:[#allocation6 + $0x18] sm:$0xff] (!%p3869_p2)  ;;  %4433 = vmatprep.mubr.msk.f32.mxu0 (!%p3869_p2), %vm6074_vm0, %v6075_v6  ;;  %v1125_v8 = vld [vmem:[#allocation6 + $0x20] sm:$0xff] (!%p3869_p2)  ;;  %v1126_v9 = vld [vmem:[#allocation6 + $0x28] sm:$0xff] (!%p3869_p2) }
 0x1b0   : > { %s3866_s29 = sshll.u32 %s6759_s12, 2  ;;  %s1100_s4 = scalar_lea.vmem %s7626_s5, %s6759_s12  ;;  %v4970_v7 = vpack.c.bf16 (!%p3869_p2), %v1124_v5, %v1123_v2  ;;  %v4973_v10 = vpack.c.bf16 (!%p3869_p2), %v1126_v9, %v1125_v8  ;;  %v1127_v11 = vld [vmem:[#allocation6 + $0x30] sm:$0xff] (!%p3869_p2)  ;;  %v1128_v12 = vld [vmem:[#allocation6 + $0x38] sm:$0xff] (!%p3869_p2)  ;;  %v1129_v14 = vld [vmem:[#allocation6 + $0x40] sm:$0xff] (!%p3869_p2) }
 0x1b1   : > { %s6769_s13 = scalar_lea.vmem %s7622_s11, %s3866_s29  ;;  %s6774_s26 = scalar_lea.vmem %s7623_s23, %s3866_s29  ;;  %4968 = vmatpush3.bf16.msra.mxu0 (!%p3869_p2), %v4967_v4  ;;  %v4976_v13 = vpack.c.bf16 (!%p3869_p2), %v1128_v12, %v1127_v11  ;;  %v1130_v15 = vld [vmem:[#allocation6 + $0x48] sm:$0xff] (!%p3869_p2)  ;;  %v1131_v17 = vld [vmem:[#allocation6 + $0x50] sm:$0xff] (!%p3869_p2)  ;;  %v1132_v18 = vld [vmem:[#allocation6 + $0x58] sm:$0xff] (!%p3869_p2) }
 0x1b2   : > { %s6779_s3 = scalar_lea.vmem %s7624_s20, %s3866_s29  ;;  %s1103_s10 = scalar_lea.vmem %s7627_s16, %s6759_s12  ;;  %4969 = vmatprep.subr.bf16.mxu0 (!%p3869_p2), %v6073_v3  ;;  %v4979_v16 = vpack.c.bf16 (!%p3869_p2), %v1130_v15, %v1129_v14  ;;  %v4982_v19 = vpack.c.bf16 (!%p3869_p2), %v1132_v18, %v1131_v17  ;;  %v1133_v20 = vld [vmem:[#allocation6 + $0x60] sm:$0xff] (!%p3869_p2)  ;;  %v1134_v21 = vld [vmem:[#allocation6 + $0x68] sm:$0xff] (!%p3869_p2)  ;;  %v1135_v23 = vld [vmem:[#allocation6 + $0x70] sm:$0xff] (!%p3869_p2) }
 0x1b3   : > { %7625 = sst [smem:[#allocation54_spill]] %s6779_s3  ;;  %s1106_s21 = scalar_lea.vmem %s7628_s18, %s6759_s12  ;;  %v4985_v22 = vpack.c.bf16 (!%p3869_p2), %v1134_v21, %v1133_v20  ;;  %v1136_v24 = vld [vmem:[#allocation6 + $0x78] sm:$0xff] (!%p3869_p2)  ;;  %v3870_v27 = vld [vmem:[#allocation8] ss:$0 sm:$0xff] (!%p3869_p2)  ;;  %v3871_v41 = vld [vmem:[#allocation9] ss:$0 sm:$0xff] (!%p3869_p2) }
 0x1b4   : > { %s7629_s23 = sld [smem:[#allocation73_spill]]  ;;  %s7630_s20 = sld [smem:[#allocation74_spill]]  ;;  %v4988_v25 = vpack.c.bf16 (!%p3869_p2), %v1136_v24, %v1135_v23  ;;  %v1120_v26 = vld [vmem:[%s6719_s0] sm:$0xff] (!%p3869_p2)  ;;  %v3872_v43 = vld [vmem:[#allocation11] ss:$0 sm:$0xff] (!%p3869_p2) }
 0x1b5   : > { %s1115_s5 = scalar_lea.vmem %s7631_s27, %s6759_s12  ;;  %s6809_s16 = scalar_lea.vmem [#allocation21], %s7632_s6  ;;  %4971 = vmatpush3.bf16.msra.mxu0 (!%p3869_p2), %v4970_v7 }
 0x1b6   : > { %1119 = sbr.rel (%p3869_p2) target bundleno = 848 (0x350), region = 152  ;;  %4972 = vmatprep.subr.bf16.mxu0 (!%p3869_p2), %v6073_v3 }
 0x1b9   : > { %4974 = vmatpush3.bf16.msra.mxu0 (!%p3869_p2), %v4973_v10 }
 0x1ba   : > { %s1109_s19 = scalar_lea.vmem %s7629_s23, %s6759_s12  ;;  %s1112_s15 = scalar_lea.vmem %s7630_s20, %s6759_s12  ;;  %4975 = vmatprep.subr.bf16.mxu0 (!%p3869_p2), %v6073_v3 }
 0x1bd   : > { %4977 = vmatpush3.bf16.msra.mxu0 %v4976_v13 }
 0x1be   : > { %4978 = vmatprep.subr.bf16.mxu0 %v6073_v3 }
 0x1c1   : > { %4980 = vmatpush3.bf16.msra.mxu0 %v4979_v16 }
 0x1c2   : > { %4981 = vmatprep.subr.bf16.mxu0 %v6073_v3 }
 0x1c5   : > { %4983 = vmatpush3.bf16.msra.mxu0 %v4982_v19 }
 0x1c6   : > { %4984 = vmatprep.subr.bf16.mxu0 %v6073_v3 }
 0x1c9   : > { %4986 = vmatpush3.bf16.msra.mxu0 %v4985_v22 }
 0x1ca   : > { %4987 = vmatprep.subr.bf16.mxu0 %v6073_v3 }
 0x1cd   : > { %4989 = vmatpush3.bf16.msra.mxu0 %v4988_v25 }
 0x1d0   : > { %4434 = vmatmul.mubr.f32.vlgmr.msra.gmra.mrb[0].mxu0 %v1120_v26 }
 0x2a3   : > { %v1210_v28 = vpop.f32.mrb[0].mxu0 }
 0x2a4   : > { %v1211_v29 = vadd.f32 %v3870_v27, %v1210_v28  ;;  %v4435_v30 = vpop.f32.mrb[1].mxu0 }
 0x2a6   : > { %1216 = vadd.xlane.f32.xlu0 %v1211_v29  ;;  %v1218_v31 = vmul.f32 %v1211_v29, %v1211_v29 }
 0x2aa   : > { %1219 = vadd.xlane.f32.xlu0 %v1218_v31 }
 0x333   : > { %v1217_v32 = vpop.xlane.xlu0 %1216 }
 0x334   : > { %v1221_v33 = vmul.f32 0.03125, %v1217_v32 }
 0x336   : > { %v1223_v35 = vmul.f32 %v1221_v33, %v1221_v33  ;;  %v1225_v39 = vsub.f32 %v1211_v29, %v1221_v33 }
 0x337   : > { %v1220_v34 = vpop.xlane.xlu0 %1219 }
 0x338   : > { %v1222_v36 = vmul.f32 0.03125, %v1220_v34 }
 0x33a   : > { %v1224_v37 = vsub.f32 %v1222_v36, %v1223_v35 }
 0x33c   : > { %v1226_v38 = vadd.f32 1e-05, %v1224_v37 }
 0x33e   : > { %5571 = vrsqrt.f32 %v1226_v38 }
 0x348   : > { %v5572_v40 = vpop.eup %5571 }
 0x349   : > { %v1228_v42 = vmul.f32 %v5572_v40, %v1225_v39 }
 0x34b   : > { %v1235_v44 = vmul.f32 %v3871_v41, %v1228_v42 }
 0x34d   : > { %v1242_v45 = vadd.f32 %v3872_v43, %v1235_v44 }
 0x34f   : > { %1243 = vst [vmem:[#allocation2] sm:$0xff] %v1242_v45 }
 0x350 PF: > { %v1338_v46 = vld [vmem:[%s6741_s9] sm:$0xff]  ;;  %v1339_v47 = vld [vmem:[%s6741_s9 + $0x8] sm:$0xff]  ;;  %v6076_v49 = vmov 0.0|0.0   ;;  %v1340_v52 = vld [vmem:[%s6741_s9 + $0x10] sm:$0xff]  ;;  %vm6077_vm1 = vmmov 0   ;;  %v6078_v57 = vmov 0.0  }
 0x351   : > { %v1245_v48 = vld [vmem:[%s6735_s2] sm:$0xff]  ;;  %5014 = vmatprep.subr.bf16.mxu1 %v6076_v49  ;;  %v5015_v50 = vpack.c.bf16 %v1339_v47, %v1338_v46  ;;  %4990 = vmatprep.subr.bf16.mxu0 %v6076_v49  ;;  %v1246_v51 = vld [vmem:[%s6735_s2 + $0x8] sm:$0xff]  ;;  %v1341_v53 = vld [vmem:[%s6741_s9 + $0x18] sm:$0xff]  ;;  %s7633_s3 = sld [smem:[#allocation51_spill]]  ;;  %vm1595_vm2 = vcmask 64512   ;;  %s7634_s18 = sld [smem:[#allocation54_spill]] }
 0x352   : > { %v4991_v54 = vpack.c.bf16 %v1246_v51, %v1245_v48  ;;  %v1247_v55 = vld [vmem:[%s6735_s2 + $0x10] sm:$0xff]  ;;  %v1248_v56 = vld [vmem:[%s6735_s2 + $0x18] sm:$0xff]  ;;  %4503 = vmatprep.mubr.msk.f32.mxu1 %vm6077_vm1, %v6078_v57  ;;  %4468 = vmatprep.mubr.msk.f32.mxu0 %vm6077_vm1, %v6078_v57  ;;  %v5018_v58 = vpack.c.bf16 %v1341_v53, %v1340_v52  ;;  %v1342_v60 = vld [vmem:[%s6741_s9 + $0x20] sm:$0xff]  ;;  %s7636_s0 = sld [smem:[#allocation53_spill]]  ;;  %s7637_s30 = sld [smem:[#allocation67_spill]] }
 0x353   : > { %5016 = vmatpush3.bf16.msra.mxu1 %v5015_v50  ;;  %v4994_v59 = vpack.c.bf16 %v1248_v56, %v1247_v55  ;;  %v1343_v61 = vld [vmem:[%s6741_s9 + $0x28] sm:$0xff]  ;;  %v1249_v62 = vld [vmem:[%s6735_s2 + $0x20] sm:$0xff]  ;;  %v1344_v2 = vld [vmem:[%s6741_s9 + $0x30] sm:$0xff] }
 0x354   : > { %4992 = vmatpush3.bf16.msra.mxu0 %v4991_v54  ;;  %5017 = vmatprep.subr.bf16.mxu1 %v6076_v49  ;;  %v1250_v63 = vld [vmem:[%s6735_s2 + $0x28] sm:$0xff]  ;;  %v5021_v0 = vpack.c.bf16 %v1343_v61, %v1342_v60  ;;  %v1345_v3 = vld [vmem:[%s6741_s9 + $0x38] sm:$0xff]  ;;  %v1251_v4 = vld [vmem:[%s6735_s2 + $0x30] sm:$0xff] }
 0x355   : > { %4993 = vmatprep.subr.bf16.mxu0 %v6076_v49  ;;  %v4997_v1 = vpack.c.bf16 %v1250_v63, %v1249_v62  ;;  %v1252_v5 = vld [vmem:[%s6735_s2 + $0x38] sm:$0xff]  ;;  %v5024_v6 = vpack.c.bf16 %v1345_v3, %v1344_v2  ;;  %v1346_v8 = vld [vmem:[%s6741_s9 + $0x40] sm:$0xff]  ;;  %v1347_v9 = vld [vmem:[%s6741_s9 + $0x48] sm:$0xff] }
 0x356   : > { %v5000_v7 = vpack.c.bf16 %v1252_v5, %v1251_v4  ;;  %v1253_v10 = vld [vmem:[%s6735_s2 + $0x40] sm:$0xff]  ;;  %v1254_v11 = vld [vmem:[%s6735_s2 + $0x48] sm:$0xff]  ;;  %v5027_v12 = vpack.c.bf16 %v1347_v9, %v1346_v8  ;;  %v1348_v14 = vld [vmem:[%s6741_s9 + $0x50] sm:$0xff] }
 0x357   : > { %5019 = vmatpush3.bf16.msra.mxu1 %v5018_v58  ;;  %v5003_v13 = vpack.c.bf16 %v1254_v11, %v1253_v10  ;;  %v1349_v15 = vld [vmem:[%s6741_s9 + $0x58] sm:$0xff]  ;;  %v1255_v16 = vld [vmem:[%s6735_s2 + $0x50] sm:$0xff]  ;;  %v1350_v20 = vld [vmem:[%s6741_s9 + $0x60] sm:$0xff] }
 0x358   : > { %4995 = vmatpush3.bf16.msra.mxu0 %v4994_v59  ;;  %5020 = vmatprep.subr.bf16.mxu1 %v6076_v49  ;;  %v1256_v17 = vld [vmem:[%s6735_s2 + $0x58] sm:$0xff]  ;;  %v5030_v18 = vpack.c.bf16 %v1349_v15, %v1348_v14  ;;  %v1351_v21 = vld [vmem:[%s6741_s9 + $0x68] sm:$0xff]  ;;  %v1257_v22 = vld [vmem:[%s6735_s2 + $0x60] sm:$0xff]  ;;  %s7638_s22 = scalar_lea.vmem %s7637_s30, %s6759_s12 }
 0x359   : > { %4996 = vmatprep.subr.bf16.mxu0 %v6076_v49  ;;  %v5006_v19 = vpack.c.bf16 %v1256_v17, %v1255_v16  ;;  %v1258_v23 = vld [vmem:[%s6735_s2 + $0x68] sm:$0xff]  ;;  %v5033_v24 = vpack.c.bf16 %v1351_v21, %v1350_v20  ;;  %v1352_v26 = vld [vmem:[%s6741_s9 + $0x70] sm:$0xff]  ;;  %v1353_v27 = vld [vmem:[%s6741_s9 + $0x78] sm:$0xff] }
 0x35a   : > { %v5009_v25 = vpack.c.bf16 %v1258_v23, %v1257_v22  ;;  %v1259_v28 = vld [vmem:[%s6735_s2 + $0x70] sm:$0xff]  ;;  %v1260_v29 = vld [vmem:[%s6735_s2 + $0x78] sm:$0xff]  ;;  %v5036_v30 = vpack.c.bf16 %v1353_v27, %v1352_v26  ;;  %v6865_v32 = vld [vmem:[#allocation2] sm:$0xff] }
 0x35b   : > { %5022 = vmatpush3.bf16.msra.mxu1 %v5021_v0  ;;  %v5012_v31 = vpack.c.bf16 %v1260_v29, %v1259_v28  ;;  %v3874_v33 = vld [vmem:[%s6774_s26] ss:$0 sm:$0xff]  ;;  %v1432_v42 = vld [vmem:[%s7633_s3 + $0x8] sm:$0xff]  ;;  %v1433_v43 = vld [vmem:[%s7633_s3 + $0x10] sm:$0xff] }
 0x35c   : > { %4998 = vmatpush3.bf16.msra.mxu0 %v4997_v1  ;;  %5023 = vmatprep.subr.bf16.mxu1 %v6076_v49  ;;  %v3873_v34 = vld [vmem:[%s6769_s13] ss:$0 sm:$0xff]  ;;  %v1434_v45 = vld [vmem:[%s7633_s3 + $0x18] sm:$0xff]  ;;  %v1436_v48 = vld [vmem:[%s7633_s3 + $0x28] sm:$0xff] }
 0x35d   : > { %4999 = vmatprep.subr.bf16.mxu0 %v6076_v49  ;;  %v1431_v41 = vld [vmem:[%s7633_s3] sm:$0xff]  ;;  %v5042_v46 = vpack.c.bf16 %v1434_v45, %v1433_v43  ;;  %v1437_v51 = vld [vmem:[%s7633_s3 + $0x30] sm:$0xff]  ;;  %v1438_v52 = vld [vmem:[%s7633_s3 + $0x38] sm:$0xff] }
 0x35e   : > { %v5039_v44 = vpack.c.bf16 %v1432_v42, %v1431_v41  ;;  %v1435_v47 = vld [vmem:[%s7633_s3 + $0x20] sm:$0xff]  ;;  %v5048_v53 = vpack.c.bf16 %v1438_v52, %v1437_v51  ;;  %v1440_v55 = vld [vmem:[%s7633_s3 + $0x48] sm:$0xff]  ;;  %v1441_v58 = vld [vmem:[%s7633_s3 + $0x50] sm:$0xff] }
 0x35f   : > { %5025 = vmatpush3.bf16.msra.mxu1 %v5024_v6  ;;  %v5045_v50 = vpack.c.bf16 %v1436_v48, %v1435_v47  ;;  %v1439_v54 = vld [vmem:[%s7633_s3 + $0x40] sm:$0xff]  ;;  %v1442_v59 = vld [vmem:[%s7633_s3 + $0x58] sm:$0xff]  ;;  %v1444_v62 = vld [vmem:[%s7633_s3 + $0x68] sm:$0xff] }
 0x360   : > { %5001 = vmatpush3.bf16.msra.mxu0 %v5000_v7  ;;  %5026 = vmatprep.subr.bf16.mxu1 %v6076_v49  ;;  %v5051_v56 = vpack.c.bf16 %v1440_v55, %v1439_v54  ;;  %v5054_v60 = vpack.c.bf16 %v1442_v59, %v1441_v58  ;;  %v1443_v61 = vld [vmem:[%s7633_s3 + $0x60] sm:$0xff]  ;;  %v1445_v0 = vld [vmem:[%s7633_s3 + $0x70] sm:$0xff]  ;;  %v1446_v1 = vld [vmem:[%s7633_s3 + $0x78] sm:$0xff] }
 0x361   : > { %5002 = vmatprep.subr.bf16.mxu0 %v6076_v49  ;;  %v5057_v63 = vpack.c.bf16 %v1444_v62, %v1443_v61  ;;  %v5060_v2 = vpack.c.bf16 %v1446_v1, %v1445_v0  ;;  %v3875_v16 = vld [vmem:[%s7634_s18] ss:$0 sm:$0xff]  ;;  %v3898_v20 = vld [vmem:[%s6741_s9 + $0x98] sm:$0xff]  ;;  %v3900_v23 = vld [vmem:[%s6741_s9 + $0xa8] sm:$0xff] }
 0x362   : > { %v3899_v22 = vld [vmem:[%s6741_s9 + $0xa0] sm:$0xff]  ;;  %v3902_v26 = vld [vmem:[%s6741_s9 + $0xb8] sm:$0xff]  ;;  %v3904_v29 = vld [vmem:[%s6741_s9 + $0xc8] sm:$0xff] }
 0x363   : > { %5028 = vmatpush3.bf16.msra.mxu1 %v5027_v12  ;;  %v3895_v12 = vld [vmem:[%s6741_s9 + $0x80] sm:$0xff]  ;;  %v3878_v43 = vld [vmem:[%s6735_s2 + $0x88] sm:$0xff]  ;;  %v3879_v47 = vld [vmem:[%s6735_s2 + $0x90] sm:$0xff] }
 0x364   : > { %5004 = vmatpush3.bf16.msra.mxu0 %v5003_v13  ;;  %5029 = vmatprep.subr.bf16.mxu1 %v6076_v49  ;;  %v3896_v13 = vld [vmem:[%s6741_s9 + $0x88] sm:$0xff]  ;;  %v3903_v28 = vld [vmem:[%s6741_s9 + $0xc0] sm:$0xff]  ;;  %v3880_v48 = vld [vmem:[%s6735_s2 + $0x98] sm:$0xff] }
 0x365   : > { %5005 = vmatprep.subr.bf16.mxu0 %v6076_v49  ;;  %v5087_v15 = vpack.c.bf16 %v3896_v13, %v3895_v12  ;;  %v3877_v42 = vld [vmem:[%s6735_s2 + $0x80] sm:$0xff]  ;;  %v3882_v52 = vld [vmem:[%s6735_s2 + $0xa8] sm:$0xff]  ;;  %v3883_v54 = vld [vmem:[%s6735_s2 + $0xb0] sm:$0xff] }
 0x366   : > { %v5063_v45 = vpack.c.bf16 %v3878_v43, %v3877_v42  ;;  %v3881_v51 = vld [vmem:[%s6735_s2 + $0xa0] sm:$0xff]  ;;  %v3884_v55 = vld [vmem:[%s6735_s2 + $0xb8] sm:$0xff]  ;;  %v3886_v59 = vld [vmem:[%s6735_s2 + $0xc8] sm:$0xff] }
 0x367   : > { %5031 = vmatpush3.bf16.msra.mxu1 %v5030_v18  ;;  %v3885_v58 = vld [vmem:[%s6735_s2 + $0xc0] sm:$0xff]  ;;  %v3887_v61 = vld [vmem:[%s6735_s2 + $0xd0] sm:$0xff]  ;;  %v3888_v62 = vld [vmem:[%s6735_s2 + $0xd8] sm:$0xff] }
 0x368   : > { %5007 = vmatpush3.bf16.msra.mxu0 %v5006_v19  ;;  %5032 = vmatprep.subr.bf16.mxu1 %v6076_v49  ;;  %v3897_v19 = vld [vmem:[%s6741_s9 + $0x90] sm:$0xff]  ;;  %v3889_v0 = vld [vmem:[%s6735_s2 + $0xe0] sm:$0xff]  ;;  %v3890_v1 = vld [vmem:[%s6735_s2 + $0xe8] sm:$0xff] }
 0x369   : > { %5008 = vmatprep.subr.bf16.mxu0 %v6076_v49  ;;  %v5090_v21 = vpack.c.bf16 %v3898_v20, %v3897_v19  ;;  %v3894_v12 = vld [vmem:[%s6769_s13 + $0x1] ss:$0 sm:$0xff]  ;;  %v3916_v20 = vld [vmem:[%s7633_s3 + $0x98] sm:$0xff] }
 0x36b   : > { %5034 = vmatpush3.bf16.msra.mxu1 %v5033_v24  ;;  %v5093_v24 = vpack.c.bf16 %v3900_v23, %v3899_v22  ;;  %v3917_v22 = vld [vmem:[%s7633_s3 + $0xa0] sm:$0xff]  ;;  %v3918_v23 = vld [vmem:[%s7633_s3 + $0xa8] sm:$0xff] }
 0x36c   : > { %5010 = vmatpush3.bf16.msra.mxu0 %v5009_v25  ;;  %5035 = vmatprep.subr.bf16.mxu1 %v6076_v49  ;;  %v3901_v25 = vld [vmem:[%s6741_s9 + $0xb0] sm:$0xff] }
 0x36d   : > { %5011 = vmatprep.subr.bf16.mxu0 %v6076_v49  ;;  %v5096_v27 = vpack.c.bf16 %v3902_v26, %v3901_v25  ;;  %v3919_v25 = vld [vmem:[%s7633_s3 + $0xb0] sm:$0xff]  ;;  %v3920_v26 = vld [vmem:[%s7633_s3 + $0xb8] sm:$0xff] }
 0x36f   : > { %5037 = vmatpush3.bf16.msra.mxu1 %v5036_v30  ;;  %v5099_v30 = vpack.c.bf16 %v3904_v29, %v3903_v28  ;;  %v3921_v28 = vld [vmem:[%s7633_s3 + $0xc0] sm:$0xff]  ;;  %v3922_v29 = vld [vmem:[%s7633_s3 + $0xc8] sm:$0xff] }
 0x370   : > { %5013 = vmatpush3.bf16.msra.mxu0 %v5012_v31  ;;  %4541 = vmatprep.subr.mxu1 %v6078_v57  ;;  %v3905_v31 = vld [vmem:[%s6741_s9 + $0xd0] sm:$0xff] }
 0x371   : > { %5038 = vmatprep.subr.bf16.mxu0 %v6076_v49 }
 0x372   : > { %4504 = vmatmul.mubr.f32.vlgmr.msra.gmra.mrb[0].mxu1 %v6865_v32 }
 0x373   : > { %4469 = vmatmul.mubr.f32.vlgmr.msra.gmra.mrb[0].mxu0 %v6865_v32  ;;  %4543 = vmatprep.mubr.msk.f32.mxu1 %vm6077_vm1, %v6078_v57 }
 0x374   : > { %4538 = vmatprep.mubr.msk.f32.mxu0 %vm6077_vm1, %v6078_v57  ;;  %5040 = vmatpush3.bf16.msra.mxu0 %v5039_v44 }
 0x375   : > { %5041 = vmatprep.subr.bf16.mxu0 %v6076_v49 }
 0x378   : > { %5043 = vmatpush3.bf16.msra.mxu0 %v5042_v46 }
 0x379   : > { %5044 = vmatprep.subr.bf16.mxu0 %v6076_v49 }
 0x37c   : > { %5046 = vmatpush3.bf16.msra.mxu0 %v5045_v50  ;;  %v5066_v50 = vpack.c.bf16 %v3880_v48, %v3879_v47 }
 0x37d   : > { %5047 = vmatprep.subr.bf16.mxu0 %v6076_v49 }
 0x380   : > { %5049 = vmatpush3.bf16.msra.mxu0 %v5048_v53  ;;  %v5069_v53 = vpack.c.bf16 %v3882_v52, %v3881_v51  ;;  %v3950_v51 = vld [vmem:[%s6741_s9 + $0x100] sm:$0xff]  ;;  %v3951_v52 = vld [vmem:[%s6741_s9 + $0x108] sm:$0xff] }
 0x381   : > { %5050 = vmatprep.subr.bf16.mxu0 %v6076_v49 }
 0x384   : > { %5052 = vmatpush3.bf16.msra.mxu0 %v5051_v56  ;;  %v5072_v56 = vpack.c.bf16 %v3884_v55, %v3883_v54  ;;  %v5159_v54 = vpack.c.bf16 %v3951_v52, %v3950_v51  ;;  %v3930_v55 = vld [vmem:[%s7634_s18 + $0x1] ss:$0 sm:$0xff]  ;;  %v3949_v52 = vld [vmem:[%s6769_s13 + $0x2] ss:$0 sm:$0xff] }
 0x385   : > { %5053 = vmatprep.subr.bf16.mxu0 %v6076_v49 }
 0x388   : > { %5055 = vmatpush3.bf16.msra.mxu0 %v5054_v60  ;;  %v5075_v60 = vpack.c.bf16 %v3886_v59, %v3885_v58  ;;  %v3952_v59 = vld [vmem:[%s6741_s9 + $0x110] sm:$0xff] }
 0x389   : > { %5056 = vmatprep.subr.bf16.mxu0 %v6076_v49 }
 0x38c   : > { %5058 = vmatpush3.bf16.msra.mxu0 %v5057_v63  ;;  %v5078_v63 = vpack.c.bf16 %v3888_v62, %v3887_v61  ;;  %v3954_v62 = vld [vmem:[%s6741_s9 + $0x120] sm:$0xff] }
 0x38d   : > { %5059 = vmatprep.subr.bf16.mxu0 %v6076_v49 }
 0x390   : > { %5061 = vmatpush3.bf16.msra.mxu0 %v5060_v2  ;;  %v5081_v2 = vpack.c.bf16 %v3890_v1, %v3889_v0  ;;  %v3956_v1 = vld [vmem:[%s6741_s9 + $0x130] sm:$0xff] }
 0x391   : > { %5086 = vmatprep.subr.bf16.mxu0 %v6076_v49 }
 0x393   : > { %4539 = vmatmul.mubr.f32.vlgmr.msra.gmra.mrb[2].mxu0 %v6865_v32 }
 0x394   : > { %4618 = vmatprep.mubr.msk.f32.mxu0 %vm6077_vm1, %v6078_v57  ;;  %5088 = vmatpush3.bf16.msra.mxu0 %v5087_v15 }
 0x395   : > { %5089 = vmatprep.subr.bf16.mxu0 %v6076_v49 }
 0x398   : > { %5091 = vmatpush3.bf16.msra.mxu0 %v5090_v21 }
 0x399   : > { %5092 = vmatprep.subr.bf16.mxu0 %v6076_v49 }
 0x39c   : > { %5094 = vmatpush3.bf16.msra.mxu0 %v5093_v24  ;;  %v5117_v24 = vpack.c.bf16 %v3918_v23, %v3917_v22  ;;  %v3934_v23 = vld [vmem:[%s6735_s2 + $0x110] sm:$0xff] }
 0x39d   : > { %5095 = vmatprep.subr.bf16.mxu0 %v6076_v49 }
 0x3a0   : > { %5097 = vmatpush3.bf16.msra.mxu0 %v5096_v27  ;;  %v5120_v27 = vpack.c.bf16 %v3920_v26, %v3919_v25  ;;  %v3936_v26 = vld [vmem:[%s6735_s2 + $0x120] sm:$0xff] }
 0x3a1   : > { %5098 = vmatprep.subr.bf16.mxu0 %v6076_v49 }
 0x3a4   : > { %5100 = vmatpush3.bf16.msra.mxu0 %v5099_v30  ;;  %v5123_v30 = vpack.c.bf16 %v3922_v29, %v3921_v28  ;;  %v3938_v29 = vld [vmem:[%s6735_s2 + $0x130] sm:$0xff] }
 0x3a5   : > { %5101 = vmatprep.subr.bf16.mxu0 %v6076_v49 }
 0x445   : > { %v1427_v35 = vpop.f32.mrb[0].mxu1 }
 0x446   : > { %v1428_v36 = vadd.f32 %v3874_v33, %v1427_v35  ;;  %v4505_v37 = vpop.f32.mrb[1].mxu1  ;;  %v1334_v38 = vpop.f32.mrb[0].mxu0  ;;  %v3906_v33 = vld [vmem:[%s6741_s9 + $0xd8] sm:$0xff]  ;;  %v3907_v35 = vld [vmem:[%s6741_s9 + $0xe0] sm:$0xff] }
 0x447   : > { %v1335_v39 = vadd.f32 %v3873_v34, %v1334_v38  ;;  %v4470_v40 = vpop.f32.mrb[1].mxu0  ;;  %v5102_v34 = vpack.c.bf16 %v3906_v33, %v3905_v31  ;;  %v3909_v38 = vld [vmem:[%s6741_s9 + $0xf0] sm:$0xff]  ;;  %v3924_v33 = vld [vmem:[%s7633_s3 + $0xd8] sm:$0xff] }
 0x448   : > { %4542 = vmatpush3.xpose.msra.mxu1 %v1428_v36  ;;  %v3908_v36 = vld [vmem:[%s6741_s9 + $0xe8] sm:$0xff]  ;;  %v3923_v31 = vld [vmem:[%s7633_s3 + $0xd0] sm:$0xff] }
 0x449   : > { %4546 = vmatprep.subr.mxu1 %v6078_v57  ;;  %5103 = vmatpush3.bf16.msra.mxu0 %v5102_v34  ;;  %v5105_v37 = vpack.c.bf16 %v3908_v36, %v3907_v35  ;;  %v5126_v34 = vpack.c.bf16 %v3924_v33, %v3923_v31  ;;  %v3925_v35 = vld [vmem:[%s7633_s3 + $0xe0] sm:$0xff]  ;;  %v3926_v36 = vld [vmem:[%s7633_s3 + $0xe8] sm:$0xff] }
 0x44a   : > { %5104 = vmatprep.subr.bf16.mxu0 %v6076_v49  ;;  %v3940_v33 = vld [vmem:[%s6735_s2 + $0x140] sm:$0xff] }
 0x44b   : > { %4544 = vmatmul.mubr.f32.vlgmr.msra.gmra.mrb[2].mxu1 %v1335_v39  ;;  %v3910_v39 = vld [vmem:[%s6741_s9 + $0xf8] sm:$0xff] }
 0x44c   : > { %4548 = vmatprep.mubr.msk.f32.mxu1 %vm6077_vm1, %v6078_v57  ;;  %v5108_v40 = vpack.c.bf16 %v3910_v39, %v3909_v38  ;;  %v3927_v38 = vld [vmem:[%s7633_s3 + $0xf0] sm:$0xff]  ;;  %v3928_v39 = vld [vmem:[%s7633_s3 + $0xf8] sm:$0xff] }
 0x44d   : > { %5106 = vmatpush3.bf16.msra.mxu0 %v5105_v37  ;;  %v5129_v37 = vpack.c.bf16 %v3926_v36, %v3925_v35  ;;  %v3942_v36 = vld [vmem:[%s6735_s2 + $0x150] sm:$0xff] }
 0x44e   : > { %5107 = vmatprep.subr.bf16.mxu0 %v6076_v49 }
 0x451   : > { %5109 = vmatpush3.bf16.msra.mxu0 %v5108_v40  ;;  %v5132_v40 = vpack.c.bf16 %v3928_v39, %v3927_v38  ;;  %v3944_v39 = vld [vmem:[%s6735_s2 + $0x160] sm:$0xff] }
 0x452   : > { %4656 = vmatprep.subr.mxu0 %v6078_v57 }
 0x454   : > { %4619 = vmatmul.mubr.f32.vlgmr.msra.gmra.mrb[4].mxu0 %v6865_v32 }
 0x455   : > { %4658 = vmatprep.mubr.msk.f32.mxu0 %vm6077_vm1, %v6078_v57 }
 0x466   : > { %v1520_v14 = vpop.f32.mrb[2].mxu0 }
 0x467   : > { %v4540_v17 = vpop.f32.mrb[3].mxu0  ;;  %v1521_v18 = vadd.f32 %v3875_v16, %v1520_v14  ;;  %v3913_v16 = vld [vmem:[%s7633_s3 + $0x80] sm:$0xff] }
 0x468   : > { %v3914_v17 = vld [vmem:[%s7633_s3 + $0x88] sm:$0xff] }
 0x469   : > { %4547 = vmatpush3.msra.mxu1 %v1521_v18  ;;  %v3915_v18 = vld [vmem:[%s7633_s3 + $0x90] sm:$0xff]  ;;  %v5111_v19 = vpack.c.bf16 %v3914_v17, %v3913_v16 }
 0x46a   : > { %5062 = vmatprep.subr.bf16.mxu1 %v6076_v49  ;;  %v5114_v21 = vpack.c.bf16 %v3916_v20, %v3915_v18  ;;  %v3932_v18 = vld [vmem:[%s6735_s2 + $0x100] sm:$0xff] }
 0x51e   : > { %v1590_v3 = vpop.f32.mrb[2].mxu1 }
 0x51f   : > { %v1594_v4 = vmul.f32 0.35355338, %v1590_v3  ;;  %v4545_v5 = vpop.f32.mrb[3].mxu1  ;;  %v3891_v3 = vld [vmem:[%s6735_s2 + $0xf0] sm:$0xff] }
 0x521   : > { %v1596_v6 = vsel %vm1595_vm2, %v1594_v4, -inf }
 0x522   : > { %1597 = vmax.xlane.f32.xlu0 %v1596_v6  ;;  %v3912_v6 = vld [vmem:[%s6774_s26 + $0x1] ss:$0 sm:$0xff] }
 0x5af   : > { %v1598_v7 = vpop.xlane.xlu0 %1597 }
 0x5b0   : > { %v1599_v8 = vsub.f32 %v1594_v4, %v1598_v7  ;;  %v3892_v4 = vld [vmem:[%s6735_s2 + $0xf8] sm:$0xff]  ;;  %v1866_v7 = vpop.f32.mrb[4].mxu0 }
 0x5b1   : > { %v5084_v5 = vpack.c.bf16 %v3892_v4, %v3891_v3  ;;  %v3958_v4 = vld [vmem:[%s6741_s9 + $0x140] sm:$0xff] }
 0x5b2   : > { %v1600_v9 = vmul.f32 1.442695, %v1599_v8  ;;  %v1867_v8 = vadd.f32 %v3912_v6, %v1866_v7  ;;  %v3960_v7 = vld [vmem:[%s6741_s9 + $0x150] sm:$0xff] }
 0x5b4   : > { %5573 = vpow2.f32 %v1600_v9  ;;  %v4620_v9 = vpop.f32.mrb[5].mxu0  ;;  %4657 = vmatpush3.xpose.msra.mxu0 %v1867_v8  ;;  %v3961_v8 = vld [vmem:[%s6741_s9 + $0x158] sm:$0xff] }
 0x5b5   : > { %4661 = vmatprep.subr.mxu0 %v6078_v57  ;;  %v5174_v9 = vpack.c.bf16 %v3961_v8, %v3960_v7  ;;  %v3978_v8 = vld [vmem:[%s7633_s3 + $0x150] sm:$0xff] }
 0x5be   : > { %v5574_v10 = vpop.eup %5573 }
 0x5bf   : > { %v1602_v11 = vsel %vm1595_vm2, %v5574_v10, 0.0 }
 0x5c0   : > { %1603 = vadd.xlane.f32.xlu0 %v1602_v11 }
 0x64d   : > { %v1604_v41 = vpop.xlane.xlu0 %1603 }
 0x64e   : > { %5575 = vrcp.f32 %v1604_v41 }
 0x658   : > { %v5576_v44 = vpop.eup %5575 }
 0x659   : > { %v1606_v46 = vmul.f32 %v5576_v44, %v5574_v10 }
 0x65b   : > { %4549 = vmatmul.mubr.msk.f32.vlgmr.msra.gmra.mrb[4].mxu1 %vm1595_vm2, %v1606_v46 }
 0x65c   : > { %5064 = vmatpush3.bf16.msra.mxu1 %v5063_v45  ;;  %4583 = vmatprep.mubr.msk.f32.mxu1 %vm6077_vm1, %v6078_v57 }
 0x65d   : > { %5065 = vmatprep.subr.bf16.mxu1 %v6076_v49 }
 0x660   : > { %5067 = vmatpush3.bf16.msra.mxu1 %v5066_v50 }
 0x661   : > { %5068 = vmatprep.subr.bf16.mxu1 %v6076_v49 }
 0x664   : > { %5070 = vmatpush3.bf16.msra.mxu1 %v5069_v53 }
 0x665   : > { %5071 = vmatprep.subr.bf16.mxu1 %v6076_v49 }
 0x668   : > { %5073 = vmatpush3.bf16.msra.mxu1 %v5072_v56 }
 0x669   : > { %5074 = vmatprep.subr.bf16.mxu1 %v6076_v49 }
 0x66c   : > { %5076 = vmatpush3.bf16.msra.mxu1 %v5075_v60  ;;  %v3953_v60 = vld [vmem:[%s6741_s9 + $0x118] sm:$0xff] }
 0x66d   : > { %5077 = vmatprep.subr.bf16.mxu1 %v6076_v49  ;;  %v5162_v61 = vpack.c.bf16 %v3953_v60, %v3952_v59  ;;  %v3970_v59 = vld [vmem:[%s7633_s3 + $0x110] sm:$0xff] }
 0x670   : > { %5079 = vmatpush3.bf16.msra.mxu1 %v5078_v63  ;;  %v3955_v63 = vld [vmem:[%s6741_s9 + $0x128] sm:$0xff] }
 0x671   : > { %5080 = vmatprep.subr.bf16.mxu1 %v6076_v49  ;;  %v5165_v0 = vpack.c.bf16 %v3955_v63, %v3954_v62  ;;  %v3972_v63 = vld [vmem:[%s7633_s3 + $0x120] sm:$0xff] }
 0x674   : > { %5082 = vmatpush3.bf16.msra.mxu1 %v5081_v2  ;;  %v3957_v2 = vld [vmem:[%s6741_s9 + $0x138] sm:$0xff] }
 0x675   : > { %5083 = vmatprep.subr.bf16.mxu1 %v6076_v49  ;;  %v5168_v3 = vpack.c.bf16 %v3957_v2, %v3956_v1  ;;  %v3974_v2 = vld [vmem:[%s7633_s3 + $0x130] sm:$0xff] }
 0x678   : > { %5085 = vmatpush3.bf16.msra.mxu1 %v5084_v5  ;;  %v3959_v5 = vld [vmem:[%s6741_s9 + $0x148] sm:$0xff] }
 0x679   : > { %5110 = vmatprep.subr.bf16.mxu1 %v6076_v49  ;;  %v5171_v6 = vpack.c.bf16 %v3959_v5, %v3958_v4  ;;  %v3976_v5 = vld [vmem:[%s7633_s3 + $0x140] sm:$0xff] }
 0x67b   : > { %4584 = vmatmul.mubr.f32.vlgmr.msra.gmra.mrb[6].mxu1 %v6865_v32 }
 0x67c   : > { %4653 = vmatprep.mubr.msk.f32.mxu1 %vm6077_vm1, %v6078_v57  ;;  %5112 = vmatpush3.bf16.msra.mxu1 %v5111_v19  ;;  %v3933_v19 = vld [vmem:[%s6735_s2 + $0x108] sm:$0xff] }
 0x67d   : > { %5113 = vmatprep.subr.bf16.mxu1 %v6076_v49 }
 0x680   : > { %5115 = vmatpush3.bf16.msra.mxu1 %v5114_v21  ;;  %v5135_v21 = vpack.c.bf16 %v3933_v19, %v3932_v18 }
 0x681   : > { %5116 = vmatprep.subr.bf16.mxu1 %v6076_v49 }
 0x684   : > { %5118 = vmatpush3.bf16.msra.mxu1 %v5117_v24  ;;  %v3935_v24 = vld [vmem:[%s6735_s2 + $0x118] sm:$0xff] }
 0x685   : > { %5119 = vmatprep.subr.bf16.mxu1 %v6076_v49  ;;  %v5138_v25 = vpack.c.bf16 %v3935_v24, %v3934_v23 }
 0x688   : > { %5121 = vmatpush3.bf16.msra.mxu1 %v5120_v27  ;;  %v3937_v27 = vld [vmem:[%s6735_s2 + $0x128] sm:$0xff] }
 0x689   : > { %5122 = vmatprep.subr.bf16.mxu1 %v6076_v49  ;;  %v5141_v28 = vpack.c.bf16 %v3937_v27, %v3936_v26  ;;  %v4005_v27 = vld [vmem:[%s6741_s9 + $0x180] sm:$0xff] }
 0x68c   : > { %5124 = vmatpush3.bf16.msra.mxu1 %v5123_v30  ;;  %v3939_v30 = vld [vmem:[%s6735_s2 + $0x138] sm:$0xff] }
 0x68d   : > { %5125 = vmatprep.subr.bf16.mxu1 %v6076_v49  ;;  %v5144_v31 = vpack.c.bf16 %v3939_v30, %v3938_v29 }
 0x690   : > { %5127 = vmatpush3.bf16.msra.mxu1 %v5126_v34  ;;  %v3941_v34 = vld [vmem:[%s6735_s2 + $0x148] sm:$0xff] }
 0x691   : > { %5128 = vmatprep.subr.bf16.mxu1 %v6076_v49  ;;  %v5147_v35 = vpack.c.bf16 %v3941_v34, %v3940_v33 }
 0x694   : > { %5130 = vmatpush3.bf16.msra.mxu1 %v5129_v37  ;;  %v3943_v37 = vld [vmem:[%s6735_s2 + $0x158] sm:$0xff] }
 0x695   : > { %5131 = vmatprep.subr.bf16.mxu1 %v6076_v49  ;;  %v5150_v38 = vpack.c.bf16 %v3943_v37, %v3942_v36  ;;  %v4008_v36 = vld [vmem:[%s6741_s9 + $0x198] sm:$0xff] }
 0x698   : > { %5133 = vmatpush3.bf16.msra.mxu1 %v5132_v40  ;;  %v3945_v40 = vld [vmem:[%s6735_s2 + $0x168] sm:$0xff] }
 0x699   : > { %5158 = vmatprep.subr.bf16.mxu1 %v6076_v49 }
 0x69b   : > { %4654 = vmatmul.mubr.f32.vlgmr.msra.gmra.mrb[8].mxu1 %v6865_v32 }
 0x69c   : > { %4733 = vmatprep.mubr.msk.f32.mxu1 %vm6077_vm1, %v6078_v57  ;;  %5160 = vmatpush3.bf16.msra.mxu1 %v5159_v54 }
 0x69d   : > { %5161 = vmatprep.subr.bf16.mxu1 %v6076_v49 }
 0x6a0   : > { %5163 = vmatpush3.bf16.msra.mxu1 %v5162_v61  ;;  %v3971_v61 = vld [vmem:[%s7633_s3 + $0x118] sm:$0xff] }
 0x6a1   : > { %5164 = vmatprep.subr.bf16.mxu1 %v6076_v49  ;;  %v5186_v62 = vpack.c.bf16 %v3971_v61, %v3970_v59  ;;  %v3988_v61 = vld [vmem:[%s6735_s2 + $0x188] sm:$0xff] }
 0x6a4   : > { %5166 = vmatpush3.bf16.msra.mxu1 %v5165_v0  ;;  %v3973_v0 = vld [vmem:[%s7633_s3 + $0x128] sm:$0xff] }
 0x6a5   : > { %5167 = vmatprep.subr.bf16.mxu1 %v6076_v49  ;;  %v5189_v1 = vpack.c.bf16 %v3973_v0, %v3972_v63 }
 0x6a8   : > { %5169 = vmatpush3.bf16.msra.mxu1 %v5168_v3  ;;  %v3975_v3 = vld [vmem:[%s7633_s3 + $0x138] sm:$0xff] }
 0x6a9   : > { %5170 = vmatprep.subr.bf16.mxu1 %v6076_v49  ;;  %v5192_v4 = vpack.c.bf16 %v3975_v3, %v3974_v2  ;;  %v3990_v2 = vld [vmem:[%s6735_s2 + $0x198] sm:$0xff] }
 0x6ac   : > { %5172 = vmatpush3.bf16.msra.mxu1 %v5171_v6  ;;  %v3977_v6 = vld [vmem:[%s7633_s3 + $0x148] sm:$0xff] }
 0x6ad   : > { %5173 = vmatprep.subr.bf16.mxu1 %v6076_v49  ;;  %v5195_v7 = vpack.c.bf16 %v3977_v6, %v3976_v5  ;;  %v3992_v5 = vld [vmem:[%s6735_s2 + $0x1a8] sm:$0xff] }
 0x6b0   : > { %5175 = vmatpush3.bf16.msra.mxu1 %v5174_v9  ;;  %v3979_v9 = vld [vmem:[%s7633_s3 + $0x158] sm:$0xff] }
 0x6b1   : > { %5176 = vmatprep.subr.bf16.mxu1 %v6076_v49 }
 0x72e   : > { %v6970_v10 = vpop.f32.mrb[4].mxu1 }
 0x72f   : > { %v4550_v11 = vpop.f32.mrb[5].mxu1 }
 0x730   : > { %v3962_v11 = vld [vmem:[%s6741_s9 + $0x160] sm:$0xff] }
 0x74e   : > { %v1771_v13 = vpop.f32.mrb[6].mxu1 }
 0x74f   : > { %v1772_v14 = vadd.f32 %v3894_v12, %v1771_v13  ;;  %v4585_v15 = vpop.f32.mrb[7].mxu1  ;;  %v3963_v12 = vld [vmem:[%s6741_s9 + $0x168] sm:$0xff] }
 0x750   : > { %v5177_v13 = vpack.c.bf16 %v3963_v12, %v3962_v11  ;;  %v3965_v15 = vld [vmem:[%s6741_s9 + $0x178] sm:$0xff]  ;;  %v5198_v11 = vpack.c.bf16 %v3979_v9, %v3978_v8  ;;  %v3980_v12 = vld [vmem:[%s7633_s3 + $0x160] sm:$0xff] }
 0x751   : > { %4659 = vmatmul.mubr.f32.vlgmr.msra.gmra.mrb[6].mxu0 %v1772_v14  ;;  %v3964_v14 = vld [vmem:[%s6741_s9 + $0x170] sm:$0xff]  ;;  %v3994_v8 = vld [vmem:[%s6735_s2 + $0x1b8] sm:$0xff] }
 0x752   : > { %4663 = vmatprep.mubr.msk.f32.mxu0 %vm6077_vm1, %v6078_v57  ;;  %5178 = vmatpush3.bf16.msra.mxu1 %v5177_v13  ;;  %v5180_v16 = vpack.c.bf16 %v3965_v15, %v3964_v14  ;;  %v3981_v13 = vld [vmem:[%s7633_s3 + $0x168] sm:$0xff]  ;;  %v3982_v15 = vld [vmem:[%s7633_s3 + $0x170] sm:$0xff] }
 0x753   : > { %5179 = vmatprep.subr.bf16.mxu1 %v6076_v49  ;;  %v5201_v14 = vpack.c.bf16 %v3981_v13, %v3980_v12  ;;  %v3996_v12 = vld [vmem:[%s6735_s2 + $0x1c8] sm:$0xff] }
 0x756   : > { %5181 = vmatpush3.bf16.msra.mxu1 %v5180_v16  ;;  %v3983_v16 = vld [vmem:[%s7633_s3 + $0x178] sm:$0xff] }
 0x757   : > { %4771 = vmatprep.subr.mxu1 %v6078_v57 }
 0x759   : > { %4734 = vmatmul.mubr.f32.vlgmr.msra.gmra.mrb[10].mxu1 %v6865_v32 }
 0x75a   : > { %4773 = vmatprep.mubr.msk.f32.mxu1 %vm6077_vm1, %v6078_v57 }
 0x76e   : > { %v1961_v53 = vpop.f32.mrb[8].mxu1 }
 0x76f   : > { %v4655_v56 = vpop.f32.mrb[9].mxu1  ;;  %v1962_v58 = vadd.f32 %v3930_v55, %v1961_v53 }
 0x770   : > { %v3968_v56 = vld [vmem:[%s7633_s3 + $0x100] sm:$0xff] }
 0x771   : > { %4662 = vmatpush3.msra.mxu0 %v1962_v58  ;;  %v3969_v58 = vld [vmem:[%s7633_s3 + $0x108] sm:$0xff] }
 0x772   : > { %5134 = vmatprep.subr.bf16.mxu0 %v6076_v49  ;;  %v5183_v60 = vpack.c.bf16 %v3969_v58, %v3968_v56  ;;  %v4020_v56 = vld [vmem:[%s6741_s9 + $0x1f8] sm:$0xff] }
 0x824   : > { %v2031_v41 = vpop.f32.mrb[6].mxu0 }
 0x825   : > { %v2035_v42 = vmul.f32 0.35355338, %v2031_v41  ;;  %v4660_v43 = vpop.f32.mrb[7].mxu0  ;;  %v5153_v41 = vpack.c.bf16 %v3945_v40, %v3944_v39  ;;  %v4010_v39 = vld [vmem:[%s6741_s9 + $0x1a8] sm:$0xff] }
 0x826   : > { %v3947_v43 = vld [vmem:[%s6735_s2 + $0x178] sm:$0xff] }
 0x827   : > { %v2036_v44 = vsel %vm1595_vm2, %v2035_v42, -inf }
 0x828   : > { %2037 = vmax.xlane.f32.xlu1 %v2036_v44 }
 0x8b5   : > { %v2038_v45 = vpop.xlane.xlu1 %2037 }
 0x8b6   : > { %v2039_v46 = vsub.f32 %v2035_v42, %v2038_v45  ;;  %v3946_v42 = vld [vmem:[%s6735_s2 + $0x170] sm:$0xff]  ;;  %v3967_v45 = vld [vmem:[%s6774_s26 + $0x2] ss:$0 sm:$0xff] }
 0x8b7   : > { %v5156_v44 = vpack.c.bf16 %v3947_v43, %v3946_v42  ;;  %v4012_v42 = vld [vmem:[%s6741_s9 + $0x1b8] sm:$0xff] }
 0x8b8   : > { %v2040_v47 = vmul.f32 1.442695, %v2039_v46  ;;  %v2306_v46 = vpop.f32.mrb[10].mxu1 }
 0x8ba   : > { %5577 = vpow2.f32 %v2040_v47  ;;  %v2307_v47 = vadd.f32 %v3967_v45, %v2306_v46  ;;  %v4014_v45 = vld [vmem:[%s6741_s9 + $0x1c8] sm:$0xff] }
 0x8bc   : > { %4772 = vmatpush3.xpose.msra.mxu1 %v2307_v47  ;;  %v4015_v47 = vld [vmem:[%s6741_s9 + $0x1d0] sm:$0xff] }
 0x8bd   : > { %4776 = vmatprep.subr.mxu1 %v6078_v57 }
 0x8c4   : > { %v5578_v48 = vpop.eup %5577 }
 0x8c5   : > { %v2042_v50 = vsel %vm1595_vm2, %v5578_v48, 0.0 }
 0x8c6   : > { %2043 = vadd.xlane.f32.xlu1 %v2042_v50 }
 0x953   : > { %v2044_v17 = vpop.xlane.xlu1 %2043 }
 0x954   : > { %5579 = vrcp.f32 %v2044_v17  ;;  %v5204_v17 = vpack.c.bf16 %v3983_v16, %v3982_v15  ;;  %v3998_v15 = vld [vmem:[%s6735_s2 + $0x1d8] sm:$0xff] }
 0x95e   : > { %v5580_v20 = vpop.eup %5579 }
 0x95f   : > { %v2046_v22 = vmul.f32 %v5580_v20, %v5578_v48  ;;  %v4735_v48 = vpop.f32.mrb[11].mxu1 }
 0x960   : > { %v4016_v48 = vld [vmem:[%s6741_s9 + $0x1d8] sm:$0xff] }
 0x961   : > { %4664 = vmatmul.mubr.msk.f32.vlgmr.msra.gmra.mrb[8].mxu0 %vm1595_vm2, %v2046_v22 }
 0x962   : > { %5136 = vmatpush3.bf16.msra.mxu0 %v5135_v21  ;;  %4698 = vmatprep.mubr.msk.f32.mxu0 %vm6077_vm1, %v6078_v57 }
 0x963   : > { %5137 = vmatprep.subr.bf16.mxu0 %v6076_v49 }
 0x966   : > { %5139 = vmatpush3.bf16.msra.mxu0 %v5138_v25 }
 0x967   : > { %5140 = vmatprep.subr.bf16.mxu0 %v6076_v49 }
 0x96a   : > { %5142 = vmatpush3.bf16.msra.mxu0 %v5141_v28  ;;  %v4006_v28 = vld [vmem:[%s6741_s9 + $0x188] sm:$0xff] }
 0x96b   : > { %5143 = vmatprep.subr.bf16.mxu0 %v6076_v49  ;;  %v5231_v30 = vpack.c.bf16 %v4006_v28, %v4005_v27 }
 0x96e   : > { %5145 = vmatpush3.bf16.msra.mxu0 %v5144_v31  ;;  %v3985_v31 = vld [vmem:[%s7634_s18 + $0x2] ss:$0 sm:$0xff] }
 0x96f   : > { %5146 = vmatprep.subr.bf16.mxu0 %v6076_v49 }
 0x972   : > { %5148 = vmatpush3.bf16.msra.mxu0 %v5147_v35  ;;  %v4007_v35 = vld [vmem:[%s6741_s9 + $0x190] sm:$0xff] }
 0x973   : > { %5149 = vmatprep.subr.bf16.mxu0 %v6076_v49  ;;  %v5234_v37 = vpack.c.bf16 %v4008_v36, %v4007_v35  ;;  %v4025_v35 = vld [vmem:[%s7633_s3 + $0x190] sm:$0xff] }
 0x976   : > { %5151 = vmatpush3.bf16.msra.mxu0 %v5150_v38  ;;  %v4009_v38 = vld [vmem:[%s6741_s9 + $0x1a0] sm:$0xff] }
 0x977   : > { %5152 = vmatprep.subr.bf16.mxu0 %v6076_v49  ;;  %v5237_v40 = vpack.c.bf16 %v4010_v39, %v4009_v38  ;;  %v4027_v39 = vld [vmem:[%s7633_s3 + $0x1a0] sm:$0xff] }
 0x97a   : > { %5154 = vmatpush3.bf16.msra.mxu0 %v5153_v41  ;;  %v4011_v41 = vld [vmem:[%s6741_s9 + $0x1b0] sm:$0xff] }
 0x97b   : > { %5155 = vmatprep.subr.bf16.mxu0 %v6076_v49  ;;  %v5240_v43 = vpack.c.bf16 %v4012_v42, %v4011_v41  ;;  %v4029_v42 = vld [vmem:[%s7633_s3 + $0x1b0] sm:$0xff] }
 0x97e   : > { %5157 = vmatpush3.bf16.msra.mxu0 %v5156_v44  ;;  %v4013_v44 = vld [vmem:[%s6741_s9 + $0x1c0] sm:$0xff] }
 0x97f   : > { %5182 = vmatprep.subr.bf16.mxu0 %v6076_v49  ;;  %v5243_v46 = vpack.c.bf16 %v4014_v45, %v4013_v44  ;;  %v4031_v45 = vld [vmem:[%s7633_s3 + $0x1c0] sm:$0xff] }
 0x981   : > { %4699 = vmatmul.mubr.f32.vlgmr.msra.gmra.mrb[10].mxu0 %v6865_v32 }
 0x982   : > { %4768 = vmatprep.mubr.msk.f32.mxu0 %vm6077_vm1, %v6078_v57  ;;  %5184 = vmatpush3.bf16.msra.mxu0 %v5183_v60  ;;  %v3987_v60 = vld [vmem:[%s6735_s2 + $0x180] sm:$0xff] }
 0x983   : > { %5185 = vmatprep.subr.bf16.mxu0 %v6076_v49  ;;  %v5207_v63 = vpack.c.bf16 %v3988_v61, %v3987_v60  ;;  %v7188_v60 = vld [vmem:[#allocation2] sm:$0xff] }
 0x986   : > { %5187 = vmatpush3.bf16.msra.mxu0 %v5186_v62 }
 0x987   : > { %5188 = vmatprep.subr.bf16.mxu0 %v6076_v49 }
 0x98a   : > { %5190 = vmatpush3.bf16.msra.mxu0 %v5189_v1  ;;  %v3989_v1 = vld [vmem:[%s6735_s2 + $0x190] sm:$0xff] }
 0x98b   : > { %5191 = vmatprep.subr.bf16.mxu0 %v6076_v49  ;;  %v5210_v3 = vpack.c.bf16 %v3990_v2, %v3989_v1 }
 0x98e   : > { %5193 = vmatpush3.bf16.msra.mxu0 %v5192_v4  ;;  %v3991_v4 = vld [vmem:[%s6735_s2 + $0x1a0] sm:$0xff] }
 0x98f   : > { %5194 = vmatprep.subr.bf16.mxu0 %v6076_v49  ;;  %v5213_v6 = vpack.c.bf16 %v3992_v5, %v3991_v4 }
 0x992   : > { %5196 = vmatpush3.bf16.msra.mxu0 %v5195_v7  ;;  %v3993_v7 = vld [vmem:[%s6735_s2 + $0x1b0] sm:$0xff] }
 0x993   : > { %5197 = vmatprep.subr.bf16.mxu0 %v6076_v49  ;;  %v5216_v9 = vpack.c.bf16 %v3994_v8, %v3993_v7 }
 0x996   : > { %5199 = vmatpush3.bf16.msra.mxu0 %v5198_v11  ;;  %v3995_v11 = vld [vmem:[%s6735_s2 + $0x1c0] sm:$0xff] }
 0x997   : > { %5200 = vmatprep.subr.bf16.mxu0 %v6076_v49  ;;  %v5219_v13 = vpack.c.bf16 %v3996_v12, %v3995_v11 }
 0x99a   : > { %5202 = vmatpush3.bf16.msra.mxu0 %v5201_v14  ;;  %v3997_v14 = vld [vmem:[%s6735_s2 + $0x1d0] sm:$0xff] }
 0x99b   : > { %5203 = vmatprep.subr.bf16.mxu0 %v6076_v49  ;;  %v5222_v16 = vpack.c.bf16 %v3998_v15, %v3997_v14 }
 0x99e   : > { %5205 = vmatpush3.bf16.msra.mxu0 %v5204_v17  ;;  %v3999_v17 = vld [vmem:[%s6735_s2 + $0x1e0] sm:$0xff] }
 0x99f   : > { %5230 = vmatprep.subr.bf16.mxu0 %v6076_v49 }
 0x9a1   : > { %4769 = vmatmul.mubr.f32.vlgmr.msra.gmra.mrb[12].mxu0 %v6865_v32 }
 0x9a2   : > { %4848 = vmatprep.mubr.msk.f32.mxu0 %vm6077_vm1, %v6078_v57  ;;  %5232 = vmatpush3.bf16.msra.mxu0 %v5231_v30 }
 0x9a3   : > { %5233 = vmatprep.subr.bf16.mxu0 %v6076_v49 }
 0x9a6   : > { %5235 = vmatpush3.bf16.msra.mxu0 %v5234_v37  ;;  %v4026_v37 = vld [vmem:[%s7633_s3 + $0x198] sm:$0xff] }
 0x9a7   : > { %5236 = vmatprep.subr.bf16.mxu0 %v6076_v49  ;;  %v5258_v38 = vpack.c.bf16 %v4026_v37, %v4025_v35 }
 0x9aa   : > { %5238 = vmatpush3.bf16.msra.mxu0 %v5237_v40  ;;  %v4028_v40 = vld [vmem:[%s7633_s3 + $0x1a8] sm:$0xff] }
 0x9ab   : > { %5239 = vmatprep.subr.bf16.mxu0 %v6076_v49  ;;  %v5261_v41 = vpack.c.bf16 %v4028_v40, %v4027_v39 }
 0x9ae   : > { %5241 = vmatpush3.bf16.msra.mxu0 %v5240_v43  ;;  %v4030_v43 = vld [vmem:[%s7633_s3 + $0x1b8] sm:$0xff] }
 0x9af   : > { %5242 = vmatprep.subr.bf16.mxu0 %v6076_v49  ;;  %v5264_v44 = vpack.c.bf16 %v4030_v43, %v4029_v42 }
 0x9b2   : > { %5244 = vmatpush3.bf16.msra.mxu0 %v5243_v46  ;;  %v4032_v46 = vld [vmem:[%s7633_s3 + $0x1c8] sm:$0xff] }
 0x9b3   : > { %5245 = vmatprep.subr.bf16.mxu0 %v6076_v49 }
 0xa34   : > { %v7065_v50 = vpop.f32.mrb[8].mxu0 }
 0xa35   : > { %v4665_v51 = vpop.f32.mrb[9].mxu0 }
 0xa36   : > { %v5246_v51 = vpack.c.bf16 %v4016_v48, %v4015_v47  ;;  %v5267_v47 = vpack.c.bf16 %v4032_v46, %v4031_v45  ;;  %v4033_v48 = vld [vmem:[%s7633_s3 + $0x1d0] sm:$0xff] }
 0xa38   : > { %5247 = vmatpush3.bf16.msra.mxu0 %v5246_v51  ;;  %v4034_v51 = vld [vmem:[%s7633_s3 + $0x1d8] sm:$0xff] }
 0xa39   : > { %5248 = vmatprep.subr.bf16.mxu0 %v6076_v49 }
 0xa54   : > { %v2211_v53 = vpop.f32.mrb[10].mxu0 }
 0xa55   : > { %v2212_v54 = vadd.f32 %v3949_v52, %v2211_v53  ;;  %v4700_v55 = vpop.f32.mrb[11].mxu0  ;;  %v4017_v52 = vld [vmem:[%s6741_s9 + $0x1e0] sm:$0xff]  ;;  %v4018_v53 = vld [vmem:[%s6741_s9 + $0x1e8] sm:$0xff] }
 0xa56   : > { %v4019_v55 = vld [vmem:[%s6741_s9 + $0x1f0] sm:$0xff] }
 0xa57   : > { %4774 = vmatmul.mubr.f32.vlgmr.msra.gmra.mrb[12].mxu1 %v2212_v54  ;;  %v5249_v54 = vpack.c.bf16 %v4018_v53, %v4017_v52  ;;  %v5252_v58 = vpack.c.bf16 %v4020_v56, %v4019_v55  ;;  %v5270_v52 = vpack.c.bf16 %v4034_v51, %v4033_v48  ;;  %v4035_v53 = vld [vmem:[%s7633_s3 + $0x1e0] sm:$0xff]  ;;  %v4037_v56 = vld [vmem:[%s7633_s3 + $0x1f0] sm:$0xff] }
 0xa58   : > { %4778 = vmatprep.mubr.msk.f32.mxu1 %vm6077_vm1, %v6078_v57 }
 0xa59   : > { %5250 = vmatpush3.bf16.msra.mxu0 %v5249_v54  ;;  %v4036_v54 = vld [vmem:[%s7633_s3 + $0x1e8] sm:$0xff] }
 0xa5a   : > { %5251 = vmatprep.subr.bf16.mxu0 %v6076_v49  ;;  %v5273_v55 = vpack.c.bf16 %v4036_v54, %v4035_v53 }
 0xa5d   : > { %5253 = vmatpush3.bf16.msra.mxu0 %v5252_v58  ;;  %v4038_v58 = vld [vmem:[%s7633_s3 + $0x1f8] sm:$0xff] }
 0xa5e   : > { %4886 = vmatprep.subr.mxu0 %v6078_v57 }
 0xa60   : > { %4849 = vmatmul.mubr.f32.vlgmr.msra.gmra.mrb[14].mxu0 %v6865_v32 }
 0xa61   : > { %4888 = vmatprep.mubr.msk.f32.mxu0 %vm6077_vm1, %v6078_v57 }
 0xa74   : > { %v2401_v29 = vpop.f32.mrb[12].mxu0 }
 0xa75   : > { %v4770_v33 = vpop.f32.mrb[13].mxu0  ;;  %v2402_v34 = vadd.f32 %v3985_v31, %v2401_v29 }
 0xa76   : > { %v4023_v33 = vld [vmem:[%s7633_s3 + $0x180] sm:$0xff] }
 0xa77   : > { %4777 = vmatpush3.msra.mxu1 %v2402_v34  ;;  %v4024_v34 = vld [vmem:[%s7633_s3 + $0x188] sm:$0xff]  ;;  %s7645_s3 = sld [smem:[#allocation34_spill]] }
 0xa78   : > { %5206 = vmatprep.subr.bf16.mxu1 %v6076_v49  ;;  %v5255_v36 = vpack.c.bf16 %v4024_v34, %v4023_v33 }
 0xa7d   : > { %p4049_p7 = scmp.ne.s32.totalorder %s7645_s3, 1 }
 0xb2a   : > { %v2471_v18 = vpop.f32.mrb[12].mxu1 }
 0xb2b   : > { %v2475_v19 = vmul.f32 0.35355338, %v2471_v18  ;;  %v4775_v20 = vpop.f32.mrb[13].mxu1  ;;  %v4000_v18 = vld [vmem:[%s6735_s2 + $0x1e8] sm:$0xff] }
 0xb2c   : > { %v4001_v20 = vld [vmem:[%s6735_s2 + $0x1f0] sm:$0xff] }
 0xb2d   : > { %v2476_v21 = vsel %vm1595_vm2, %v2475_v19, -inf }
 0xb2e   : > { %2477 = vmax.xlane.f32.xlu0 %v2476_v21  ;;  %v4002_v21 = vld [vmem:[%s6735_s2 + $0x1f8] sm:$0xff] }
 0xbbb   : > { %v2478_v22 = vpop.xlane.xlu0 %2477 }
 0xbbc   : > { %v2479_v23 = vsub.f32 %v2475_v19, %v2478_v22  ;;  %v5225_v19 = vpack.c.bf16 %v4000_v18, %v3999_v17  ;;  %v5228_v22 = vpack.c.bf16 %v4002_v21, %v4001_v20 }
 0xbbe   : > { %v2480_v24 = vmul.f32 1.442695, %v2479_v23  ;;  %v4022_v23 = vld [vmem:[%s6774_s26 + $0x3] ss:$0 sm:$0xff]  ;;  %s7635_s26 = sld [smem:[#allocation52_spill]] }
 0xbc0   : > { %5581 = vpow2.f32 %v2480_v24  ;;  %v2746_v24 = vpop.f32.mrb[14].mxu0 }
 0xbc4   : > { %v3016_v11 = vld [vmem:[%s7635_s26 + $0x80] sm:$0xff]  ;;  %v3017_v12 = vld [vmem:[%s7635_s26 + $0x88] sm:$0xff]  ;;  %v3051_v20 = vld [vmem:[%s7635_s26 + $0x198] sm:$0xff] }
 0xbc5   : > { %v3048_v14 = vld [vmem:[%s7635_s26 + $0x180] sm:$0xff]  ;;  %v3049_v15 = vld [vmem:[%s7635_s26 + $0x188] sm:$0xff]  ;;  %v3055_v33 = vld [vmem:[%s7635_s26 + $0x1b8] sm:$0xff] }
 0xbc6   : > { %v5310_v17 = vpack.c.bf16 %v3049_v15, %v3048_v14  ;;  %v3033_v18 = vld [vmem:[%s7635_s26 + $0x108] sm:$0xff]  ;;  %v3039_v37 = vld [vmem:[%s7635_s26 + $0x138] sm:$0xff]  ;;  %v3040_v42 = vld [vmem:[%s7635_s26 + $0x140] sm:$0xff] }
 0xbc7   : > { %v3057_v39 = vld [vmem:[%s7635_s26 + $0x1c8] sm:$0xff]  ;;  %v3059_v45 = vld [vmem:[%s7635_s26 + $0x1d8] sm:$0xff]  ;;  %v3042_v48 = vld [vmem:[%s7635_s26 + $0x150] sm:$0xff] }
 0xbc8   : > { %v3041_v43 = vld [vmem:[%s7635_s26 + $0x148] sm:$0xff]  ;;  %v3043_v51 = vld [vmem:[%s7635_s26 + $0x158] sm:$0xff]  ;;  %v3002_v14 = vld [vmem:[%s7635_s26 + $0x10] sm:$0xff] }
 0xbc9   : > { %v5328_v46 = vpack.c.bf16 %v3041_v43, %v3040_v42  ;;  %v3061_v53 = vld [vmem:[%s7635_s26 + $0x1e8] sm:$0xff]  ;;  %v5332_v54 = vpack.c.bf16 %v3043_v51, %v3042_v48  ;;  %v3003_v15 = vld [vmem:[%s7635_s26 + $0x18] sm:$0xff]  ;;  %v3012_v43 = vld [vmem:[%s7635_s26 + $0x60] sm:$0xff] }
 0xbca   : > { %v5582_v25 = vpop.eup %5581  ;;  %v3014_v51 = vld [vmem:[%s7635_s26 + $0x70] sm:$0xff] }
 0xbcb   : > { %v2482_v26 = vsel %vm1595_vm2, %v5582_v25, 0.0 }
 0xbcc   : > { %2483 = vadd.xlane.f32.xlu1 %v2482_v26  ;;  %v4850_v26 = vpop.f32.mrb[15].mxu0 }
 0xbcd   : > { %v3053_v26 = vld [vmem:[%s7635_s26 + $0x1a8] sm:$0xff] }
 0xc59   : > { %v2484_v59 = vpop.xlane.xlu1 %2483 }
 0xc5a   : > { %5583 = vrcp.f32 %v2484_v59  ;;  %v5276_v59 = vpack.c.bf16 %v4038_v58, %v4037_v56  ;;  %v3044_v56 = vld [vmem:[%s7635_s26 + $0x160] sm:$0xff]  ;;  %v3045_v58 = vld [vmem:[%s7635_s26 + $0x168] sm:$0xff] }
 0xc64   : > { %v5584_v62 = vpop.eup %5583 }
 0xc65   : > { %v2486_v0 = vmul.f32 %v5584_v62, %v5582_v25  ;;  %v2747_v25 = vadd.f32 %v4022_v23, %v2746_v24  ;;  %v3034_v23 = vld [vmem:[%s7635_s26 + $0x110] sm:$0xff]  ;;  %v3035_v24 = vld [vmem:[%s7635_s26 + $0x118] sm:$0xff] }
 0xc67   : > { %4779 = vmatmul.mubr.msk.f32.vlgmr.msra.gmra.mrb[14].mxu1 %vm1595_vm2, %v2486_v0  ;;  %4887 = vmatpush3.xpose.msra.mxu0 %v2747_v25  ;;  %v3052_v25 = vld [vmem:[%s7635_s26 + $0x1a0] sm:$0xff] }
 0xc68   : > { %5208 = vmatpush3.bf16.msra.mxu1 %v5207_v63  ;;  %4813 = vmatprep.mubr.msk.f32.mxu1 %vm6077_vm1, %v6078_v57 }
 0xc69   : > { %5209 = vmatprep.subr.bf16.mxu1 %v6076_v49  ;;  %4891 = vmatprep.subr.mxu0 %v6078_v57 }
 0xc6c   : > { %5211 = vmatpush3.bf16.msra.mxu1 %v5210_v3 }
 0xc6d   : > { %5212 = vmatprep.subr.bf16.mxu1 %v6076_v49 }
 0xc70   : > { %5214 = vmatpush3.bf16.msra.mxu1 %v5213_v6  ;;  %v4040_v6 = vld [vmem:[%s7634_s18 + $0x3] ss:$0 sm:$0xff] }
 0xc71   : > { %5215 = vmatprep.subr.bf16.mxu1 %v6076_v49 }
 0xc74   : > { %5217 = vmatpush3.bf16.msra.mxu1 %v5216_v9 }
 0xc75   : > { %5218 = vmatprep.subr.bf16.mxu1 %v6076_v49 }
 0xc78   : > { %5220 = vmatpush3.bf16.msra.mxu1 %v5219_v13  ;;  %v5278_v13 = vpack.c.bf16 %v3017_v12, %v3016_v11 }
 0xc79   : > { %5221 = vmatprep.subr.bf16.mxu1 %v6076_v49 }
 0xc7c   : > { %5223 = vmatpush3.bf16.msra.mxu1 %v5222_v16  ;;  %v3032_v16 = vld [vmem:[%s7635_s26 + $0x100] sm:$0xff] }
 0xc7d   : > { %5224 = vmatprep.subr.bf16.mxu1 %v6076_v49  ;;  %v5312_v21 = vpack.c.bf16 %v3033_v18, %v3032_v16  ;;  %v3020_v16 = vld [vmem:[%s7635_s26 + $0xa0] sm:$0xff]  ;;  %v5284_v18 = vpack.c.bf16 %v3003_v15, %v3002_v14  ;;  %v3248_v14 = vld [vmem:[%s7636_s0 + $0x38] sm:$0xff] }
 0xc7e   : > { %v3249_v15 = vld [vmem:[%s7636_s0 + $0x40] sm:$0xff] }
 0xc80   : > { %5226 = vmatpush3.bf16.msra.mxu1 %v5225_v19  ;;  %v3050_v19 = vld [vmem:[%s7635_s26 + $0x190] sm:$0xff] }
 0xc81   : > { %5227 = vmatprep.subr.bf16.mxu1 %v6076_v49 }
 0xc84   : > { %5229 = vmatpush3.bf16.msra.mxu1 %v5228_v22  ;;  %v5314_v22 = vpack.c.bf16 %v3051_v20, %v3050_v19  ;;  %v3004_v20 = vld [vmem:[%s7635_s26 + $0x20] sm:$0xff] }
 0xc85   : > { %5254 = vmatprep.subr.bf16.mxu1 %v6076_v49 }
 0xc87   : > { %4814 = vmatmul.mubr.f32.vlgmr.msra.gmra.mrb[16].mxu1 %v6865_v32  ;;  %v4004_v32 = vld [vmem:[%s6769_s13 + $0x3] ss:$0 sm:$0xff] }
 0xc88   : > { %4883 = vmatprep.mubr.msk.f32.mxu1 %vm6077_vm1, %v6078_v57  ;;  %5256 = vmatpush3.bf16.msra.mxu1 %v5255_v36  ;;  %v3038_v36 = vld [vmem:[%s7635_s26 + $0x130] sm:$0xff] }
 0xc89   : > { %5257 = vmatprep.subr.bf16.mxu1 %v6076_v49  ;;  %v5324_v40 = vpack.c.bf16 %v3039_v37, %v3038_v36  ;;  %v3010_v37 = vld [vmem:[%s7635_s26 + $0x50] sm:$0xff] }
 0xc8c   : > { %5259 = vmatpush3.bf16.msra.mxu1 %v5258_v38  ;;  %v3056_v38 = vld [vmem:[%s7635_s26 + $0x1c0] sm:$0xff] }
 0xc8d   : > { %5260 = vmatprep.subr.bf16.mxu1 %v6076_v49 }
 0xc90   : > { %5262 = vmatpush3.bf16.msra.mxu1 %v5261_v41  ;;  %v5326_v41 = vpack.c.bf16 %v3057_v39, %v3056_v38  ;;  %v3011_v38 = vld [vmem:[%s7635_s26 + $0x58] sm:$0xff]  ;;  %v3028_v39 = vld [vmem:[%s7635_s26 + $0xe0] sm:$0xff] }
 0xc91   : > { %5263 = vmatprep.subr.bf16.mxu1 %v6076_v49 }
 0xc94   : > { %5265 = vmatpush3.bf16.msra.mxu1 %v5264_v44  ;;  %v3058_v44 = vld [vmem:[%s7635_s26 + $0x1d0] sm:$0xff] }
 0xc95   : > { %5266 = vmatprep.subr.bf16.mxu1 %v6076_v49 }
 0xc98   : > { %5268 = vmatpush3.bf16.msra.mxu1 %v5267_v47  ;;  %v5330_v47 = vpack.c.bf16 %v3059_v45, %v3058_v44  ;;  %v3013_v44 = vld [vmem:[%s7635_s26 + $0x68] sm:$0xff]  ;;  %v3030_v45 = vld [vmem:[%s7635_s26 + $0xf0] sm:$0xff] }
 0xc99   : > { %5269 = vmatprep.subr.bf16.mxu1 %v6076_v49 }
 0xc9c   : > { %5271 = vmatpush3.bf16.msra.mxu1 %v5270_v52  ;;  %v3060_v52 = vld [vmem:[%s7635_s26 + $0x1e0] sm:$0xff] }
 0xc9d   : > { %5272 = vmatprep.subr.bf16.mxu1 %v6076_v49 }
 0xca0   : > { %5274 = vmatpush3.bf16.msra.mxu1 %v5273_v55  ;;  %v5334_v55 = vpack.c.bf16 %v3061_v53, %v3060_v52  ;;  %v3015_v52 = vld [vmem:[%s7635_s26 + $0x78] sm:$0xff] }
 0xca1   : > { %5275 = vmatprep.subr.bf16.mxu1 %v6076_v49  ;;  %v5308_v53 = vpack.c.bf16 %v3015_v52, %v3014_v51 }
 0xca4   : > { %5277 = vmatpush3.bf16.msra.mxu1 %v5276_v59  ;;  %v3062_v59 = vld [vmem:[%s7635_s26 + $0x1f0] sm:$0xff] }
 0xca5   : > { %5311 = vmatprep.subr.bf16.mxu1 %v5310_v17  ;;  %v3021_v17 = vld [vmem:[%s7635_s26 + $0xa8] sm:$0xff] }
 0xca6   : > { %v5286_v19 = vpack.c.bf16 %v3021_v17, %v3020_v16  ;;  %v3250_v16 = vld [vmem:[%s7636_s0 + $0x48] sm:$0xff]  ;;  %v3251_v17 = vld [vmem:[%s7636_s0 + $0x50] sm:$0xff] }
 0xca7   : > { %4884 = vmatmul.mubr.f32.vlgmr.msra.gmra.mrb[18].mxu1 %v7188_v60 }
 0xca8   : > { %5313 = vmatpush3.bf16.msra.mxu1 %v5312_v21  ;;  %v3022_v21 = vld [vmem:[%s7635_s26 + $0xb0] sm:$0xff] }
 0xca9   : > { %5315 = vmatprep.subr.bf16.mxu1 %v5314_v22  ;;  %v3023_v22 = vld [vmem:[%s7635_s26 + $0xb8] sm:$0xff] }
 0xd3a   : > { %v7160_v27 = vpop.f32.mrb[14].mxu1 }
 0xd3b   : > { %v4780_v28 = vpop.f32.mrb[15].mxu1 }
 0xd3c   : > { %v5316_v28 = vpack.c.bf16 %v3035_v24, %v3034_v23  ;;  %v5290_v24 = vpack.c.bf16 %v3023_v22, %v3022_v21  ;;  %v3254_v21 = vld [vmem:[%s7636_s0 + $0x68] sm:$0xff] }
 0xd3e   : > { %5317 = vmatpush3.bf16.msra.mxu1 %v5316_v28  ;;  %v3025_v28 = vld [vmem:[%s7635_s26 + $0xc8] sm:$0xff] }
 0xd5a   : > { %v2651_v29 = vpop.f32.mrb[16].mxu1 }
 0xd5b   : > { %v2652_v30 = vadd.f32 %v4004_v32, %v2651_v29  ;;  %v4815_v31 = vpop.f32.mrb[17].mxu1  ;;  %v5318_v32 = vpack.c.bf16 %v3053_v26, %v3052_v25  ;;  %v3036_v29 = vld [vmem:[%s7635_s26 + $0x120] sm:$0xff]  ;;  %v3006_v25 = vld [vmem:[%s7635_s26 + $0x30] sm:$0xff]  ;;  %v3007_v26 = vld [vmem:[%s7635_s26 + $0x38] sm:$0xff] }
 0xd5c   : > { %v3054_v31 = vld [vmem:[%s7635_s26 + $0x1b0] sm:$0xff] }
 0xd5d   : > { %4889 = vmatmul.mubr.f32.vlgmr.msra.gmra.mrb[16].mxu0 %v2652_v30  ;;  %v3037_v30 = vld [vmem:[%s7635_s26 + $0x128] sm:$0xff]  ;;  %5319 = vmatprep.subr.bf16.mxu1 %v5318_v32  ;;  %v5322_v35 = vpack.c.bf16 %v3055_v33, %v3054_v31  ;;  %v5292_v32 = vpack.c.bf16 %v3007_v26, %v3006_v25  ;;  %v3026_v33 = vld [vmem:[%s7635_s26 + $0xd0] sm:$0xff]  ;;  %v3335_v26 = vld [vmem:[%s6805_s1] sm:$0xff] }
 0xd5e   : > { %4893 = vmatprep.mubr.msk.f32.mxu0 %vm6077_vm1, %v6078_v57  ;;  %v5320_v34 = vpack.c.bf16 %v3037_v30, %v3036_v29  ;;  %v3008_v30 = vld [vmem:[%s7635_s26 + $0x40] sm:$0xff]  ;;  %v3009_v31 = vld [vmem:[%s7635_s26 + $0x48] sm:$0xff] }
 0xd60   : > { %5321 = vmatpush3.bf16.msra.mxu1 %v5320_v34  ;;  %v3027_v34 = vld [vmem:[%s7635_s26 + $0xd8] sm:$0xff] }
 0xd61   : > { %5323 = vmatprep.subr.bf16.mxu1 %v5322_v35  ;;  %v5296_v35 = vpack.c.bf16 %v3009_v31, %v3008_v30  ;;  %v5298_v36 = vpack.c.bf16 %v3027_v34, %v3026_v33  ;;  %v3339_v31 = vld [vmem:[%s6805_s1 + $0x20] sm:$0xff]  ;;  %v3340_v33 = vld [vmem:[%s6805_s1 + $0x28] sm:$0xff] }
 0xd62   : > { %v5373_v34 = vpack.c.bf16 %v3340_v33, %v3339_v31 }
 0xd64   : > { %5325 = vmatpush3.bf16.msra.mxu1 %v5324_v40  ;;  %v3029_v40 = vld [vmem:[%s7635_s26 + $0xe8] sm:$0xff] }
 0xd65   : > { %5327 = vmatprep.subr.bf16.mxu1 %v5326_v41  ;;  %v5300_v41 = vpack.c.bf16 %v3011_v38, %v3010_v37  ;;  %v5302_v42 = vpack.c.bf16 %v3029_v40, %v3028_v39  ;;  %v3343_v38 = vld [vmem:[%s6805_s1 + $0x40] sm:$0xff]  ;;  %v3344_v39 = vld [vmem:[%s6805_s1 + $0x48] sm:$0xff] }
 0xd66   : > { %v5379_v40 = vpack.c.bf16 %v3344_v39, %v3343_v38 }
 0xd68   : > { %5329 = vmatpush3.bf16.msra.mxu1 %v5328_v46  ;;  %v3031_v46 = vld [vmem:[%s7635_s26 + $0xf8] sm:$0xff] }
 0xd69   : > { %5331 = vmatprep.subr.bf16.mxu1 %v5330_v47  ;;  %v5304_v47 = vpack.c.bf16 %v3013_v44, %v3012_v43  ;;  %v5306_v48 = vpack.c.bf16 %v3031_v46, %v3030_v45  ;;  %v3347_v44 = vld [vmem:[%s6805_s1 + $0x60] sm:$0xff]  ;;  %v3348_v45 = vld [vmem:[%s6805_s1 + $0x68] sm:$0xff] }
 0xd6a   : > { %v5385_v46 = vpack.c.bf16 %v3348_v45, %v3347_v44 }
 0xd6c   : > { %5333 = vmatpush3.bf16.msra.mxu1 %v5332_v54 }
 0xd6d   : > { %5335 = vmatprep.subr.bf16.mxu1 %v5334_v55 }
 0xd7a   : > { %v2841_v7 = vpop.f32.mrb[18].mxu1 }
 0xd7b   : > { %v2842_v8 = vadd.f32 %v4040_v6, %v2841_v7  ;;  %v4885_v9 = vpop.f32.mrb[19].mxu1  ;;  %v3001_v6 = vld [vmem:[%s7635_s26 + $0x8] sm:$0xff]  ;;  %v3018_v7 = vld [vmem:[%s7635_s26 + $0x90] sm:$0xff] }
 0xd7d   : > { %4892 = vmatpush3.msra.mxu0 %v2842_v8  ;;  %v3019_v8 = vld [vmem:[%s7635_s26 + $0x98] sm:$0xff] }
 0xd7e   : > { %5279 = vmatprep.subr.bf16.mxu0 %v5278_v13  ;;  %v5282_v13 = vpack.c.bf16 %v3019_v8, %v3018_v7 }
 0xe30   : > { %v2911_v61 = vpop.f32.mrb[16].mxu0 }
 0xe31   : > { %v2915_v62 = vmul.f32 0.35355338, %v2911_v61  ;;  %v4890_v63 = vpop.f32.mrb[17].mxu0  ;;  %v3063_v61 = vld [vmem:[%s7635_s26 + $0x1f8] sm:$0xff] }
 0xe32   : > { %v5338_v63 = vpack.c.bf16 %v3063_v61, %v3062_v59  ;;  %v3241_v61 = vld [vmem:[%s7636_s0] sm:$0xff] }
 0xe33   : > { %v2916_v0 = vsel %vm1595_vm2, %v2915_v62, -inf }
 0xe34   : > { %2917 = vmax.xlane.f32.xlu0 %v2916_v0  ;;  %v3046_v0 = vld [vmem:[%s7635_s26 + $0x170] sm:$0xff] }
 0xec1   : > { %v2918_v1 = vpop.xlane.xlu0 %2917 }
 0xec2   : > { %v2919_v2 = vsub.f32 %v2915_v62, %v2918_v1  ;;  %v5336_v62 = vpack.c.bf16 %v3045_v58, %v3044_v56  ;;  %v3047_v1 = vld [vmem:[%s7635_s26 + $0x178] sm:$0xff] }
 0xec4   : > { %v2920_v3 = vmul.f32 1.442695, %v2919_v2  ;;  %5337 = vmatpush3.bf16.msra.mxu1 %v5336_v62  ;;  %v5340_v2 = vpack.c.bf16 %v3047_v1, %v3046_v0  ;;  %v3242_v62 = vld [vmem:[%s7636_s0 + $0x8] sm:$0xff] }
 0xec5   : > { %5339 = vmatprep.subr.bf16.mxu1 %v5338_v63  ;;  %v3243_v63 = vld [vmem:[%s7636_s0 + $0x10] sm:$0xff]  ;;  %v5343_v0 = vpack.c.bf16 %v3242_v62, %v3241_v61  ;;  %v4044_v61 = vld [vmem:[%s1103_s10] ss:$0 sm:$0xff] }
 0xec6   : > { %5585 = vpow2.f32 %v2920_v3 }
 0xec8   : > { %5341 = vmatpush3.bf16.msra.mxu1 %v5340_v2 }
 0xec9   : > { %5366 = vmatprep.subr.bf16.mxu1 %v6076_v49 }
 0xed0   : > { %v7192_v4 = vpop.eup %5585 }
 0xed1   : > { %v2922_v5 = vsel %vm1595_vm2, %v7192_v4, 0.0 }
 0xed2   : > { %2923 = vadd.xlane.f32.xlu1 %v2922_v5  ;;  %v3000_v5 = vld [vmem:[%s7635_s26] sm:$0xff] }
 0xed3   : > { %v5280_v11 = vpack.c.bf16 %v3001_v6, %v3000_v5 }
 0xf5f   : > { %v2924_v3 = vpop.xlane.xlu1 %2923 }
 0xf60   : > { %5587 = vrcp.f32 %v2924_v3 }
 0xf6a   : > { %v5588_v9 = vpop.eup %5587 }
 0xf6b   : > { %v2926_v12 = vmul.f32 %v5588_v9, %v7192_v4  ;;  %v3005_v4 = vld [vmem:[%s7635_s26 + $0x28] sm:$0xff]  ;;  %v3245_v9 = vld [vmem:[%s7636_s0 + $0x20] sm:$0xff] }
 0xf6c   : > { %v5288_v23 = vpack.c.bf16 %v3005_v4, %v3004_v20  ;;  %v3253_v4 = vld [vmem:[%s7636_s0 + $0x60] sm:$0xff] }
 0xf6d   : > { %4894 = vmatmul.mubr.msk.f32.vlgmr.msra.gmra.mrb[18].mxu0 %vm1595_vm2, %v2926_v12  ;;  %v5361_v22 = vpack.c.bf16 %v3254_v21, %v3253_v4  ;;  %v4047_v4 = vld [vmem:[%s1112_s15] ss:$0 sm:$0xff] }
 0xf6e   : > { %5281 = vmatpush3.bf16.msra.mxu0 %v5280_v11  ;;  %3135 = vmatprep.mubr.f32.mxu0 %v7065_v50  ;;  %v3024_v50 = vld [vmem:[%s7635_s26 + $0xc0] sm:$0xff]  ;;  %v3246_v11 = vld [vmem:[%s7636_s0 + $0x28] sm:$0xff] }
 0xf6f   : > { %5283 = vmatprep.subr.bf16.mxu0 %v5282_v13  ;;  %v5294_v29 = vpack.c.bf16 %v3025_v28, %v3024_v50  ;;  %v5349_v12 = vpack.c.bf16 %v3246_v11, %v3245_v9  ;;  %v3247_v13 = vld [vmem:[%s7636_s0 + $0x30] sm:$0xff]  ;;  %v3336_v50 = vld [vmem:[%s6805_s1 + $0x8] sm:$0xff] }
 0xf70   : > { %v3337_v28 = vld [vmem:[%s6805_s1 + $0x10] sm:$0xff] }
 0xf72   : > { %5285 = vmatpush3.bf16.msra.mxu0 %v5284_v18  ;;  %v5355_v18 = vpack.c.bf16 %v3250_v16, %v3249_v15 }
 0xf73   : > { %5287 = vmatprep.subr.bf16.mxu0 %v5286_v19  ;;  %v3252_v19 = vld [vmem:[%s7636_s0 + $0x58] sm:$0xff] }
 0xf74   : > { %v5358_v20 = vpack.c.bf16 %v3252_v19, %v3251_v17 }
 0xf76   : > { %5289 = vmatpush3.bf16.msra.mxu0 %v5288_v23  ;;  %v3255_v23 = vld [vmem:[%s7636_s0 + $0x70] sm:$0xff] }
 0xf77   : > { %5291 = vmatprep.subr.bf16.mxu0 %v5290_v24  ;;  %v3256_v24 = vld [vmem:[%s7636_s0 + $0x78] sm:$0xff] }
 0xf78   : > { %v5364_v25 = vpack.c.bf16 %v3256_v24, %v3255_v23 }
 0xf7a   : > { %5293 = vmatpush3.bf16.msra.mxu0 %v5292_v32  ;;  %v5367_v32 = vpack.c.bf16 %v3336_v50, %v3335_v26 }
 0xf7b   : > { %5295 = vmatprep.subr.bf16.mxu0 %v5294_v29  ;;  %v3338_v29 = vld [vmem:[%s6805_s1 + $0x18] sm:$0xff] }
 0xf7c   : > { %v5370_v30 = vpack.c.bf16 %v3338_v29, %v3337_v28 }
 0xf7e   : > { %5297 = vmatpush3.bf16.msra.mxu0 %v5296_v35  ;;  %v3341_v35 = vld [vmem:[%s6805_s1 + $0x30] sm:$0xff] }
 0xf7f   : > { %5299 = vmatprep.subr.bf16.mxu0 %v5298_v36  ;;  %v3342_v36 = vld [vmem:[%s6805_s1 + $0x38] sm:$0xff] }
 0xf80   : > { %v5376_v37 = vpack.c.bf16 %v3342_v36, %v3341_v35 }
 0xf82   : > { %5301 = vmatpush3.bf16.msra.mxu0 %v5300_v41  ;;  %v3345_v41 = vld [vmem:[%s6805_s1 + $0x50] sm:$0xff] }
 0xf83   : > { %5303 = vmatprep.subr.bf16.mxu0 %v5302_v42  ;;  %v3346_v42 = vld [vmem:[%s6805_s1 + $0x58] sm:$0xff] }
 0xf84   : > { %v5382_v43 = vpack.c.bf16 %v3346_v42, %v3345_v41 }
 0xf86   : > { %5305 = vmatpush3.bf16.msra.mxu0 %v5304_v47 }
 0xf87   : > { %5307 = vmatprep.subr.bf16.mxu0 %v5306_v48 }
 0xf8a   : > { %5309 = vmatpush3.bf16.msra.mxu0 %v5308_v53 }
 0xf8b   : > { %5342 = vmatprep.subr.bf16.mxu0 %v6076_v49 }
 0xf8d   : > { %3136 = vmatmul.mubr.f32.vlgmr.msra.gmra.mrb[20].mxu0 %v6970_v10  ;;  %v3244_v10 = vld [vmem:[%s7636_s0 + $0x18] sm:$0xff] }
 0xf8e   : > { %4928 = vmatprep.mubr.msk.f32.mxu0 %vm6077_vm1, %v6078_v57  ;;  %5344 = vmatpush3.bf16.msra.mxu0 %v5343_v0  ;;  %v5346_v1 = vpack.c.bf16 %v3244_v10, %v3243_v63  ;;  %v3349_v0 = vld [vmem:[%s6805_s1 + $0x70] sm:$0xff]  ;;  %v3350_v10 = vld [vmem:[%s6805_s1 + $0x78] sm:$0xff] }
 0xf8f   : > { %5345 = vmatprep.subr.bf16.mxu0 %v6076_v49 }
 0xf92   : > { %5347 = vmatpush3.bf16.msra.mxu0 %v5346_v1  ;;  %v5388_v1 = vpack.c.bf16 %v3350_v10, %v3349_v0 }
 0xf93   : > { %5348 = vmatprep.subr.bf16.mxu0 %v6076_v49 }
 0xf96   : > { %5350 = vmatpush3.bf16.msra.mxu0 %v5349_v12 }
 0xf97   : > { %5351 = vmatprep.subr.bf16.mxu0 %v6076_v49 }
0x1040   : > { %v2996_v54 = vpop.f32.mrb[18].mxu0 }
0x1041   : > { %v4895_v55 = vpop.f32.mrb[19].mxu0  ;;  %3205 = vmatprep.mubr.f32.mxu1 %v2996_v54 }
0x1042   : > { %3206 = vmatmul.mubr.f32.vlgmr.msra.gmra.mrb[20].mxu1 %v7160_v27 }
0x1043   : > { %4963 = vmatprep.mubr.msk.f32.mxu1 %vm6077_vm1, %v6078_v57  ;;  %v4042_v57 = vld [vmem:[%s7638_s22] ss:$0 sm:$0xff]  ;;  %5368 = vmatpush3.bf16.msra.mxu1 %v5367_v32 }
0x1044   : > { %5369 = vmatprep.subr.bf16.mxu1 %v6076_v49 }
0x1047   : > { %5371 = vmatpush3.bf16.msra.mxu1 %v5370_v30 }
0x1048   : > { %5372 = vmatprep.subr.bf16.mxu1 %v6076_v49 }
0x104b   : > { %5374 = vmatpush3.bf16.msra.mxu1 %v5373_v34 }
0x104c   : > { %5375 = vmatprep.subr.bf16.mxu1 %v6076_v49 }
0x104f   : > { %5377 = vmatpush3.bf16.msra.mxu1 %v5376_v37 }
0x1050   : > { %5378 = vmatprep.subr.bf16.mxu1 %v6076_v49 }
0x1053   : > { %5380 = vmatpush3.bf16.msra.mxu1 %v5379_v40 }
0x1054   : > { %5381 = vmatprep.subr.bf16.mxu1 %v6076_v49 }
0x1057   : > { %5383 = vmatpush3.bf16.msra.mxu1 %v5382_v43 }
0x1058   : > { %5384 = vmatprep.subr.bf16.mxu1 %v6076_v49 }
0x105b   : > { %5386 = vmatpush3.bf16.msra.mxu1 %v5385_v46 }
0x105c   : > { %5387 = vmatprep.subr.bf16.mxu1 %v6076_v49 }
0x105f   : > { %5389 = vmatpush3.bf16.msra.mxu1 %v5388_v1 }
0x1060   : > { %v4329_v56 = vpop.f32.mrb[20].mxu0 }
0x1061   : > { %v4330_v58 = vpop.f32.mrb[21].mxu0 }
0x1062   : > { %v4331_v59 = vadd.f32 %v4330_v58, %v4329_v56 }
0x1064   : > { %v3138_v3 = vadd.f32 %v4331_v59, %v4042_v57  ;;  %v4043_v59 = vld [vmem:[%s1100_s4] ss:$0 sm:$0xff] }
0x1065   : > { %v4045_v57 = vld [vmem:[%s1106_s21] ss:$0 sm:$0xff] }
0x1115   : > { %v4364_v27 = vpop.f32.mrb[20].mxu1 }
0x1116   : > { %v4365_v2 = vpop.f32.mrb[21].mxu1 }
0x1117   : > { %v4366_v5 = vadd.f32 %v4365_v2, %v4364_v27 }
0x1119   : > { %v3208_v6 = vadd.f32 %v4366_v5, %v3138_v3 }
0x111b   : > { %v7284_v7 = vadd.f32 %v7188_v60, %v3208_v6  ;;  %v5352_v60 = vpack.c.bf16 %v3248_v14, %v3247_v13  ;;  %v4046_v6 = vld [vmem:[%s1109_s19] ss:$0 sm:$0xff] }
0x111d   : > { %3214 = vadd.xlane.f32.xlu0 %v7284_v7  ;;  %v3216_v8 = vmul.f32 %v7284_v7, %v7284_v7  ;;  %5353 = vmatpush3.bf16.msra.mxu0 %v5352_v60 }
0x111e   : > { %5354 = vmatprep.subr.bf16.mxu0 %v6076_v49 }
0x111f   : > { %3217 = vadd.xlane.f32.xlu1 %v3216_v8 }
0x1121   : > { %5356 = vmatpush3.bf16.msra.mxu0 %v5355_v18 }
0x1122   : > { %5357 = vmatprep.subr.bf16.mxu0 %v6076_v49 }
0x1125   : > { %5359 = vmatpush3.bf16.msra.mxu0 %v5358_v20 }
0x1126   : > { %5360 = vmatprep.subr.bf16.mxu0 %v6076_v49 }
0x1129   : > { %5362 = vmatpush3.bf16.msra.mxu0 %v5361_v22  ;;  %v4048_v22 = vld [vmem:[%s1115_s5] ss:$0 sm:$0xff] }
0x112a   : > { %5363 = vmatprep.subr.bf16.mxu0 %v6076_v49 }
0x112d   : > { %5365 = vmatpush3.bf16.msra.mxu0 %v5364_v25 }
0x11aa   : > { %v3215_v47 = vpop.xlane.xlu0 %3214 }
0x11ab   : > { %v3219_v48 = vmul.f32 0.03125, %v3215_v47 }
0x11ac   : > { %v3218_v51 = vpop.xlane.xlu1 %3217 }
0x11ad   : > { %v3221_v52 = vmul.f32 %v3219_v48, %v3219_v48  ;;  %v3220_v53 = vmul.f32 0.03125, %v3218_v51  ;;  %v3223_v56 = vsub.f32 %v7284_v7, %v3219_v48 }
0x11af   : > { %v3222_v54 = vsub.f32 %v3220_v53, %v3221_v52 }
0x11b1   : > { %v3224_v55 = vadd.f32 1e-05, %v3222_v54 }
0x11b3   : > { %5589 = vrsqrt.f32 %v3224_v55 }
0x11bd   : > { %v5590_v58 = vpop.eup %5589 }
0x11be   : > { %v3226_v49 = vmul.f32 %v5590_v58, %v3223_v56 }
0x11c0   : > { %v3233_v62 = vmul.f32 %v4043_v59, %v3226_v49 }
0x11c2   : > { %v3240_v63 = vadd.f32 %v4044_v61, %v3233_v62 }
0x11c4   : > { %4929 = vmatmul.mubr.f32.vlgmr.msra.gmra.mrb[22].mxu0 %v3240_v63 }
0x1297   : > { %v3330_v27 = vpop.f32.mrb[22].mxu0 }
0x1298   : > { %v3331_v2 = vadd.f32 %v4045_v57, %v3330_v27  ;;  %v4930_v3 = vpop.f32.mrb[23].mxu0 }
0x129a   : > { %v3334_v5 = vmax.f32 %v3331_v2, 0.0 }
0x129c   : > { %4964 = vmatmul.mubr.f32.vlgmr.msra.gmra.mrb[22].mxu1 %v3334_v5 }
0x136f   : > { %v3424_v7 = vpop.f32.mrb[22].mxu1 }
0x1370   : > { %v3425_v8 = vadd.f32 %v4046_v6, %v3424_v7  ;;  %v4965_v9 = vpop.f32.mrb[23].mxu1 }
0x1372   : > { %v3428_v11 = vadd.f32 %v3425_v8, %v3240_v63 }
0x1374   : > { %3431 = vadd.xlane.f32.xlu0 %v3428_v11  ;;  %v3433_v12 = vmul.f32 %v3428_v11, %v3428_v11 }
0x1376   : > { %3434 = vadd.xlane.f32.xlu1 %v3433_v12 }
0x1401   : > { %v3432_v13 = vpop.xlane.xlu0 %3431 }
0x1402   : > { %v3436_v14 = vmul.f32 0.03125, %v3432_v13 }
0x1403   : > { %v3435_v60 = vpop.xlane.xlu1 %3434 }
0x1404   : > { %v3438_v15 = vmul.f32 %v3436_v14, %v3436_v14  ;;  %v3437_v16 = vmul.f32 0.03125, %v3435_v60  ;;  %v3440_v19 = vsub.f32 %v3428_v11, %v3436_v14 }
0x1406   : > { %v3439_v17 = vsub.f32 %v3437_v16, %v3438_v15 }
0x1408   : > { %v3441_v18 = vadd.f32 1e-05, %v3439_v17 }
0x140a   : > { %5591 = vrsqrt.f32 %v3441_v18 }
0x1414   : > { %v5592_v20 = vpop.eup %5591 }
0x1415   : > { %v3443_v21 = vmul.f32 %v5592_v20, %v3440_v19  ;;  %3462 = sbr.rel (%p4049_p7) target bundleno = 5148 (0x141c), region = 156 }
0x1417   : > { %v3450_v23 = vmul.f32 %v4047_v4, %v3443_v21 }
0x1419   : > { %v3457_v24 = vadd.f32 %v4048_v22, %v3450_v23 }
0x141b   : > { %3458 = vst [vmem:[#allocation2] sm:$0xff] %v3457_v24  ;;  %3463 = vst [vmem:[%s6809_s16] sm:$0xff] (!%p4049_p7), %v3457_v24 }
0x141c PF: > { %s7646_s18 = sld [smem:[#allocation35_spill]]  ;;  %s7647_s26 = sld [smem:[#allocation43_spill]] }
0x141d   : > { %s7648_s9 = sld [smem:[#allocation76_spill]]  ;;  %s3478_s12 = sshll.u32 %s6809_s16, 4  ;;  %s3479_s12 = int_to_ptr.vmem [resolvable:$true] %s3478_s12 }
0x141e   : > { %s3465_s5 = scalar_lea.sflag [#allocation5], %s6713_s8  ;;  %s5916_s22 = scalar_lea.vmem %s3479_s12, 128 }
0x141f   : > { %p5917_p4 = scmp.ne.s32.totalorder %s3479_s12, %s5916_s22  ;;  %s6079_s24 = smov [#allocation21]  }
0x1420   : > { %s5920_s13 = sshll.u32 %s6079_s24, 4  ;;  %s5921_s13 = int_to_ptr.vmem [resolvable:$false] %s5920_s13 }
0x1421   : > { %s5922_s14 = scalar_lea.vmem %s5921_s13, 256  ;;  %p5923_p11 = scmp.lt.s32.totalorder %s3479_s12, %s5921_s13 }
0x1422   : > { %s4051_s15 = sshll.u32 %s7646_s18, 7  ;;  %p7649_p9 = scmp.ne.s32.totalorder %s7647_s26, 0 }
0x1423   : > { %s7366_s30 = scalar_lea.hbm %s7648_s9, %s4051_s15  ;;  %p5924_p5 = scmp.lt.s32.totalorder %s5922_s14, %s5916_s22 }
0x1424   : > { %p5918_p0 = pnand %p5917_p4, %p7649_p9 }
0x1425   : > { %p5925_p3 = por %p5924_p5, %p5923_p11 }
0x1426   : > { %p5919_p8 = pneg %p5918_p0 }
0x1428   : > { %p5926_p10 = pnand %p5925_p3, %p5919_p8 }
0x142a   : > { %5929 = shalt.err (!%p5926_p10)
}
0x142b   : > { %s5930_s8 = scalar_lea.hbm %s7366_s30, 128  ;;  %s5934_s11 = scalar_lea.hbm %s7648_s9, 256 }
0x142c   : > { %p5931_p13 = scmp.ne.s32.totalorder %s7366_s30, %s5930_s8  ;;  %p5935_p12 = scmp.lt.u32.totalorder %s7366_s30, %s7648_s9 }
0x142d   : > { %p5936_p2 = scmp.lt.u32.totalorder %s5934_s11, %s5930_s8  ;;  %p5938_p4 = scmp.lt.u32.totalorder %s5930_s8, %s7366_s30 }
0x142e   : > { %p5932_p1 = pnand %p5931_p13, %p7649_p9 }
0x142f   : > { %p5937_p7 = por %p5936_p2, %p5935_p12 }
0x1430   : > { %p5933_p6 = pneg %p5932_p1 }
0x1431   : > { %p5939_p0 = por %p5938_p4, %p5937_p7 }
0x1433   : > { %p5940_p8 = pnand %p5939_p0, %p5933_p6 }
0x1435   : > { %5943 = shalt.err (!%p5940_p8)
}
0x1436   : > { %5420 = dma.vmem_to_hbm [thread:$0]  (%p7649_p9), %s3479_s12, 128, %s7366_s30, %s3465_s5  }
0x1437 PF: > { %s7650_s23 = sld [smem:[#allocation38_spill]]  ;;  %s7651_s17 = sld [smem:[#allocation31_spill]] }
0x1438   : > { %s7652_s4 = sld [smem:[#allocation50_spill]] }
0x143d   : > { %p5470_p11 = scmp.ge.s32.totalorder %s7650_s23, 2  ;;  %s3490_s20 = sand.u32 1, %s7651_s17  }
0x143e   : > { %p7653_p5 = scmp.ne.s32.totalorder %s7652_s4, 0  ;;  %s3491_s10 = scalar_lea.sflag [#allocation5], %s3490_s20 }
0x1440   : > { %p5458_p3 = pnand %p5470_p11, %p7653_p5 }
0x1442   : > { %6013 = dma.done.wait (!%p5458_p3), %s3491_s10, 128  }
0x1443   : > { %6015 = vsyncadd (!%p5458_p3), %s3491_s10, 4294967168  ;;  %s48_s5 = sadd.s32 1, %s7650_s23   ;;  %s7654_s2 = sld [smem:[#allocation29_spill]] }
0x1444   : > { %p45_p10 = scmp.ge.s32.totalorder %s48_s5, 6   ;;  %s7655_s25 = sld [smem:[#allocation30_spill]] }
0x1445   : > { %s7656_s26 = sld [smem:[#allocation48_spill]]  ;;  %s7657_s27 = sld [smem:[#allocation32_spill]] }
0x1446   : > { %s7658_s3 = sld [smem:[#allocation33_spill]]  ;;  %s7659_s28 = sld [smem:[#allocation49_spill]] }
0x1447   : > { %s7660_s29 = sld [smem:[#allocation36_spill]]  ;;  %s7661_s0 = sld [smem:[#allocation37_spill]] }
0x1448   : > { %s7662_s4 = sld [smem:[#allocation46_spill]]  ;;  %s7663_s30 = sld [smem:[#allocation47_spill]] }
0x1449   :  { %47 = sbr.rel (!%p45_p10) target bundleno = 40 (0x28), region = 293 }
0x1450   :  { %3496 = vsyncpa [#allocation4], 1 }
0x1451   :  { %3498 = vsyncpa [#allocation4 + $0x1], 1 }
0x1452   :  { %3499 = vsyncpa [#allocation7], 1 }
0x1453   :  { %3500 = vsyncpa [#allocation10], 1 }
0x1454   :  { %3501 = vsyncpa [#allocation13], 1 }
0x1455   :  { %3503 = vsyncpa [#allocation13 + $0x1], 1 }
0x1456   :  { %3504 = vsyncpa [#allocation16], 1 }
0x1457   :  { %3506 = vsyncpa [#allocation16 + $0x1], 1 }
0x1458   :  { %3507 = vsyncpa [#allocation19], 1 }
0x1459   :  { %3509 = vsyncpa [#allocation19 + $0x1], 1 }
0x145a   :  { %3510 = vsyncpa [#allocation5], 1 }
0x145b   :  { %3512 = vsyncpa [#allocation5 + $0x1], 1 }

</bundles_post_ra>
